<compile_context>
chip_gen: v7x
topology: tpu7x:2x2x1
jax: 0.10.0
libtpu: 0.0.40
codegen_flags: <defaults>
</compile_context>

<pallas_src>
import jax
import jax.numpy as jnp
from jax.experimental import pallas as pl
from jax.experimental.pallas import tpu as pltpu

EPS = 1e-5            # nn.BatchNorm1d default eps
C = 64                # hidden channel width of the ResNet
KERNEL_SIZES = (7, 5, 3)
NUM_BLOCKS = 3


# ---------------------------------------------------------------------------
# Fused Pallas kernel (whole network)
# ---------------------------------------------------------------------------
def _make_fused_resnet(B, L, out_dim, batch_tiles=1):
    """Build the fused pallas_call: 9x(conv+BN+ReLU) + residuals + GAP + Linear."""
    assert B % batch_tiles == 0
    Bt = B // batch_tiles
    layer_ks = KERNEL_SIZES * NUM_BLOCKS
    n_layers = len(layer_ks)

    def kernel(x_ref, *refs):
        w_refs = refs[:n_layers]                     # folded (K*C, C) im2col weights
        sh_refs = refs[n_layers:2 * n_layers]        # folded (1, C) shifts
        lw_ref = refs[2 * n_layers]                  # (C, out_dim)
        lb_ref = refs[2 * n_layers + 1]              # (1, out_dim)
        out_ref = refs[2 * n_layers + 2]             # (Bt, out_dim)

        x = x_ref[...].astype(jnp.float32)           # (Bt, L, 1)
        # torch.cat([x]*64, dim=1) residual == channel broadcast of the input.
        h = jnp.broadcast_to(x, (Bt, L, C))          # (Bt, L, C)
        residual = h.reshape(Bt * L, C)

        li = 0
        for _blk in range(NUM_BLOCKS):
            for j, K in enumerate(KERNEL_SIZES):
                pad = K // 2
                # 'same' halo built as values in VMEM (no HBM padded copies).
                zp = jnp.zeros((Bt, pad, C), jnp.float32)
                hp = jnp.concatenate([zp, h, zp], axis=1)         # (Bt, L+2p, C)
                # im2col: lane-concatenate the K shifted tap slices.
                cols = [hp[:, k:k + L, :].reshape(Bt * L, C) for k in range(K)]
                m = jnp.concatenate(cols, axis=-1)                # (Bt*L, K*C)
                # One MXU contraction per layer; BN scale pre-folded into w.
                y = jnp.dot(m, w_refs[li][...],
                            preferred_element_type=jnp.float32)   # (Bt*L, C)
                y = jnp.maximum(y + sh_refs[li][...], 0.0)        # bias/BN shift + ReLU
                if j == len(KERNEL_SIZES) - 1:                    # end of res-block
                    y = y + residual
                    residual = y
                h = y.reshape(Bt, L, C)
                li += 1

        # Fused head: AvgPool1d over full length + Linear(C -> out_dim).
        g = jnp.mean(h, axis=1)                                   # (Bt, C)
        out = jnp.dot(g, lw_ref[...],
                      preferred_element_type=jnp.float32) + lb_ref[...]
        out_ref[...] = out.astype(out_ref.dtype)

    in_specs = [pl.BlockSpec((Bt, L, 1), lambda i: (i, 0, 0))]
    for K in layer_ks:
        in_specs.append(pl.BlockSpec((K * C, C), lambda i: (0, 0)))
    for _ in layer_ks:
        in_specs.append(pl.BlockSpec((1, C), lambda i: (0, 0)))
    in_specs.append(pl.BlockSpec((C, out_dim), lambda i: (0, 0)))
    in_specs.append(pl.BlockSpec((1, out_dim), lambda i: (0, 0)))

    return pl.pallas_call(
        kernel,
        out_shape=jax.ShapeDtypeStruct((B, out_dim), jnp.float32),
        grid=(batch_tiles,),
        in_specs=in_specs,
        out_specs=pl.BlockSpec((Bt, out_dim), lambda i: (i, 0)),
        compiler_params=pltpu.CompilerParams(
            # "parallel" batch axis: on v7x use batch_tiles=2 to engage both
            # TensorCores; on v5e/v6e (1 TC) batch_tiles=1 keeps M=B*L maximal.
            dimension_semantics=("parallel",),
        ),
    )


# ---------------------------------------------------------------------------
# Parameters (deterministic, synthetic) and host-side weight folding
# ---------------------------------------------------------------------------
def init_params(key, out_dim=1):
    blocks = []
    for blk in range(NUM_BLOCKS):
        layers = []
        for li, K in enumerate(KERNEL_SIZES):
            cin = 1 if (blk == 0 and li == 0) else C
            key, kw, kb, kg, kbe, km, kv = jax.random.split(key, 7)
            layers.append(dict(
                w=0.1 * jax.random.normal(kw, (C, cin, K), jnp.float32),  # torch (Cout,Cin,K)
                b=0.1 * jax.random.normal(kb, (C,), jnp.float32),
                gamma=1.0 + 0.1 * jax.random.normal(kg, (C,), jnp.float32),
                beta=0.1 * jax.random.normal(kbe, (C,), jnp.float32),
                mean=0.1 * jax.random.normal(km, (C,), jnp.float32),
                var=1.0 + 0.1 * jnp.abs(jax.random.normal(kv, (C,), jnp.float32)),
            ))
        blocks.append(layers)
    key, kw, kb = jax.random.split(key, 3)
    return dict(
        blocks=blocks,
        lin_w=0.1 * jax.random.normal(kw, (out_dim, C), jnp.float32),      # torch (out, in)
        lin_b=0.1 * jax.random.normal(kb, (out_dim,), jnp.float32),
    )


def _fold_layer(layer):
    """Fold BN (eval mode) + conv bias into an im2col weight and a shift.

    BN(conv(x) + b) = scale*conv(x) + [scale*(b - mean) + beta]
    with scale = gamma / sqrt(var + eps).  scale is folded into the conv
    weights, so the in-kernel epilogue is just `+ shift; relu`.
    """
    scale = layer["gamma"] / jnp.sqrt(layer["var"] + EPS)                 # (C,)
    shift = (layer["b"] - layer["mean"]) * scale + layer["beta"]          # (C,)
    w = layer["w"]                                                        # (Cout, Cin, K)
    cout, cin, K = w.shape
    w_kic = jnp.transpose(w, (2, 1, 0)) * scale[None, None, :]            # (K, Cin, Cout)
    if cin == 1:
        # Lift the 1-channel first layer onto the 64-channel im2col path:
        # only channel slot 0 carries the weight (input is channel-broadcast).
        w_full = jnp.zeros((K, C, cout), w.dtype).at[:, 0, :].set(w_kic[:, 0, :])
    else:
        w_full = w_kic
    return w_full.reshape(K * C, cout), shift.reshape(1, cout)


def resnet_forward(params, x_ncl, out_dim=1, batch_tiles=1):
    # TODO(synk): BatchNorm1d is implemented in eval mode (folded running
    # stats); training-mode batch statistics are not implemented.
    B, _, L = x_ncl.shape
    x = jnp.transpose(x_ncl, (0, 2, 1))                                   # (B, L, 1)
    ws, shs = [], []
    for layers in params["blocks"]:
        for layer in layers:
            w, s = _fold_layer(layer)
            ws.append(w)
            shs.append(s)
    lin_w = params["lin_w"].T                                             # (C, out_dim)
    lin_b = params["lin_b"].reshape(1, out_dim)
    call = _make_fused_resnet(B, L, out_dim, batch_tiles=batch_tiles)
    return call(x, *ws, *shs, lin_w, lin_b)


# ---------------------------------------------------------------------------
# Pure-JAX reference (mirrors the PyTorch forward) for validation
# ---------------------------------------------------------------------------
def reference_forward(params, x_ncl):
    def conv_bn_relu(h, layer):
        K = layer["w"].shape[-1]
        pad = K // 2
        y = jax.lax.conv_general_dilated(
            h, layer["w"], window_strides=(1,), padding=[(pad, pad)],
            dimension_numbers=("NCH", "OIH", "NCH"))
        y = y + layer["b"][None, :, None]
        y = (y - layer["mean"][None, :, None]) / jnp.sqrt(layer["var"][None, :, None] + EPS)
        y = y * layer["gamma"][None, :, None] + layer["beta"][None, :, None]
        return jnp.maximum(y, 0.0)

    h = x_ncl
    for blk_idx, layers in enumerate(params["blocks"]):
        res = jnp.concatenate([h] * C, axis=1) if blk_idx == 0 else h
        y = h
        for layer in layers:
            y = conv_bn_relu(y, layer)
        h = y + res
    g = jnp.mean(h, axis=-1)                          # AvgPool1d(L) + squeeze
    return g @ params["lin_w"].T + params["lin_b"]


if __name__ == "__main__":
    B, L, OUT_DIM = 2, 16, 1
    key = jax.random.PRNGKey(0)
    key, kp, kx = jax.random.split(key, 3)
    params = init_params(kp, OUT_DIM)
    x = jax.random.normal(kx, (B, 1, L), jnp.float32)   # PyTorch NCL input (B,1,L)

    fwd = jax.jit(lambda p, xx: resnet_forward(p, xx, OUT_DIM, batch_tiles=1))
    out = jax.block_until_ready(fwd(params, x))

    ref = reference_forward(params, x)
    assert out.shape == (B, OUT_DIM), out.shape
    assert jnp.allclose(out, ref, rtol=2e-3, atol=2e-3), (out, ref)
    print("KERNEL_OK")
</pallas_src>

<mosaic_0001>
module attributes {stable_mosaic.version = 11 : i64} {
  func.func @kernel(%arg0: i32, %arg1: memref<2x16x1xf32, #tpu.memory_space<vmem>>, %arg2: memref<448x64xf32, #tpu.memory_space<vmem>>, %arg3: memref<320x64xf32, #tpu.memory_space<vmem>>, %arg4: memref<192x64xf32, #tpu.memory_space<vmem>>, %arg5: memref<448x64xf32, #tpu.memory_space<vmem>>, %arg6: memref<320x64xf32, #tpu.memory_space<vmem>>, %arg7: memref<192x64xf32, #tpu.memory_space<vmem>>, %arg8: memref<448x64xf32, #tpu.memory_space<vmem>>, %arg9: memref<320x64xf32, #tpu.memory_space<vmem>>, %arg10: memref<192x64xf32, #tpu.memory_space<vmem>>, %arg11: memref<1x64xf32, #tpu.memory_space<vmem>>, %arg12: memref<1x64xf32, #tpu.memory_space<vmem>>, %arg13: memref<1x64xf32, #tpu.memory_space<vmem>>, %arg14: memref<1x64xf32, #tpu.memory_space<vmem>>, %arg15: memref<1x64xf32, #tpu.memory_space<vmem>>, %arg16: memref<1x64xf32, #tpu.memory_space<vmem>>, %arg17: memref<1x64xf32, #tpu.memory_space<vmem>>, %arg18: memref<1x64xf32, #tpu.memory_space<vmem>>, %arg19: memref<1x64xf32, #tpu.memory_space<vmem>>, %arg20: memref<64x1xf32, #tpu.memory_space<vmem>>, %arg21: memref<1x1xf32, #tpu.memory_space<vmem>>, %arg22: memref<2x1xf32, #tpu.memory_space<vmem>>) attributes {dimension_semantics = [#tpu.dimension_semantics<parallel>], iteration_bounds = array<i64: 1>, scalar_prefetch = 0 : i64, scratch_operands = 0 : i64, tpu.core_type = #tpu.core_type<tc>, window_params = [{transform_indices = @transform_0, window_bounds = array<i64: 2, 16, 1>}, {pipeline_mode = #tpu.pipeline_mode<synchronous>, transform_indices = @transform_1, window_bounds = array<i64: 448, 64>}, {pipeline_mode = #tpu.pipeline_mode<synchronous>, transform_indices = @transform_2, window_bounds = array<i64: 320, 64>}, {pipeline_mode = #tpu.pipeline_mode<synchronous>, transform_indices = @transform_3, window_bounds = array<i64: 192, 64>}, {pipeline_mode = #tpu.pipeline_mode<synchronous>, transform_indices = @transform_4, window_bounds = array<i64: 448, 64>}, {pipeline_mode = #tpu.pipeline_mode<synchronous>, transform_indices = @transform_5, window_bounds = array<i64: 320, 64>}, {pipeline_mode = #tpu.pipeline_mode<synchronous>, transform_indices = @transform_6, window_bounds = array<i64: 192, 64>}, {pipeline_mode = #tpu.pipeline_mode<synchronous>, transform_indices = @transform_7, window_bounds = array<i64: 448, 64>}, {pipeline_mode = #tpu.pipeline_mode<synchronous>, transform_indices = @transform_8, window_bounds = array<i64: 320, 64>}, {pipeline_mode = #tpu.pipeline_mode<synchronous>, transform_indices = @transform_9, window_bounds = array<i64: 192, 64>}, {pipeline_mode = #tpu.pipeline_mode<synchronous>, transform_indices = @transform_10, window_bounds = array<i64: 1, 64>}, {pipeline_mode = #tpu.pipeline_mode<synchronous>, transform_indices = @transform_11, window_bounds = array<i64: 1, 64>}, {pipeline_mode = #tpu.pipeline_mode<synchronous>, transform_indices = @transform_12, window_bounds = array<i64: 1, 64>}, {pipeline_mode = #tpu.pipeline_mode<synchronous>, transform_indices = @transform_13, window_bounds = array<i64: 1, 64>}, {pipeline_mode = #tpu.pipeline_mode<synchronous>, transform_indices = @transform_14, window_bounds = array<i64: 1, 64>}, {pipeline_mode = #tpu.pipeline_mode<synchronous>, transform_indices = @transform_15, window_bounds = array<i64: 1, 64>}, {pipeline_mode = #tpu.pipeline_mode<synchronous>, transform_indices = @transform_16, window_bounds = array<i64: 1, 64>}, {pipeline_mode = #tpu.pipeline_mode<synchronous>, transform_indices = @transform_17, window_bounds = array<i64: 1, 64>}, {pipeline_mode = #tpu.pipeline_mode<synchronous>, transform_indices = @transform_18, window_bounds = array<i64: 1, 64>}, {pipeline_mode = #tpu.pipeline_mode<synchronous>, transform_indices = @transform_19, window_bounds = array<i64: 64, 1>}, {pipeline_mode = #tpu.pipeline_mode<synchronous>, transform_indices = @transform_20, window_bounds = array<i64: 1, 1>}, {transform_indices = @transform_21, window_bounds = array<i64: 2, 1>}]} {
    %c0 = arith.constant 0 : index
    %c0_0 = arith.constant 0 : index
    %c0_1 = arith.constant 0 : index
    %0 = vector.load %arg1[%c0, %c0_0, %c0_1] : memref<2x16x1xf32, #tpu.memory_space<vmem>>, vector<2x16x1xf32>
    %1 = vector.shape_cast %0 : vector<2x16x1xf32> to vector<2x16x1xf32>
    %2 = vector.broadcast %1 : vector<2x16x1xf32> to vector<2x16x64xf32>
    %3 = vector.shape_cast %2 : vector<2x16x64xf32> to vector<32x64xf32>
    %cst = arith.constant 0.000000e+00 : f32
    %4 = vector.broadcast %cst : f32 to vector<2x3x64xf32>
    %5 = tpu.concatenate %4, %2, %4 in 1 : vector<2x3x64xf32>, vector<2x16x64xf32>, vector<2x3x64xf32> -> vector<2x22x64xf32>
    %6 = vector.extract_strided_slice %5 {offsets = [0, 0, 0], sizes = [2, 16, 64], strides = [1, 1, 1]} : vector<2x22x64xf32> to vector<2x16x64xf32>
    %7 = vector.shape_cast %6 : vector<2x16x64xf32> to vector<32x64xf32>
    %8 = vector.extract_strided_slice %5 {offsets = [0, 1, 0], sizes = [2, 16, 64], strides = [1, 1, 1]} : vector<2x22x64xf32> to vector<2x16x64xf32>
    %9 = vector.shape_cast %8 : vector<2x16x64xf32> to vector<32x64xf32>
    %10 = vector.extract_strided_slice %5 {offsets = [0, 2, 0], sizes = [2, 16, 64], strides = [1, 1, 1]} : vector<2x22x64xf32> to vector<2x16x64xf32>
    %11 = vector.shape_cast %10 : vector<2x16x64xf32> to vector<32x64xf32>
    %12 = vector.extract_strided_slice %5 {offsets = [0, 3, 0], sizes = [2, 16, 64], strides = [1, 1, 1]} : vector<2x22x64xf32> to vector<2x16x64xf32>
    %13 = vector.shape_cast %12 : vector<2x16x64xf32> to vector<32x64xf32>
    %14 = vector.extract_strided_slice %5 {offsets = [0, 4, 0], sizes = [2, 16, 64], strides = [1, 1, 1]} : vector<2x22x64xf32> to vector<2x16x64xf32>
    %15 = vector.shape_cast %14 : vector<2x16x64xf32> to vector<32x64xf32>
    %16 = vector.extract_strided_slice %5 {offsets = [0, 5, 0], sizes = [2, 16, 64], strides = [1, 1, 1]} : vector<2x22x64xf32> to vector<2x16x64xf32>
    %17 = vector.shape_cast %16 : vector<2x16x64xf32> to vector<32x64xf32>
    %18 = vector.extract_strided_slice %5 {offsets = [0, 6, 0], sizes = [2, 16, 64], strides = [1, 1, 1]} : vector<2x22x64xf32> to vector<2x16x64xf32>
    %19 = vector.shape_cast %18 : vector<2x16x64xf32> to vector<32x64xf32>
    %20 = tpu.concatenate %7, %9, %11, %13, %15, %17, %19 in 1 : vector<32x64xf32>, vector<32x64xf32>, vector<32x64xf32>, vector<32x64xf32>, vector<32x64xf32>, vector<32x64xf32>, vector<32x64xf32> -> vector<32x448xf32>
    %c0_2 = arith.constant 0 : index
    %c0_3 = arith.constant 0 : index
    %21 = vector.load %arg2[%c0_2, %c0_3] : memref<448x64xf32, #tpu.memory_space<vmem>>, vector<448x64xf32>
    %cst_4 = arith.constant dense<0.000000e+00> : vector<32x64xf32>
    %22 = tpu.matmul %20, %21, %cst_4 {dimension_numbers = #tpu.dot_dimension_numbers<[1], [0], [0], [1], [0, 0, 1, 1], [], []>} : vector<32x448xf32>, vector<448x64xf32>, vector<32x64xf32> -> vector<32x64xf32>
    %c0_5 = arith.constant 0 : index
    %c0_6 = arith.constant 0 : index
    %23 = vector.load %arg11[%c0_5, %c0_6] : memref<1x64xf32, #tpu.memory_space<vmem>>, vector<1x64xf32>
    %24 = vector.broadcast %23 : vector<1x64xf32> to vector<32x64xf32>
    %25 = arith.addf %22, %24 : vector<32x64xf32>
    %cst_7 = arith.constant 0.000000e+00 : f32
    %26 = vector.broadcast %cst_7 : f32 to vector<32x64xf32>
    %27 = arith.maximumf %25, %26 : vector<32x64xf32>
    %28 = vector.shape_cast %27 : vector<32x64xf32> to vector<2x16x64xf32>
    %cst_8 = arith.constant 0.000000e+00 : f32
    %29 = vector.broadcast %cst_8 : f32 to vector<2x2x64xf32>
    %30 = tpu.concatenate %29, %28, %29 in 1 : vector<2x2x64xf32>, vector<2x16x64xf32>, vector<2x2x64xf32> -> vector<2x20x64xf32>
    %31 = vector.extract_strided_slice %30 {offsets = [0, 0, 0], sizes = [2, 16, 64], strides = [1, 1, 1]} : vector<2x20x64xf32> to vector<2x16x64xf32>
    %32 = vector.shape_cast %31 : vector<2x16x64xf32> to vector<32x64xf32>
    %33 = vector.extract_strided_slice %30 {offsets = [0, 1, 0], sizes = [2, 16, 64], strides = [1, 1, 1]} : vector<2x20x64xf32> to vector<2x16x64xf32>
    %34 = vector.shape_cast %33 : vector<2x16x64xf32> to vector<32x64xf32>
    %35 = vector.extract_strided_slice %30 {offsets = [0, 2, 0], sizes = [2, 16, 64], strides = [1, 1, 1]} : vector<2x20x64xf32> to vector<2x16x64xf32>
    %36 = vector.shape_cast %35 : vector<2x16x64xf32> to vector<32x64xf32>
    %37 = vector.extract_strided_slice %30 {offsets = [0, 3, 0], sizes = [2, 16, 64], strides = [1, 1, 1]} : vector<2x20x64xf32> to vector<2x16x64xf32>
    %38 = vector.shape_cast %37 : vector<2x16x64xf32> to vector<32x64xf32>
    %39 = vector.extract_strided_slice %30 {offsets = [0, 4, 0], sizes = [2, 16, 64], strides = [1, 1, 1]} : vector<2x20x64xf32> to vector<2x16x64xf32>
    %40 = vector.shape_cast %39 : vector<2x16x64xf32> to vector<32x64xf32>
    %41 = tpu.concatenate %32, %34, %36, %38, %40 in 1 : vector<32x64xf32>, vector<32x64xf32>, vector<32x64xf32>, vector<32x64xf32>, vector<32x64xf32> -> vector<32x320xf32>
    %c0_9 = arith.constant 0 : index
    %c0_10 = arith.constant 0 : index
    %42 = vector.load %arg3[%c0_9, %c0_10] : memref<320x64xf32, #tpu.memory_space<vmem>>, vector<320x64xf32>
    %cst_11 = arith.constant dense<0.000000e+00> : vector<32x64xf32>
    %43 = tpu.matmul %41, %42, %cst_11 {dimension_numbers = #tpu.dot_dimension_numbers<[1], [0], [0], [1], [0, 0, 1, 1], [], []>} : vector<32x320xf32>, vector<320x64xf32>, vector<32x64xf32> -> vector<32x64xf32>
    %c0_12 = arith.constant 0 : index
    %c0_13 = arith.constant 0 : index
    %44 = vector.load %arg12[%c0_12, %c0_13] : memref<1x64xf32, #tpu.memory_space<vmem>>, vector<1x64xf32>
    %45 = vector.broadcast %44 : vector<1x64xf32> to vector<32x64xf32>
    %46 = arith.addf %43, %45 : vector<32x64xf32>
    %cst_14 = arith.constant 0.000000e+00 : f32
    %47 = vector.broadcast %cst_14 : f32 to vector<32x64xf32>
    %48 = arith.maximumf %46, %47 : vector<32x64xf32>
    %49 = vector.shape_cast %48 : vector<32x64xf32> to vector<2x16x64xf32>
    %cst_15 = arith.constant 0.000000e+00 : f32
    %50 = vector.broadcast %cst_15 : f32 to vector<2x1x64xf32>
    %51 = tpu.concatenate %50, %49, %50 in 1 : vector<2x1x64xf32>, vector<2x16x64xf32>, vector<2x1x64xf32> -> vector<2x18x64xf32>
    %52 = vector.extract_strided_slice %51 {offsets = [0, 0, 0], sizes = [2, 16, 64], strides = [1, 1, 1]} : vector<2x18x64xf32> to vector<2x16x64xf32>
    %53 = vector.shape_cast %52 : vector<2x16x64xf32> to vector<32x64xf32>
    %54 = vector.extract_strided_slice %51 {offsets = [0, 1, 0], sizes = [2, 16, 64], strides = [1, 1, 1]} : vector<2x18x64xf32> to vector<2x16x64xf32>
    %55 = vector.shape_cast %54 : vector<2x16x64xf32> to vector<32x64xf32>
    %56 = vector.extract_strided_slice %51 {offsets = [0, 2, 0], sizes = [2, 16, 64], strides = [1, 1, 1]} : vector<2x18x64xf32> to vector<2x16x64xf32>
    %57 = vector.shape_cast %56 : vector<2x16x64xf32> to vector<32x64xf32>
    %58 = tpu.concatenate %53, %55, %57 in 1 : vector<32x64xf32>, vector<32x64xf32>, vector<32x64xf32> -> vector<32x192xf32>
    %c0_16 = arith.constant 0 : index
    %c0_17 = arith.constant 0 : index
    %59 = vector.load %arg4[%c0_16, %c0_17] : memref<192x64xf32, #tpu.memory_space<vmem>>, vector<192x64xf32>
    %cst_18 = arith.constant dense<0.000000e+00> : vector<32x64xf32>
    %60 = tpu.matmul %58, %59, %cst_18 {dimension_numbers = #tpu.dot_dimension_numbers<[1], [0], [0], [1], [0, 0, 1, 1], [], []>} : vector<32x192xf32>, vector<192x64xf32>, vector<32x64xf32> -> vector<32x64xf32>
    %c0_19 = arith.constant 0 : index
    %c0_20 = arith.constant 0 : index
    %61 = vector.load %arg13[%c0_19, %c0_20] : memref<1x64xf32, #tpu.memory_space<vmem>>, vector<1x64xf32>
    %62 = vector.broadcast %61 : vector<1x64xf32> to vector<32x64xf32>
    %63 = arith.addf %60, %62 : vector<32x64xf32>
    %cst_21 = arith.constant 0.000000e+00 : f32
    %64 = vector.broadcast %cst_21 : f32 to vector<32x64xf32>
    %65 = arith.maximumf %63, %64 : vector<32x64xf32>
    %66 = arith.addf %65, %3 : vector<32x64xf32>
    %67 = vector.shape_cast %66 : vector<32x64xf32> to vector<2x16x64xf32>
    %cst_22 = arith.constant 0.000000e+00 : f32
    %68 = vector.broadcast %cst_22 : f32 to vector<2x3x64xf32>
    %69 = tpu.concatenate %68, %67, %68 in 1 : vector<2x3x64xf32>, vector<2x16x64xf32>, vector<2x3x64xf32> -> vector<2x22x64xf32>
    %70 = vector.extract_strided_slice %69 {offsets = [0, 0, 0], sizes = [2, 16, 64], strides = [1, 1, 1]} : vector<2x22x64xf32> to vector<2x16x64xf32>
    %71 = vector.shape_cast %70 : vector<2x16x64xf32> to vector<32x64xf32>
    %72 = vector.extract_strided_slice %69 {offsets = [0, 1, 0], sizes = [2, 16, 64], strides = [1, 1, 1]} : vector<2x22x64xf32> to vector<2x16x64xf32>
    %73 = vector.shape_cast %72 : vector<2x16x64xf32> to vector<32x64xf32>
    %74 = vector.extract_strided_slice %69 {offsets = [0, 2, 0], sizes = [2, 16, 64], strides = [1, 1, 1]} : vector<2x22x64xf32> to vector<2x16x64xf32>
    %75 = vector.shape_cast %74 : vector<2x16x64xf32> to vector<32x64xf32>
    %76 = vector.extract_strided_slice %69 {offsets = [0, 3, 0], sizes = [2, 16, 64], strides = [1, 1, 1]} : vector<2x22x64xf32> to vector<2x16x64xf32>
    %77 = vector.shape_cast %76 : vector<2x16x64xf32> to vector<32x64xf32>
    %78 = vector.extract_strided_slice %69 {offsets = [0, 4, 0], sizes = [2, 16, 64], strides = [1, 1, 1]} : vector<2x22x64xf32> to vector<2x16x64xf32>
    %79 = vector.shape_cast %78 : vector<2x16x64xf32> to vector<32x64xf32>
    %80 = vector.extract_strided_slice %69 {offsets = [0, 5, 0], sizes = [2, 16, 64], strides = [1, 1, 1]} : vector<2x22x64xf32> to vector<2x16x64xf32>
    %81 = vector.shape_cast %80 : vector<2x16x64xf32> to vector<32x64xf32>
    %82 = vector.extract_strided_slice %69 {offsets = [0, 6, 0], sizes = [2, 16, 64], strides = [1, 1, 1]} : vector<2x22x64xf32> to vector<2x16x64xf32>
    %83 = vector.shape_cast %82 : vector<2x16x64xf32> to vector<32x64xf32>
    %84 = tpu.concatenate %71, %73, %75, %77, %79, %81, %83 in 1 : vector<32x64xf32>, vector<32x64xf32>, vector<32x64xf32>, vector<32x64xf32>, vector<32x64xf32>, vector<32x64xf32>, vector<32x64xf32> -> vector<32x448xf32>
    %c0_23 = arith.constant 0 : index
    %c0_24 = arith.constant 0 : index
    %85 = vector.load %arg5[%c0_23, %c0_24] : memref<448x64xf32, #tpu.memory_space<vmem>>, vector<448x64xf32>
    %cst_25 = arith.constant dense<0.000000e+00> : vector<32x64xf32>
    %86 = tpu.matmul %84, %85, %cst_25 {dimension_numbers = #tpu.dot_dimension_numbers<[1], [0], [0], [1], [0, 0, 1, 1], [], []>} : vector<32x448xf32>, vector<448x64xf32>, vector<32x64xf32> -> vector<32x64xf32>
    %c0_26 = arith.constant 0 : index
    %c0_27 = arith.constant 0 : index
    %87 = vector.load %arg14[%c0_26, %c0_27] : memref<1x64xf32, #tpu.memory_space<vmem>>, vector<1x64xf32>
    %88 = vector.broadcast %87 : vector<1x64xf32> to vector<32x64xf32>
    %89 = arith.addf %86, %88 : vector<32x64xf32>
    %cst_28 = arith.constant 0.000000e+00 : f32
    %90 = vector.broadcast %cst_28 : f32 to vector<32x64xf32>
    %91 = arith.maximumf %89, %90 : vector<32x64xf32>
    %92 = vector.shape_cast %91 : vector<32x64xf32> to vector<2x16x64xf32>
    %cst_29 = arith.constant 0.000000e+00 : f32
    %93 = vector.broadcast %cst_29 : f32 to vector<2x2x64xf32>
    %94 = tpu.concatenate %93, %92, %93 in 1 : vector<2x2x64xf32>, vector<2x16x64xf32>, vector<2x2x64xf32> -> vector<2x20x64xf32>
    %95 = vector.extract_strided_slice %94 {offsets = [0, 0, 0], sizes = [2, 16, 64], strides = [1, 1, 1]} : vector<2x20x64xf32> to vector<2x16x64xf32>
    %96 = vector.shape_cast %95 : vector<2x16x64xf32> to vector<32x64xf32>
    %97 = vector.extract_strided_slice %94 {offsets = [0, 1, 0], sizes = [2, 16, 64], strides = [1, 1, 1]} : vector<2x20x64xf32> to vector<2x16x64xf32>
    %98 = vector.shape_cast %97 : vector<2x16x64xf32> to vector<32x64xf32>
    %99 = vector.extract_strided_slice %94 {offsets = [0, 2, 0], sizes = [2, 16, 64], strides = [1, 1, 1]} : vector<2x20x64xf32> to vector<2x16x64xf32>
    %100 = vector.shape_cast %99 : vector<2x16x64xf32> to vector<32x64xf32>
    %101 = vector.extract_strided_slice %94 {offsets = [0, 3, 0], sizes = [2, 16, 64], strides = [1, 1, 1]} : vector<2x20x64xf32> to vector<2x16x64xf32>
    %102 = vector.shape_cast %101 : vector<2x16x64xf32> to vector<32x64xf32>
    %103 = vector.extract_strided_slice %94 {offsets = [0, 4, 0], sizes = [2, 16, 64], strides = [1, 1, 1]} : vector<2x20x64xf32> to vector<2x16x64xf32>
    %104 = vector.shape_cast %103 : vector<2x16x64xf32> to vector<32x64xf32>
    %105 = tpu.concatenate %96, %98, %100, %102, %104 in 1 : vector<32x64xf32>, vector<32x64xf32>, vector<32x64xf32>, vector<32x64xf32>, vector<32x64xf32> -> vector<32x320xf32>
    %c0_30 = arith.constant 0 : index
    %c0_31 = arith.constant 0 : index
    %106 = vector.load %arg6[%c0_30, %c0_31] : memref<320x64xf32, #tpu.memory_space<vmem>>, vector<320x64xf32>
    %cst_32 = arith.constant dense<0.000000e+00> : vector<32x64xf32>
    %107 = tpu.matmul %105, %106, %cst_32 {dimension_numbers = #tpu.dot_dimension_numbers<[1], [0], [0], [1], [0, 0, 1, 1], [], []>} : vector<32x320xf32>, vector<320x64xf32>, vector<32x64xf32> -> vector<32x64xf32>
    %c0_33 = arith.constant 0 : index
    %c0_34 = arith.constant 0 : index
    %108 = vector.load %arg15[%c0_33, %c0_34] : memref<1x64xf32, #tpu.memory_space<vmem>>, vector<1x64xf32>
    %109 = vector.broadcast %108 : vector<1x64xf32> to vector<32x64xf32>
    %110 = arith.addf %107, %109 : vector<32x64xf32>
    %cst_35 = arith.constant 0.000000e+00 : f32
    %111 = vector.broadcast %cst_35 : f32 to vector<32x64xf32>
    %112 = arith.maximumf %110, %111 : vector<32x64xf32>
    %113 = vector.shape_cast %112 : vector<32x64xf32> to vector<2x16x64xf32>
    %cst_36 = arith.constant 0.000000e+00 : f32
    %114 = vector.broadcast %cst_36 : f32 to vector<2x1x64xf32>
    %115 = tpu.concatenate %114, %113, %114 in 1 : vector<2x1x64xf32>, vector<2x16x64xf32>, vector<2x1x64xf32> -> vector<2x18x64xf32>
    %116 = vector.extract_strided_slice %115 {offsets = [0, 0, 0], sizes = [2, 16, 64], strides = [1, 1, 1]} : vector<2x18x64xf32> to vector<2x16x64xf32>
    %117 = vector.shape_cast %116 : vector<2x16x64xf32> to vector<32x64xf32>
    %118 = vector.extract_strided_slice %115 {offsets = [0, 1, 0], sizes = [2, 16, 64], strides = [1, 1, 1]} : vector<2x18x64xf32> to vector<2x16x64xf32>
    %119 = vector.shape_cast %118 : vector<2x16x64xf32> to vector<32x64xf32>
    %120 = vector.extract_strided_slice %115 {offsets = [0, 2, 0], sizes = [2, 16, 64], strides = [1, 1, 1]} : vector<2x18x64xf32> to vector<2x16x64xf32>
    %121 = vector.shape_cast %120 : vector<2x16x64xf32> to vector<32x64xf32>
    %122 = tpu.concatenate %117, %119, %121 in 1 : vector<32x64xf32>, vector<32x64xf32>, vector<32x64xf32> -> vector<32x192xf32>
    %c0_37 = arith.constant 0 : index
    %c0_38 = arith.constant 0 : index
    %123 = vector.load %arg7[%c0_37, %c0_38] : memref<192x64xf32, #tpu.memory_space<vmem>>, vector<192x64xf32>
    %cst_39 = arith.constant dense<0.000000e+00> : vector<32x64xf32>
    %124 = tpu.matmul %122, %123, %cst_39 {dimension_numbers = #tpu.dot_dimension_numbers<[1], [0], [0], [1], [0, 0, 1, 1], [], []>} : vector<32x192xf32>, vector<192x64xf32>, vector<32x64xf32> -> vector<32x64xf32>
    %c0_40 = arith.constant 0 : index
    %c0_41 = arith.constant 0 : index
    %125 = vector.load %arg16[%c0_40, %c0_41] : memref<1x64xf32, #tpu.memory_space<vmem>>, vector<1x64xf32>
    %126 = vector.broadcast %125 : vector<1x64xf32> to vector<32x64xf32>
    %127 = arith.addf %124, %126 : vector<32x64xf32>
    %cst_42 = arith.constant 0.000000e+00 : f32
    %128 = vector.broadcast %cst_42 : f32 to vector<32x64xf32>
    %129 = arith.maximumf %127, %128 : vector<32x64xf32>
    %130 = arith.addf %129, %66 : vector<32x64xf32>
    %131 = vector.shape_cast %130 : vector<32x64xf32> to vector<2x16x64xf32>
    %cst_43 = arith.constant 0.000000e+00 : f32
    %132 = vector.broadcast %cst_43 : f32 to vector<2x3x64xf32>
    %133 = tpu.concatenate %132, %131, %132 in 1 : vector<2x3x64xf32>, vector<2x16x64xf32>, vector<2x3x64xf32> -> vector<2x22x64xf32>
    %134 = vector.extract_strided_slice %133 {offsets = [0, 0, 0], sizes = [2, 16, 64], strides = [1, 1, 1]} : vector<2x22x64xf32> to vector<2x16x64xf32>
    %135 = vector.shape_cast %134 : vector<2x16x64xf32> to vector<32x64xf32>
    %136 = vector.extract_strided_slice %133 {offsets = [0, 1, 0], sizes = [2, 16, 64], strides = [1, 1, 1]} : vector<2x22x64xf32> to vector<2x16x64xf32>
    %137 = vector.shape_cast %136 : vector<2x16x64xf32> to vector<32x64xf32>
    %138 = vector.extract_strided_slice %133 {offsets = [0, 2, 0], sizes = [2, 16, 64], strides = [1, 1, 1]} : vector<2x22x64xf32> to vector<2x16x64xf32>
    %139 = vector.shape_cast %138 : vector<2x16x64xf32> to vector<32x64xf32>
    %140 = vector.extract_strided_slice %133 {offsets = [0, 3, 0], sizes = [2, 16, 64], strides = [1, 1, 1]} : vector<2x22x64xf32> to vector<2x16x64xf32>
    %141 = vector.shape_cast %140 : vector<2x16x64xf32> to vector<32x64xf32>
    %142 = vector.extract_strided_slice %133 {offsets = [0, 4, 0], sizes = [2, 16, 64], strides = [1, 1, 1]} : vector<2x22x64xf32> to vector<2x16x64xf32>
    %143 = vector.shape_cast %142 : vector<2x16x64xf32> to vector<32x64xf32>
    %144 = vector.extract_strided_slice %133 {offsets = [0, 5, 0], sizes = [2, 16, 64], strides = [1, 1, 1]} : vector<2x22x64xf32> to vector<2x16x64xf32>
    %145 = vector.shape_cast %144 : vector<2x16x64xf32> to vector<32x64xf32>
    %146 = vector.extract_strided_slice %133 {offsets = [0, 6, 0], sizes = [2, 16, 64], strides = [1, 1, 1]} : vector<2x22x64xf32> to vector<2x16x64xf32>
    %147 = vector.shape_cast %146 : vector<2x16x64xf32> to vector<32x64xf32>
    %148 = tpu.concatenate %135, %137, %139, %141, %143, %145, %147 in 1 : vector<32x64xf32>, vector<32x64xf32>, vector<32x64xf32>, vector<32x64xf32>, vector<32x64xf32>, vector<32x64xf32>, vector<32x64xf32> -> vector<32x448xf32>
    %c0_44 = arith.constant 0 : index
    %c0_45 = arith.constant 0 : index
    %149 = vector.load %arg8[%c0_44, %c0_45] : memref<448x64xf32, #tpu.memory_space<vmem>>, vector<448x64xf32>
    %cst_46 = arith.constant dense<0.000000e+00> : vector<32x64xf32>
    %150 = tpu.matmul %148, %149, %cst_46 {dimension_numbers = #tpu.dot_dimension_numbers<[1], [0], [0], [1], [0, 0, 1, 1], [], []>} : vector<32x448xf32>, vector<448x64xf32>, vector<32x64xf32> -> vector<32x64xf32>
    %c0_47 = arith.constant 0 : index
    %c0_48 = arith.constant 0 : index
    %151 = vector.load %arg17[%c0_47, %c0_48] : memref<1x64xf32, #tpu.memory_space<vmem>>, vector<1x64xf32>
    %152 = vector.broadcast %151 : vector<1x64xf32> to vector<32x64xf32>
    %153 = arith.addf %150, %152 : vector<32x64xf32>
    %cst_49 = arith.constant 0.000000e+00 : f32
    %154 = vector.broadcast %cst_49 : f32 to vector<32x64xf32>
    %155 = arith.maximumf %153, %154 : vector<32x64xf32>
    %156 = vector.shape_cast %155 : vector<32x64xf32> to vector<2x16x64xf32>
    %cst_50 = arith.constant 0.000000e+00 : f32
    %157 = vector.broadcast %cst_50 : f32 to vector<2x2x64xf32>
    %158 = tpu.concatenate %157, %156, %157 in 1 : vector<2x2x64xf32>, vector<2x16x64xf32>, vector<2x2x64xf32> -> vector<2x20x64xf32>
    %159 = vector.extract_strided_slice %158 {offsets = [0, 0, 0], sizes = [2, 16, 64], strides = [1, 1, 1]} : vector<2x20x64xf32> to vector<2x16x64xf32>
    %160 = vector.shape_cast %159 : vector<2x16x64xf32> to vector<32x64xf32>
    %161 = vector.extract_strided_slice %158 {offsets = [0, 1, 0], sizes = [2, 16, 64], strides = [1, 1, 1]} : vector<2x20x64xf32> to vector<2x16x64xf32>
    %162 = vector.shape_cast %161 : vector<2x16x64xf32> to vector<32x64xf32>
    %163 = vector.extract_strided_slice %158 {offsets = [0, 2, 0], sizes = [2, 16, 64], strides = [1, 1, 1]} : vector<2x20x64xf32> to vector<2x16x64xf32>
    %164 = vector.shape_cast %163 : vector<2x16x64xf32> to vector<32x64xf32>
    %165 = vector.extract_strided_slice %158 {offsets = [0, 3, 0], sizes = [2, 16, 64], strides = [1, 1, 1]} : vector<2x20x64xf32> to vector<2x16x64xf32>
    %166 = vector.shape_cast %165 : vector<2x16x64xf32> to vector<32x64xf32>
    %167 = vector.extract_strided_slice %158 {offsets = [0, 4, 0], sizes = [2, 16, 64], strides = [1, 1, 1]} : vector<2x20x64xf32> to vector<2x16x64xf32>
    %168 = vector.shape_cast %167 : vector<2x16x64xf32> to vector<32x64xf32>
    %169 = tpu.concatenate %160, %162, %164, %166, %168 in 1 : vector<32x64xf32>, vector<32x64xf32>, vector<32x64xf32>, vector<32x64xf32>, vector<32x64xf32> -> vector<32x320xf32>
    %c0_51 = arith.constant 0 : index
    %c0_52 = arith.constant 0 : index
    %170 = vector.load %arg9[%c0_51, %c0_52] : memref<320x64xf32, #tpu.memory_space<vmem>>, vector<320x64xf32>
    %cst_53 = arith.constant dense<0.000000e+00> : vector<32x64xf32>
    %171 = tpu.matmul %169, %170, %cst_53 {dimension_numbers = #tpu.dot_dimension_numbers<[1], [0], [0], [1], [0, 0, 1, 1], [], []>} : vector<32x320xf32>, vector<320x64xf32>, vector<32x64xf32> -> vector<32x64xf32>
    %c0_54 = arith.constant 0 : index
    %c0_55 = arith.constant 0 : index
    %172 = vector.load %arg18[%c0_54, %c0_55] : memref<1x64xf32, #tpu.memory_space<vmem>>, vector<1x64xf32>
    %173 = vector.broadcast %172 : vector<1x64xf32> to vector<32x64xf32>
    %174 = arith.addf %171, %173 : vector<32x64xf32>
    %cst_56 = arith.constant 0.000000e+00 : f32
    %175 = vector.broadcast %cst_56 : f32 to vector<32x64xf32>
    %176 = arith.maximumf %174, %175 : vector<32x64xf32>
    %177 = vector.shape_cast %176 : vector<32x64xf32> to vector<2x16x64xf32>
    %cst_57 = arith.constant 0.000000e+00 : f32
    %178 = vector.broadcast %cst_57 : f32 to vector<2x1x64xf32>
    %179 = tpu.concatenate %178, %177, %178 in 1 : vector<2x1x64xf32>, vector<2x16x64xf32>, vector<2x1x64xf32> -> vector<2x18x64xf32>
    %180 = vector.extract_strided_slice %179 {offsets = [0, 0, 0], sizes = [2, 16, 64], strides = [1, 1, 1]} : vector<2x18x64xf32> to vector<2x16x64xf32>
    %181 = vector.shape_cast %180 : vector<2x16x64xf32> to vector<32x64xf32>
    %182 = vector.extract_strided_slice %179 {offsets = [0, 1, 0], sizes = [2, 16, 64], strides = [1, 1, 1]} : vector<2x18x64xf32> to vector<2x16x64xf32>
    %183 = vector.shape_cast %182 : vector<2x16x64xf32> to vector<32x64xf32>
    %184 = vector.extract_strided_slice %179 {offsets = [0, 2, 0], sizes = [2, 16, 64], strides = [1, 1, 1]} : vector<2x18x64xf32> to vector<2x16x64xf32>
    %185 = vector.shape_cast %184 : vector<2x16x64xf32> to vector<32x64xf32>
    %186 = tpu.concatenate %181, %183, %185 in 1 : vector<32x64xf32>, vector<32x64xf32>, vector<32x64xf32> -> vector<32x192xf32>
    %c0_58 = arith.constant 0 : index
    %c0_59 = arith.constant 0 : index
    %187 = vector.load %arg10[%c0_58, %c0_59] : memref<192x64xf32, #tpu.memory_space<vmem>>, vector<192x64xf32>
    %cst_60 = arith.constant dense<0.000000e+00> : vector<32x64xf32>
    %188 = tpu.matmul %186, %187, %cst_60 {dimension_numbers = #tpu.dot_dimension_numbers<[1], [0], [0], [1], [0, 0, 1, 1], [], []>} : vector<32x192xf32>, vector<192x64xf32>, vector<32x64xf32> -> vector<32x64xf32>
    %c0_61 = arith.constant 0 : index
    %c0_62 = arith.constant 0 : index
    %189 = vector.load %arg19[%c0_61, %c0_62] : memref<1x64xf32, #tpu.memory_space<vmem>>, vector<1x64xf32>
    %190 = vector.broadcast %189 : vector<1x64xf32> to vector<32x64xf32>
    %191 = arith.addf %188, %190 : vector<32x64xf32>
    %cst_63 = arith.constant 0.000000e+00 : f32
    %192 = vector.broadcast %cst_63 : f32 to vector<32x64xf32>
    %193 = arith.maximumf %191, %192 : vector<32x64xf32>
    %194 = arith.addf %193, %130 : vector<32x64xf32>
    %195 = vector.shape_cast %194 : vector<32x64xf32> to vector<2x16x64xf32>
    %cst_64 = arith.constant dense<0.000000e+00> : vector<2x64xf32>
    %196 = vector.multi_reduction <add>, %195, %cst_64 [1] : vector<2x16x64xf32> to vector<2x64xf32>
    %cst_65 = arith.constant 1.600000e+01 : f32
    %197 = vector.broadcast %cst_65 : f32 to vector<2x64xf32>
    %198 = arith.divf %196, %197 : vector<2x64xf32>
    %c0_66 = arith.constant 0 : index
    %c0_67 = arith.constant 0 : index
    %199 = vector.load %arg20[%c0_66, %c0_67] : memref<64x1xf32, #tpu.memory_space<vmem>>, vector<64x1xf32>
    %cst_68 = arith.constant dense<0.000000e+00> : vector<2x1xf32>
    %200 = tpu.matmul %198, %199, %cst_68 {dimension_numbers = #tpu.dot_dimension_numbers<[1], [0], [0], [1], [0, 0, 1, 1], [], []>} : vector<2x64xf32>, vector<64x1xf32>, vector<2x1xf32> -> vector<2x1xf32>
    %c0_69 = arith.constant 0 : index
    %c0_70 = arith.constant 0 : index
    %201 = vector.load %arg21[%c0_69, %c0_70] : memref<1x1xf32, #tpu.memory_space<vmem>>, vector<1x1xf32>
    %202 = vector.broadcast %201 : vector<1x1xf32> to vector<2x1xf32>
    %203 = arith.addf %200, %202 : vector<2x1xf32>
    %c0_71 = arith.constant 0 : index
    %c0_72 = arith.constant 0 : index
    %204 = vector.load %arg22[%c0_71, %c0_72] : memref<2x1xf32, #tpu.memory_space<vmem>>, vector<2x1xf32>
    tpu.vector_store %arg22[%c0_71, %c0_72], %203 {strides = array<i32>} : memref<2x1xf32, #tpu.memory_space<vmem>>, vector<2x1xf32>,
    return
  }
  func.func @transform_0(%arg0: i32) -> (i32, i32, i32) {
    %c0_i32 = arith.constant 0 : i32
    %c0_i32_0 = arith.constant 0 : i32
    %c0_i32_1 = arith.constant 0 : i32
    return %arg0, %c0_i32, %c0_i32_0 : i32, i32, i32
  }
  func.func @transform_1(%arg0: i32) -> (i32, i32) {
    %c0_i32 = arith.constant 0 : i32
    %c0_i32_0 = arith.constant 0 : i32
    %c0_i32_1 = arith.constant 0 : i32
    return %c0_i32, %c0_i32_0 : i32, i32
  }
  func.func @transform_2(%arg0: i32) -> (i32, i32) {
    %c0_i32 = arith.constant 0 : i32
    %c0_i32_0 = arith.constant 0 : i32
    %c0_i32_1 = arith.constant 0 : i32
    return %c0_i32, %c0_i32_0 : i32, i32
  }
  func.func @transform_3(%arg0: i32) -> (i32, i32) {
    %c0_i32 = arith.constant 0 : i32
    %c0_i32_0 = arith.constant 0 : i32
    %c0_i32_1 = arith.constant 0 : i32
    return %c0_i32, %c0_i32_0 : i32, i32
  }
  func.func @transform_4(%arg0: i32) -> (i32, i32) {
    %c0_i32 = arith.constant 0 : i32
    %c0_i32_0 = arith.constant 0 : i32
    %c0_i32_1 = arith.constant 0 : i32
    return %c0_i32, %c0_i32_0 : i32, i32
  }
  func.func @transform_5(%arg0: i32) -> (i32, i32) {
    %c0_i32 = arith.constant 0 : i32
    %c0_i32_0 = arith.constant 0 : i32
    %c0_i32_1 = arith.constant 0 : i32
    return %c0_i32, %c0_i32_0 : i32, i32
  }
  func.func @transform_6(%arg0: i32) -> (i32, i32) {
    %c0_i32 = arith.constant 0 : i32
    %c0_i32_0 = arith.constant 0 : i32
    %c0_i32_1 = arith.constant 0 : i32
    return %c0_i32, %c0_i32_0 : i32, i32
  }
  func.func @transform_7(%arg0: i32) -> (i32, i32) {
    %c0_i32 = arith.constant 0 : i32
    %c0_i32_0 = arith.constant 0 : i32
    %c0_i32_1 = arith.constant 0 : i32
    return %c0_i32, %c0_i32_0 : i32, i32
  }
  func.func @transform_8(%arg0: i32) -> (i32, i32) {
    %c0_i32 = arith.constant 0 : i32
    %c0_i32_0 = arith.constant 0 : i32
    %c0_i32_1 = arith.constant 0 : i32
    return %c0_i32, %c0_i32_0 : i32, i32
  }
  func.func @transform_9(%arg0: i32) -> (i32, i32) {
    %c0_i32 = arith.constant 0 : i32
    %c0_i32_0 = arith.constant 0 : i32
    %c0_i32_1 = arith.constant 0 : i32
    return %c0_i32, %c0_i32_0 : i32, i32
  }
  func.func @transform_10(%arg0: i32) -> (i32, i32) {
    %c0_i32 = arith.constant 0 : i32
    %c0_i32_0 = arith.constant 0 : i32
    %c0_i32_1 = arith.constant 0 : i32
    return %c0_i32, %c0_i32_0 : i32, i32
  }
  func.func @transform_11(%arg0: i32) -> (i32, i32) {
    %c0_i32 = arith.constant 0 : i32
    %c0_i32_0 = arith.constant 0 : i32
    %c0_i32_1 = arith.constant 0 : i32
    return %c0_i32, %c0_i32_0 : i32, i32
  }
  func.func @transform_12(%arg0: i32) -> (i32, i32) {
    %c0_i32 = arith.constant 0 : i32
    %c0_i32_0 = arith.constant 0 : i32
    %c0_i32_1 = arith.constant 0 : i32
    return %c0_i32, %c0_i32_0 : i32, i32
  }
  func.func @transform_13(%arg0: i32) -> (i32, i32) {
    %c0_i32 = arith.constant 0 : i32
    %c0_i32_0 = arith.constant 0 : i32
    %c0_i32_1 = arith.constant 0 : i32
    return %c0_i32, %c0_i32_0 : i32, i32
  }
  func.func @transform_14(%arg0: i32) -> (i32, i32) {
    %c0_i32 = arith.constant 0 : i32
    %c0_i32_0 = arith.constant 0 : i32
    %c0_i32_1 = arith.constant 0 : i32
    return %c0_i32, %c0_i32_0 : i32, i32
  }
  func.func @transform_15(%arg0: i32) -> (i32, i32) {
    %c0_i32 = arith.constant 0 : i32
    %c0_i32_0 = arith.constant 0 : i32
    %c0_i32_1 = arith.constant 0 : i32
    return %c0_i32, %c0_i32_0 : i32, i32
  }
  func.func @transform_16(%arg0: i32) -> (i32, i32) {
    %c0_i32 = arith.constant 0 : i32
    %c0_i32_0 = arith.constant 0 : i32
    %c0_i32_1 = arith.constant 0 : i32
    return %c0_i32, %c0_i32_0 : i32, i32
  }
  func.func @transform_17(%arg0: i32) -> (i32, i32) {
    %c0_i32 = arith.constant 0 : i32
    %c0_i32_0 = arith.constant 0 : i32
    %c0_i32_1 = arith.constant 0 : i32
    return %c0_i32, %c0_i32_0 : i32, i32
  }
  func.func @transform_18(%arg0: i32) -> (i32, i32) {
    %c0_i32 = arith.constant 0 : i32
    %c0_i32_0 = arith.constant 0 : i32
    %c0_i32_1 = arith.constant 0 : i32
    return %c0_i32, %c0_i32_0 : i32, i32
  }
  func.func @transform_19(%arg0: i32) -> (i32, i32) {
    %c0_i32 = arith.constant 0 : i32
    %c0_i32_0 = arith.constant 0 : i32
    %c0_i32_1 = arith.constant 0 : i32
    return %c0_i32, %c0_i32_0 : i32, i32
  }
  func.func @transform_20(%arg0: i32) -> (i32, i32) {
    %c0_i32 = arith.constant 0 : i32
    %c0_i32_0 = arith.constant 0 : i32
    %c0_i32_1 = arith.constant 0 : i32
    return %c0_i32, %c0_i32_0 : i32, i32
  }
  func.func @transform_21(%arg0: i32) -> (i32, i32) {
    %c0_i32 = arith.constant 0 : i32
    %c0_i32_0 = arith.constant 0 : i32
    return %arg0, %c0_i32 : i32, i32
  }
}

</mosaic_0001>

<bundles_post_ra>
// kernel: _lambda_.1
= control target key start
LH: loop header
LB: loop body
LE: loop exit
PB: predicated region body
PF: predicated region fallthrough
CT: control target
= control target key end

     0   :  { %v3970_v0 = vmov 0   ;;  %v3971_v5 = vmov 0.0|0.0   ;;  %vm94_vm0 = vcmask 1042432   ;;  %vm177_vm1 = vcmask 1041408   ;;  %s5981_s0 = inlined_call_operand.vmem [shape: f32[2,16,1], index: 0, kind: input, shape index: {}]   ;;  %s5982_s1 = inlined_call_operand.vmem [shape: f32[448,64], index: 1, kind: input, shape index: {}]   ;;  %s5983_s2 = inlined_call_operand.vmem [shape: f32[320,64], index: 2, kind: input, shape index: {}]   ;;  %s5984_s10 = inlined_call_operand.vmem [shape: f32[1,64], index: 10, kind: input, shape index: {}]   ;;  %s5985_s3 = inlined_call_operand.vmem [shape: f32[192,64], index: 3, kind: input, shape index: {}]   ;;  %s5986_s11 = inlined_call_operand.vmem [shape: f32[1,64], index: 11, kind: input, shape index: {}]   ;;  %s5987_s4 = inlined_call_operand.vmem [shape: f32[448,64], index: 4, kind: input, shape index: {}]   ;;  %s5988_s12 = inlined_call_operand.vmem [shape: f32[1,64], index: 12, kind: input, shape index: {}]   ;;  %s5989_s5 = inlined_call_operand.vmem [shape: f32[320,64], index: 5, kind: input, shape index: {}]   ;;  %s5990_s13 = inlined_call_operand.vmem [shape: f32[1,64], index: 13, kind: input, shape index: {}]   ;;  %s5991_s6 = inlined_call_operand.vmem [shape: f32[192,64], index: 6, kind: input, shape index: {}]   ;;  %s5992_s14 = inlined_call_operand.vmem [shape: f32[1,64], index: 14, kind: input, shape index: {}]   ;;  %s5993_s7 = inlined_call_operand.vmem [shape: f32[448,64], index: 7, kind: input, shape index: {}]   ;;  %s5994_s15 = inlined_call_operand.vmem [shape: f32[1,64], index: 15, kind: input, shape index: {}]   ;;  %s5995_s8 = inlined_call_operand.vmem [shape: f32[320,64], index: 8, kind: input, shape index: {}]   ;;  %s5996_s16 = inlined_call_operand.vmem [shape: f32[1,64], index: 16, kind: input, shape index: {}]   ;;  %s5997_s9 = inlined_call_operand.vmem [shape: f32[192,64], index: 9, kind: input, shape index: {}]   ;;  %s5998_s17 = inlined_call_operand.vmem [shape: f32[1,64], index: 17, kind: input, shape index: {}]   ;;  %s5999_s19 = inlined_call_operand.vmem [shape: f32[64,1], index: 19, kind: input, shape index: {}]   ;;  %s6000_s20 = inlined_call_operand.<no memory space> [shape: f32[1,1], index: 20, kind: input, shape index: {}]   ;;  %s6001_s18 = inlined_call_operand.vmem [shape: f32[1,64], index: 18, kind: input, shape index: {}]   ;;  %s6002_s21 = inlined_call_operand.vmem [shape: f32[2,1], index: 21, kind: output, shape index: {}]  }
   0x1   :  { %6007 = sst [smem:[#allocation3_spill]] %s5981_s0  ;;  %3848 = vset.pattern.permute.xlu0 %v3970_v0  ;;  %3849 = vset.pattern.permute.xlu1 %v3970_v0  ;;  %vm115_vm2 = vcmask 1046528   ;;  %vm141_vm3 = vcmask 1044480   ;;  %vm224_vm4 = vcmask 523264   ;;  %vm126_vm5 = vcmask 1045504  }
   0x2   :  { %6008 = sst [smem:[#allocation4_spill]] %s5982_s1  ;;  %s6013_s26 = sld [smem:[#allocation3_spill]]  ;;  %3407 = vmatprep.subr.bf16.mxu1 %v3971_v5  ;;  %vm152_vm6 = vcmask 1043456   ;;  %vm815_vm7 = vcmask 1040384   ;;  %vm3973_vm8 = vmmov 0   ;;  %vm2854_vm9 = vcmask 1041409  }
   0x3   :  { %6009 = sst [smem:[#allocation5_spill]] %s5983_s2  ;;  %s6014_s22 = sld [smem:[#allocation4_spill]]  ;;  %vm2928_vm10 = vcmask 1024  }
   0x4   :  { %6010 = sst [smem:[#allocation6_spill]] %s5984_s10  ;;  %s6015_s23 = sld [smem:[#allocation5_spill]] }
   0x5   :  { %6011 = sst [smem:[#allocation7_spill]] %s5985_s3  ;;  %s6016_s28 = sld [smem:[#allocation6_spill]] }
   0x6   :  { %6012 = sst [smem:[#allocation8_spill]] %s5986_s11 }
   0x7   :  { %s6018_s24 = sld [smem:[#allocation8_spill]] }
   0x8   :  { %v70_v1 = vld [vmem:[%s6013_s26] sm:$0xff]  ;;  %v72_v2 = vld [vmem:[%s6013_s26 + $0x10] sm:$0xff]  ;;  %v71_v3 = vld [vmem:[%s6013_s26 + $0x8] sm:$0xff] }
   0x9   :  { %76 = vperm.xlu0 %3848, %v70_v1   ;;  %86 = vperm.xlu1 %3849, %v72_v2   ;;  %v73_v4 = vld [vmem:[%s6013_s26 + $0x18] sm:$0xff]  ;;  %v269_v6 = vld [vmem:[%s6014_s22 + $0x100] sm:$0xff]  ;;  %v270_v7 = vld [vmem:[%s6014_s22 + $0x108] sm:$0xff]  ;;  %s6017_s26 = sld [smem:[#allocation7_spill]] }
   0xa   :  { %v271_v8 = vld [vmem:[%s6014_s22 + $0x110] sm:$0xff]  ;;  %v3408_v9 = vpack.c.bf16 %v270_v7, %v269_v6  ;;  %v272_v10 = vld [vmem:[%s6014_s22 + $0x118] sm:$0xff]  ;;  %v253_v11 = vld [vmem:[%s6014_s22 + $0x80] sm:$0xff] }
   0xb   :  { %v3411_v12 = vpack.c.bf16 %v272_v10, %v271_v8  ;;  %v254_v13 = vld [vmem:[%s6014_s22 + $0x88] sm:$0xff]  ;;  %v237_v14 = vld [vmem:[%s6014_s22] sm:$0xff]  ;;  %v255_v20 = vld [vmem:[%s6014_s22 + $0x90] sm:$0xff] }
   0xc   :  { %3409 = vmatpush1.bf16.msra.mxu1 %v3408_v9  ;;  %v238_v15 = vld [vmem:[%s6014_s22 + $0x8] sm:$0xff]  ;;  %v273_v16 = vld [vmem:[%s6014_s22 + $0x120] sm:$0xff]  ;;  %v3375_v18 = vpack.c.bf16 %v254_v13, %v253_v11  ;;  %v256_v21 = vld [vmem:[%s6014_s22 + $0x98] sm:$0xff] }
   0xd   :  { %81 = vperm.xlu0 %3848, %v71_v3   ;;  %91 = vperm.xlu1 %3849, %v73_v4   ;;  %v274_v17 = vld [vmem:[%s6014_s22 + $0x128] sm:$0xff]  ;;  %v3377_v19 = vpack.c.bf16 %v238_v15, %v237_v14  ;;  %v239_v22 = vld [vmem:[%s6014_s22 + $0x10] sm:$0xff]  ;;  %v240_v23 = vld [vmem:[%s6014_s22 + $0x18] sm:$0xff]  ;;  %v3379_v24 = vpack.c.bf16 %v256_v21, %v255_v20 }
   0xe   :  { %3410 = vmatprep.subr.bf16.mxu1 %v3971_v5  ;;  %3376 = vmatprep.subr.bf16.mxu0 %v3375_v18  ;;  %v257_v25 = vld [vmem:[%s6014_s22 + $0xa0] sm:$0xff]  ;;  %v3414_v26 = vpack.c.bf16 %v274_v17, %v273_v16  ;;  %v275_v27 = vld [vmem:[%s6014_s22 + $0x130] sm:$0xff]  ;;  %v3381_v28 = vpack.c.bf16 %v240_v23, %v239_v22  ;;  %v258_v29 = vld [vmem:[%s6014_s22 + $0xa8] sm:$0xff] }
   0xf   :  { %3378 = vmatpush3.bf16.msra.mxu0 %v3377_v19  ;;  %v276_v30 = vld [vmem:[%s6014_s22 + $0x138] sm:$0xff]  ;;  %v3383_v31 = vpack.c.bf16 %v258_v29, %v257_v25  ;;  %v241_v32 = vld [vmem:[%s6014_s22 + $0x20] sm:$0xff]  ;;  %v242_v33 = vld [vmem:[%s6014_s22 + $0x28] sm:$0xff] }
  0x10   :  { %3412 = vmatpush1.bf16.msra.mxu1 %v3411_v12  ;;  %3380 = vmatprep.subr.bf16.mxu0 %v3379_v24  ;;  %v259_v34 = vld [vmem:[%s6014_s22 + $0xb0] sm:$0xff]  ;;  %v260_v35 = vld [vmem:[%s6014_s22 + $0xb8] sm:$0xff]  ;;  %v3417_v36 = vpack.c.bf16 %v276_v30, %v275_v27  ;;  %v277_v37 = vld [vmem:[%s6014_s22 + $0x140] sm:$0xff]  ;;  %v3385_v38 = vpack.c.bf16 %v242_v33, %v241_v32 }
  0x11   :  { %3413 = vmatprep.subr.bf16.mxu1 %v3971_v5  ;;  %v278_v39 = vld [vmem:[%s6014_s22 + $0x148] sm:$0xff]  ;;  %v3387_v40 = vpack.c.bf16 %v260_v35, %v259_v34  ;;  %v243_v41 = vld [vmem:[%s6014_s22 + $0x30] sm:$0xff]  ;;  %v244_v42 = vld [vmem:[%s6014_s22 + $0x38] sm:$0xff] }
  0x12   :  { %v261_v43 = vld [vmem:[%s6014_s22 + $0xc0] sm:$0xff]  ;;  %v262_v44 = vld [vmem:[%s6014_s22 + $0xc8] sm:$0xff]  ;;  %v3420_v45 = vpack.c.bf16 %v278_v39, %v277_v37  ;;  %v279_v46 = vld [vmem:[%s6014_s22 + $0x150] sm:$0xff]  ;;  %v3389_v47 = vpack.c.bf16 %v244_v42, %v243_v41 }
  0x13   :  { %3382 = vmatpush3.bf16.msra.mxu0 %v3381_v28  ;;  %v280_v48 = vld [vmem:[%s6014_s22 + $0x158] sm:$0xff]  ;;  %v3391_v49 = vpack.c.bf16 %v262_v44, %v261_v43  ;;  %v245_v50 = vld [vmem:[%s6014_s22 + $0x40] sm:$0xff]  ;;  %v246_v51 = vld [vmem:[%s6014_s22 + $0x48] sm:$0xff] }
  0x14   :  { %3415 = vmatpush1.bf16.msra.mxu1 %v3414_v26  ;;  %3384 = vmatprep.subr.bf16.mxu0 %v3383_v31  ;;  %v263_v52 = vld [vmem:[%s6014_s22 + $0xd0] sm:$0xff]  ;;  %v264_v53 = vld [vmem:[%s6014_s22 + $0xd8] sm:$0xff]  ;;  %v3423_v54 = vpack.c.bf16 %v280_v48, %v279_v46  ;;  %v281_v55 = vld [vmem:[%s6014_s22 + $0x160] sm:$0xff]  ;;  %v3393_v56 = vpack.c.bf16 %v246_v51, %v245_v50 }
  0x15   :  { %3416 = vmatprep.subr.bf16.mxu1 %v3971_v5  ;;  %v282_v57 = vld [vmem:[%s6014_s22 + $0x168] sm:$0xff]  ;;  %v3395_v58 = vpack.c.bf16 %v264_v53, %v263_v52  ;;  %v247_v59 = vld [vmem:[%s6014_s22 + $0x50] sm:$0xff]  ;;  %v248_v60 = vld [vmem:[%s6014_s22 + $0x58] sm:$0xff] }
  0x16   :  { %v265_v61 = vld [vmem:[%s6014_s22 + $0xe0] sm:$0xff]  ;;  %v266_v62 = vld [vmem:[%s6014_s22 + $0xe8] sm:$0xff]  ;;  %v3426_v63 = vpack.c.bf16 %v282_v57, %v281_v55  ;;  %v283_v0 = vld [vmem:[%s6014_s22 + $0x170] sm:$0xff]  ;;  %v3397_v1 = vpack.c.bf16 %v248_v60, %v247_v59 }
  0x17   :  { %3386 = vmatpush3.bf16.msra.mxu0 %v3385_v38  ;;  %v284_v2 = vld [vmem:[%s6014_s22 + $0x178] sm:$0xff]  ;;  %v3399_v3 = vpack.c.bf16 %v266_v62, %v265_v61  ;;  %v249_v4 = vld [vmem:[%s6014_s22 + $0x60] sm:$0xff]  ;;  %v250_v6 = vld [vmem:[%s6014_s22 + $0x68] sm:$0xff] }
  0x18   :  { %3418 = vmatpush1.bf16.msra.mxu1 %v3417_v36  ;;  %3388 = vmatprep.subr.bf16.mxu0 %v3387_v40  ;;  %v3429_v7 = vpack.c.bf16 %v284_v2, %v283_v0  ;;  %v3401_v8 = vpack.c.bf16 %v250_v6, %v249_v4  ;;  %v285_v9 = vld [vmem:[%s6014_s22 + $0x180] sm:$0xff]  ;;  %v286_v10 = vld [vmem:[%s6014_s22 + $0x188] sm:$0xff]  ;;  %v287_v12 = vld [vmem:[%s6014_s22 + $0x190] sm:$0xff] }
  0x19   :  { %3419 = vmatprep.subr.bf16.mxu1 %v3971_v5  ;;  %v3432_v11 = vpack.c.bf16 %v286_v10, %v285_v9  ;;  %v288_v13 = vld [vmem:[%s6014_s22 + $0x198] sm:$0xff]  ;;  %v289_v15 = vld [vmem:[%s6014_s22 + $0x1a0] sm:$0xff]  ;;  %v290_v16 = vld [vmem:[%s6014_s22 + $0x1a8] sm:$0xff] }
  0x1a   :  { %v3435_v14 = vpack.c.bf16 %v288_v13, %v287_v12  ;;  %v3438_v17 = vpack.c.bf16 %v290_v16, %v289_v15  ;;  %v267_v18 = vld [vmem:[%s6014_s22 + $0xf0] sm:$0xff]  ;;  %v268_v19 = vld [vmem:[%s6014_s22 + $0xf8] sm:$0xff] }
  0x1b   :  { %3390 = vmatpush3.bf16.msra.mxu0 %v3389_v47  ;;  %v3403_v20 = vpack.c.bf16 %v268_v19, %v267_v18  ;;  %v251_v21 = vld [vmem:[%s6014_s22 + $0x70] sm:$0xff]  ;;  %v252_v22 = vld [vmem:[%s6014_s22 + $0x78] sm:$0xff] }
  0x1c   :  { %3421 = vmatpush1.bf16.msra.mxu1 %v3420_v45  ;;  %3392 = vmatprep.subr.bf16.mxu0 %v3391_v49  ;;  %v3405_v25 = vpack.c.bf16 %v252_v22, %v251_v21  ;;  %v291_v26 = vld [vmem:[%s6014_s22 + $0x1b0] sm:$0xff]  ;;  %v292_v27 = vld [vmem:[%s6014_s22 + $0x1b8] sm:$0xff]  ;;  %s3972_s22 = smov 64  }
  0x1d   :  { %3422 = vmatprep.subr.bf16.mxu1 %v3971_v5  ;;  %v3441_v30 = vpack.c.bf16 %v292_v27, %v291_v26 }
  0x1f   :  { %3394 = vmatpush3.bf16.msra.mxu0 %v3393_v56 }
  0x20   :  { %3424 = vmatpush1.bf16.msra.mxu1 %v3423_v54  ;;  %3396 = vmatprep.subr.bf16.mxu0 %v3395_v58 }
  0x21   :  { %3425 = vmatprep.subr.bf16.mxu1 %v3971_v5 }
  0x23   :  { %3398 = vmatpush3.bf16.msra.mxu0 %v3397_v1 }
  0x24   :  { %3427 = vmatpush1.bf16.msra.mxu1 %v3426_v63  ;;  %3400 = vmatprep.subr.bf16.mxu0 %v3399_v3 }
  0x25   :  { %3428 = vmatprep.subr.bf16.mxu1 %v3971_v5 }
  0x27   :  { %3402 = vmatpush3.bf16.msra.mxu0 %v3401_v8 }
  0x28   :  { %3430 = vmatpush1.bf16.msra.mxu1 %v3429_v7  ;;  %3404 = vmatprep.subr.bf16.mxu0 %v3403_v20 }
  0x29   :  { %3431 = vmatprep.subr.bf16.mxu1 %v3971_v5 }
  0x2b   :  { %3406 = vmatpush3.bf16.msra.mxu0 %v3405_v25 }
  0x2c   :  { %3433 = vmatpush1.bf16.msra.mxu1 %v3432_v11 }
  0x2d   :  { %3434 = vmatprep.subr.bf16.mxu1 %v3971_v5 }
  0x30   :  { %3436 = vmatpush1.bf16.msra.mxu1 %v3435_v14 }
  0x31   :  { %3437 = vmatprep.subr.bf16.mxu1 %v3971_v5 }
  0x34   :  { %3439 = vmatpush1.bf16.msra.mxu1 %v3438_v17 }
  0x35   :  { %3440 = vmatprep.subr.bf16.mxu1 %v3971_v5 }
  0x38   :  { %3442 = vmatpush1.bf16.msra.mxu1 %v3441_v30 }
  0x88   :  { %v4271_v23 = vpop.permute.xlu0 %76  ;;  %v4273_v24 = vpop.permute.xlu1 %86 }
  0x89   :  { %v95_v28 = vrot.slane %v4271_v23, 5  ;;  %v98_v29 = vrot.slane %v4273_v24, 5 }
  0x8b   :  { %v4284_v31 = vsel %vm94_vm0, 0.0, %v95_v28  ;;  %v4289_v33 = vsel %vm94_vm0, 0.0, %v98_v29 }
  0x8c   :  { %v4286_v32 = vpop.permute.xlu0 %81  ;;  %v4291_v34 = vpop.permute.xlu1 %91  ;;  %v178_v37 = vrot.slane %v4284_v31, 6  ;;  %v116_v38 = vrot.slane %v4284_v31, 1  ;;  %v142_v39 = vrot.slane %v4284_v31, 3  ;;  %v121_v43 = vrot.slane %v4289_v33, 1 }
  0x8d   :  { %v96_v35 = vrot.slane %v4286_v32, 5  ;;  %v99_v36 = vrot.slane %v4291_v34, 5  ;;  %v147_v51 = vrot.slane %v4289_v33, 3  ;;  %v167_v0 = vrot.slane %v4284_v31, 5 }
  0x8e   :  { %v172_v12 = vrot.slane %v4289_v33, 5  ;;  %v127_v19 = vrot.slane %v4284_v31, 2 }
  0x8f   :  { %v4299_v40 = vsel %vm94_vm0, %v95_v28, %v96_v35  ;;  %v4302_v41 = vsel %vm94_vm0, %v96_v35, 0.0  ;;  %v4305_v42 = vsel %vm94_vm0, %v98_v29, %v99_v36  ;;  %v4313_v48 = vsel %vm94_vm0, %v99_v36, 0.0 }
  0x90   :  { %v179_v44 = vrot.slane %v4299_v40, 6  ;;  %v117_v45 = vrot.slane %v4299_v40, 1  ;;  %v119_v46 = vrot.slane %v4302_v41, 1  ;;  %v143_v47 = vrot.slane %v4299_v40, 3 }
  0x91   :  { %v145_v49 = vrot.slane %v4302_v41, 3  ;;  %v122_v50 = vrot.slane %v4305_v42, 1  ;;  %v168_v58 = vrot.slane %v4299_v40, 5  ;;  %v124_v60 = vrot.slane %v4313_v48, 1 }
  0x92   :  { %v180_v52 = vsel %vm177_vm1, %v178_v37, %v179_v44  ;;  %v120_v53 = vsel %vm115_vm2, %v117_v45, %v119_v46  ;;  %v118_v54 = vsel %vm115_vm2, %v116_v38, %v117_v45  ;;  %v144_v55 = vsel %vm141_vm3, %v142_v39, %v143_v47 }
  0x93   :  { %2935 = vmatprep.mubr.msk.f32.mxu1 %vm224_vm4, %v180_v52  ;;  %v146_v56 = vsel %vm141_vm3, %v143_v47, %v145_v49  ;;  %v3850_v57 = vpack.i.bf16 %v118_v54, %v144_v55  ;;  %v148_v61 = vrot.slane %v4305_v42, 3  ;;  %v150_v62 = vrot.slane %v4313_v48, 3 }
  0x94   :  { %v3855_v59 = vpack.i.bf16 %v120_v53, %v146_v56  ;;  %v170_v63 = vrot.slane %v4302_v41, 5  ;;  %v123_v1 = vsel %vm115_vm2, %v121_v43, %v122_v50  ;;  %v125_v3 = vsel %vm115_vm2, %v122_v50, %v124_v60 }
  0x95   :  { %3851 = vrot.lane.b32.xlu0 %v3850_v57, %s3972_s22  ;;  %v149_v2 = vsel %vm141_vm3, %v147_v51, %v148_v61  ;;  %v151_v4 = vsel %vm141_vm3, %v148_v61, %v150_v62  ;;  %v169_v6 = vsel %vm94_vm0, %v167_v0, %v168_v58  ;;  %v181_v7 = vrot.slane %v4302_v41, 6 }
  0x96   :  { %3856 = vrot.lane.b32.xlu1 %v3855_v59, %s3972_s22  ;;  %v171_v8 = vsel %vm94_vm0, %v168_v58, %v170_v63  ;;  %v3860_v9 = vpack.i.bf16 %v123_v1, %v149_v2  ;;  %v3865_v10 = vpack.i.bf16 %v125_v3, %v151_v4  ;;  %v173_v11 = vrot.slane %v4305_v42, 5 }
  0x97   :  { %v182_v13 = vsel %vm177_vm1, %v179_v44, %v181_v7  ;;  %v175_v14 = vrot.slane %v4313_v48, 5  ;;  %v128_v17 = vrot.slane %v4299_v40, 2  ;;  %v130_v20 = vrot.slane %v4302_v41, 2 }
  0x98   :  { %v174_v15 = vsel %vm94_vm0, %v172_v12, %v173_v11  ;;  %v154_v21 = vrot.slane %v4299_v40, 4  ;;  %v153_v29 = vrot.slane %v4284_v31, 4  ;;  %v156_v43 = vrot.slane %v4302_v41, 4  ;;  %v614_v12 = vld [vmem:[%s6015_s23 + $0x100] sm:$0xff] }
  0x99   :  { %212 = vrot.lane.b32.xlu0 %v169_v6, %s3972_s22  ;;  %v176_v16 = vsel %vm94_vm0, %v173_v11, %v175_v14  ;;  %v129_v28 = vsel %vm126_vm5, %v127_v19, %v128_v17  ;;  %v131_v38 = vsel %vm126_vm5, %v128_v17, %v130_v20  ;;  %v183_v47 = vrot.slane %v4289_v33, 6  ;;  %v618_v17 = vld [vmem:[%s6015_s23 + $0x120] sm:$0xff]  ;;  %v620_v20 = vld [vmem:[%s6015_s23 + $0x130] sm:$0xff] }
  0x9a   :  { %214 = vrot.lane.b32.xlu1 %v171_v8, %s3972_s22  ;;  %v155_v39 = vsel %vm152_vm6, %v153_v29, %v154_v21  ;;  %v132_v49 = vrot.slane %v4289_v33, 2  ;;  %v133_v50 = vrot.slane %v4305_v42, 2  ;;  %v135_v41 = vrot.slane %v4313_v48, 2  ;;  %v583_v29 = vld [vmem:[%s6015_s23 + $0x8] sm:$0xff] }
  0x9b   :  { %v157_v53 = vsel %vm152_vm6, %v154_v21, %v156_v43  ;;  %v158_v54 = vrot.slane %v4289_v33, 4  ;;  %v159_v55 = vrot.slane %v4305_v42, 4  ;;  %v161_v6 = vrot.slane %v4313_v48, 4  ;;  %v621_v21 = vld [vmem:[%s6015_s23 + $0x138] sm:$0xff]  ;;  %v602_v43 = vld [vmem:[%s6015_s23 + $0xa0] sm:$0xff] }
  0x9c   :  { %v134_v62 = vsel %vm126_vm5, %v132_v49, %v133_v50  ;;  %v136_v3 = vsel %vm126_vm5, %v133_v50, %v135_v41  ;;  %v604_v49 = vld [vmem:[%s6015_s23 + $0xb0] sm:$0xff]  ;;  %v605_v50 = vld [vmem:[%s6015_s23 + $0xb8] sm:$0xff] }
  0x9d   :  { %3861 = vrot.lane.b32.xlu0 %v3860_v9, %s3972_s22  ;;  %v160_v4 = vsel %vm152_vm6, %v158_v54, %v159_v55  ;;  %v162_v11 = vsel %vm152_vm6, %v159_v55, %v161_v6  ;;  %v606_v54 = vld [vmem:[%s6015_s23 + $0xc0] sm:$0xff]  ;;  %v607_v55 = vld [vmem:[%s6015_s23 + $0xc8] sm:$0xff] }
  0x9e   :  { %3866 = vrot.lane.b32.xlu1 %v3865_v10, %s3972_s22  ;;  %v594_v6 = vld [vmem:[%s6015_s23 + $0x60] sm:$0xff] }
  0xa1   :  { %216 = vrot.lane.b32.xlu0 %v174_v15, %s3972_s22  ;;  %v617_v15 = vld [vmem:[%s6015_s23 + $0x118] sm:$0xff] }
  0xa2   :  { %218 = vrot.lane.b32.xlu1 %v176_v16, %s3972_s22 }
 0x107   :  { %v3852_v18 = vpop.permute.xlu0 %3851 }
 0x108   :  { %v3857_v22 = vpop.permute.xlu1 %3856  ;;  %v3854_v25 = vunpack.i.h.bf16 %v3852_v18  ;;  %v3853_v26 = vunpack.i.l.bf16 %v3852_v18  ;;  %v619_v18 = vld [vmem:[%s6015_s23 + $0x128] sm:$0xff] }
 0x109   :  { %v3858_v27 = vunpack.i.l.bf16 %v3857_v22  ;;  %v3859_v36 = vunpack.i.h.bf16 %v3857_v22  ;;  %v3483_v19 = vpack.c.bf16 %v619_v18, %v618_v17  ;;  %v3487_v22 = vpack.c.bf16 %v621_v21, %v620_v20 }
 0x10a   :  { %v229_v30 = vsel %vm224_vm4, %v129_v28, %v3853_v26  ;;  %v225_v35 = vsel %vm224_vm4, %v4284_v31, %v3854_v25  ;;  %v184_v31 = vrot.slane %v4305_v42, 6  ;;  %v598_v25 = vld [vmem:[%s6015_s23 + $0x80] sm:$0xff]  ;;  %v599_v26 = vld [vmem:[%s6015_s23 + $0x88] sm:$0xff] }
 0x10b   :  { %v213_v37 = vpop.permute.xlu0 %212  ;;  %372 = vmatprep.mubr.f32.mxu0 %v229_v30  ;;  %v230_v45 = vsel %vm224_vm4, %v131_v38, %v3858_v27  ;;  %v226_v52 = vsel %vm224_vm4, %v4299_v40, %v3859_v36  ;;  %v186_v40 = vrot.slane %v4313_v48, 6  ;;  %v582_v27 = vld [vmem:[%s6015_s23] sm:$0xff]  ;;  %v3443_v28 = vpack.c.bf16 %v599_v26, %v598_v25  ;;  %v600_v30 = vld [vmem:[%s6015_s23 + $0x90] sm:$0xff] }
 0x10c   :  { %v215_v44 = vpop.permute.xlu1 %214  ;;  %373 = vmatmul.mubr.f32.vlgmr.msra.gmra.mrb[0].mxu0 %v225_v35  ;;  %v233_v46 = vsel %vm224_vm4, %v155_v39, %v213_v37  ;;  %v185_v61 = vsel %vm177_vm1, %v183_v47, %v184_v31  ;;  %v601_v35 = vld [vmem:[%s6015_s23 + $0x98] sm:$0xff]  ;;  %v3445_v36 = vpack.c.bf16 %v583_v29, %v582_v27  ;;  %v584_v38 = vld [vmem:[%s6015_s23 + $0x10] sm:$0xff]  ;;  %v586_v47 = vld [vmem:[%s6015_s23 + $0x20] sm:$0xff] }
 0x10d   :  { %377 = vmatprep.mubr.f32.mxu0 %v230_v45  ;;  %458 = vmatmul.mubr.f32.vlgmr.msra.gmra.mrb[0].mxu1 %v233_v46  ;;  %v234_v59 = vsel %vm224_vm4, %v157_v53, %v215_v44  ;;  %v187_v10 = vsel %vm177_vm1, %v184_v31, %v186_v40  ;;  %v3447_v37 = vpack.c.bf16 %v601_v35, %v600_v30  ;;  %v585_v39 = vld [vmem:[%s6015_s23 + $0x18] sm:$0xff]  ;;  %v603_v44 = vld [vmem:[%s6015_s23 + $0xa8] sm:$0xff]  ;;  %v612_v30 = vld [vmem:[%s6015_s23 + $0xf0] sm:$0xff] }
 0x10e   :  { %2936 = vmatprep.mubr.msk.f32.mxu1 %vm224_vm4, %v182_v13  ;;  %v615_v13 = vld [vmem:[%s6015_s23 + $0x108] sm:$0xff]  ;;  %3444 = vmatprep.subr.bf16.mxu0 %v3443_v28  ;;  %v3449_v45 = vpack.c.bf16 %v585_v39, %v584_v38  ;;  %v3451_v46 = vpack.c.bf16 %v603_v44, %v602_v43  ;;  %v589_v53 = vld [vmem:[%s6015_s23 + $0x38] sm:$0xff] }
 0x10f   :  { %v3862_v51 = vpop.permute.xlu0 %3861  ;;  %v3475_v14 = vpack.c.bf16 %v615_v13, %v614_v12  ;;  %3446 = vmatpush3.bf16.msra.mxu0 %v3445_v36  ;;  %v587_v31 = vld [vmem:[%s6015_s23 + $0x28] sm:$0xff]  ;;  %v613_v35 = vld [vmem:[%s6015_s23 + $0xf8] sm:$0xff]  ;;  %v596_v36 = vld [vmem:[%s6015_s23 + $0x70] sm:$0xff] }
 0x110   :  { %v3867_v56 = vpop.permute.xlu1 %3866  ;;  %v3864_v57 = vunpack.i.h.bf16 %v3862_v51  ;;  %v3863_v58 = vunpack.i.l.bf16 %v3862_v51  ;;  %378 = vmatmul.mubr.f32.gmra.mrb[2].mxu0 %v226_v52  ;;  %3448 = vmatprep.subr.bf16.mxu0 %v3447_v37  ;;  %v3453_v41 = vpack.c.bf16 %v587_v31, %v586_v47  ;;  %v3455_v51 = vpack.c.bf16 %v605_v50, %v604_v49  ;;  %v588_v52 = vld [vmem:[%s6015_s23 + $0x30] sm:$0xff]  ;;  %v597_v44 = vld [vmem:[%s6015_s23 + $0x78] sm:$0xff] }
 0x111   :  { %v3868_v60 = vunpack.i.l.bf16 %v3867_v56  ;;  %463 = vmatmul.mubr.f32.gmra.mrb[2].mxu1 %v234_v59  ;;  %v3869_v1 = vunpack.i.h.bf16 %v3867_v56  ;;  %3476 = vmatprep.subr.bf16.mxu1 %v3475_v14  ;;  %v3457_v56 = vpack.c.bf16 %v589_v53, %v588_v52  ;;  %v591_v59 = vld [vmem:[%s6015_s23 + $0x48] sm:$0xff]  ;;  %v3471_v43 = vpack.c.bf16 %v613_v35, %v612_v30 }
 0x112   :  { %2937 = vmatprep.mubr.msk.f32.mxu1 %vm224_vm4, %v185_v61  ;;  %v231_v63 = vsel %vm224_vm4, %v134_v62, %v3863_v58  ;;  %v227_v0 = vsel %vm224_vm4, %v4289_v33, %v3864_v57  ;;  %3478 = vmatpush3.bf16.msra.mxu1 %v3475_v14  ;;  %v3459_v57 = vpack.c.bf16 %v607_v55, %v606_v54  ;;  %v590_v58 = vld [vmem:[%s6015_s23 + $0x40] sm:$0xff]  ;;  %v609_v61 = vld [vmem:[%s6015_s23 + $0xd8] sm:$0xff] }
 0x113   :  { %v217_v2 = vpop.permute.xlu0 %216  ;;  %382 = vmatprep.mubr.f32.mxu0 %v231_v63  ;;  %v232_v7 = vsel %vm224_vm4, %v136_v3, %v3868_v60  ;;  %v228_v33 = vsel %vm224_vm4, %v4305_v42, %v3869_v1  ;;  %v616_v42 = vld [vmem:[%s6015_s23 + $0x110] sm:$0xff]  ;;  %3450 = vmatpush3.bf16.msra.mxu0 %v3449_v45  ;;  %v3461_v62 = vpack.c.bf16 %v591_v59, %v590_v58  ;;  %v610_v1 = vld [vmem:[%s6015_s23 + $0xe0] sm:$0xff] }
 0x114   :  { %383 = vmatmul.mubr.f32.gmra.mrb[4].mxu0 %v227_v0  ;;  %v235_v8 = vsel %vm224_vm4, %v160_v4, %v217_v2  ;;  %v219_v9 = vpop.permute.xlu1 %218  ;;  %v3479_v16 = vpack.c.bf16 %v617_v15, %v616_v42  ;;  %3452 = vmatprep.subr.bf16.mxu0 %v3451_v46  ;;  %v608_v60 = vld [vmem:[%s6015_s23 + $0xd0] sm:$0xff]  ;;  %v593_v0 = vld [vmem:[%s6015_s23 + $0x58] sm:$0xff]  ;;  %v611_v2 = vld [vmem:[%s6015_s23 + $0xe8] sm:$0xff]  ;;  %v3473_v47 = vpack.c.bf16 %v597_v44, %v596_v36 }
 0x115   :  { %387 = vmatprep.mubr.f32.mxu0 %v232_v7  ;;  %468 = vmatmul.mubr.f32.gmra.mrb[4].mxu1 %v235_v8  ;;  %v236_v48 = vsel %vm224_vm4, %v162_v11, %v219_v9  ;;  %v3463_v40 = vpack.c.bf16 %v609_v61, %v608_v60  ;;  %v592_v63 = vld [vmem:[%s6015_s23 + $0x50] sm:$0xff]  ;;  %v3467_v4 = vpack.c.bf16 %v611_v2, %v610_v1  ;;  %v595_v7 = vld [vmem:[%s6015_s23 + $0x68] sm:$0xff] }
 0x116   :  { %2938 = vmatprep.mubr.msk.f32.mxu1 %vm224_vm4, %v187_v10  ;;  %3480 = vmatprep.subr.bf16.mxu1 %v3479_v16  ;;  %v3465_v3 = vpack.c.bf16 %v593_v0, %v592_v63  ;;  %v3469_v8 = vpack.c.bf16 %v595_v7, %v594_v6 }
 0x117   :  { %3482 = vmatpush3.bf16.msra.mxu1 %v3479_v16  ;;  %3454 = vmatpush3.bf16.msra.mxu0 %v3453_v41 }
 0x118   :  { %388 = vmatmul.mubr.f32.gmra.mrb[6].mxu0 %v228_v33  ;;  %3484 = vmatprep.subr.bf16.mxu1 %v3483_v19  ;;  %v2934_v33 = vld [vmem:[%s6016_s28] ss:$0 sm:$0xff] }
 0x119   :  { %473 = vmatmul.mubr.f32.gmra.mrb[6].mxu1 %v236_v48  ;;  %3456 = vmatprep.subr.bf16.mxu0 %v3455_v51 }
 0x11b   :  { %3486 = vmatpush3.bf16.msra.mxu1 %v3483_v19  ;;  %3458 = vmatpush3.bf16.msra.mxu0 %v3457_v56 }
 0x11c   :  { %3488 = vmatprep.subr.bf16.mxu1 %v3487_v22  ;;  %3460 = vmatprep.subr.bf16.mxu0 %v3459_v57 }
 0x11f   :  { %3490 = vmatpush3.bf16.msra.mxu1 %v3487_v22  ;;  %3462 = vmatpush3.bf16.msra.mxu0 %v3461_v62 }
 0x120   :  { %3464 = vmatprep.subr.bf16.mxu0 %v3463_v40 }
 0x123   :  { %3466 = vmatpush3.bf16.msra.mxu0 %v3465_v3 }
 0x124   :  { %3468 = vmatprep.subr.bf16.mxu0 %v3467_v4 }
 0x127   :  { %3470 = vmatpush3.bf16.msra.mxu0 %v3469_v8 }
 0x128   :  { %3472 = vmatprep.subr.bf16.mxu0 %v3471_v43 }
 0x12b   :  { %3474 = vmatpush3.bf16.msra.mxu0 %v3473_v47 }
 0x12c   :  { %3491 = vmatprep.subr.bf16.mxu0 %v3971_v5 }
 0x1df   :  { %v3013_v9 = vpop.f32.mrb[0].mxu0 }
 0x1e0   :  { %v3014_v10 = vpop.f32.mrb[1].mxu0  ;;  %v459_v11 = vpop.f32.mrb[0].mxu1 }
 0x1e1   :  { %v3015_v48 = vadd.f32 %v3014_v10, %v3013_v9  ;;  %v461_v12 = vpop.f32.mrb[1].mxu1 }
 0x1e3   :  { %v375_v13 = vadd.f32 %v3015_v48, %v2934_v33  ;;  %v3016_v14 = vpop.f32.mrb[2].mxu0 }
 0x1e4   :  { %v3017_v42 = vpop.f32.mrb[3].mxu0  ;;  %v464_v15 = vpop.f32.mrb[2].mxu1 }
 0x1e5   :  { %v460_v16 = vadd.f32 %v459_v11, %v375_v13  ;;  %v3018_v17 = vadd.f32 %v3017_v42, %v3016_v14  ;;  %v466_v18 = vpop.f32.mrb[3].mxu1 }
 0x1e7   :  { %v478_v19 = vmax.f32 %v460_v16, 0.0  ;;  %v380_v20 = vadd.f32 %v3018_v17, %v2934_v33  ;;  %v3019_v21 = vpop.f32.mrb[4].mxu0 }
 0x1e8   :  { %v3020_v22 = vpop.f32.mrb[5].mxu0  ;;  %v469_v25 = vpop.f32.mrb[4].mxu1 }
 0x1e9   :  { %v465_v26 = vadd.f32 %v464_v15, %v380_v20  ;;  %v3021_v27 = vadd.f32 %v3020_v22, %v3019_v21  ;;  %v471_v28 = vpop.f32.mrb[5].mxu1  ;;  %v486_v29 = vrot.slane %v478_v19, 6 }
 0x1eb   :  { %v479_v37 = vmax.f32 %v465_v26, 0.0  ;;  %v385_v38 = vadd.f32 %v3021_v27, %v2934_v33  ;;  %v3022_v39 = vpop.f32.mrb[6].mxu0  ;;  %v4519_v51 = vsel %vm177_vm1, 0.0, %v486_v29 }
 0x1ec   :  { %v3023_v45 = vpop.f32.mrb[7].mxu0  ;;  %v474_v46 = vpop.f32.mrb[6].mxu1  ;;  %v540_v60 = vrot.slane %v4519_v51, 4  ;;  %v506_v0 = vrot.slane %v4519_v51, 1  ;;  %v530_v1 = vrot.slane %v4519_v51, 3  ;;  %v516_v43 = vrot.slane %v4519_v51, 2 }
 0x1ed   :  { %v487_v31 = vrot.slane %v479_v37, 6  ;;  %v470_v49 = vadd.f32 %v469_v25, %v385_v38  ;;  %v3024_v50 = vadd.f32 %v3023_v45, %v3022_v39  ;;  %v476_v41 = vpop.f32.mrb[7].mxu1 }
 0x1ef   :  { %v4522_v52 = vsel %vm177_vm1, %v486_v29, %v487_v31  ;;  %v4525_v53 = vsel %vm177_vm1, %v487_v31, 0.0  ;;  %v480_v54 = vmax.f32 %v470_v49, 0.0  ;;  %v390_v55 = vadd.f32 %v3024_v50, %v2934_v33 }
 0x1f0   :  { %v509_v56 = vrot.slane %v4525_v53, 1  ;;  %v533_v57 = vrot.slane %v4525_v53, 3  ;;  %v543_v58 = vrot.slane %v4525_v53, 4  ;;  %v541_v61 = vrot.slane %v4522_v52, 4 }
 0x1f1   :  { %v475_v59 = vadd.f32 %v474_v46, %v390_v55  ;;  %v507_v62 = vrot.slane %v4522_v52, 1  ;;  %v489_v40 = vrot.slane %v480_v54, 6  ;;  %v531_v63 = vrot.slane %v4522_v52, 3 }
 0x1f2   :  { %v542_v3 = vsel %vm152_vm6, %v540_v60, %v541_v61  ;;  %v544_v4 = vsel %vm152_vm6, %v541_v61, %v543_v58  ;;  %v517_v36 = vrot.slane %v4522_v52, 2  ;;  %v519_v37 = vrot.slane %v4525_v53, 2 }
 0x1f3   :  { %v481_v2 = vmax.f32 %v475_v59, 0.0  ;;  %3306 = vmatprep.mubr.msk.f32.mxu1 %vm224_vm4, %v542_v3  ;;  %v510_v6 = vsel %vm115_vm2, %v507_v62, %v509_v56  ;;  %v534_v7 = vsel %vm141_vm3, %v531_v63, %v533_v57  ;;  %v508_v8 = vsel %vm115_vm2, %v506_v0, %v507_v62 }
 0x1f4   :  { %v532_v9 = vsel %vm141_vm3, %v530_v1, %v531_v63  ;;  %3307 = vmatmul.mubr.msk.f32.vlgmr.msra.gmra.mrb[8].mxu1 %vm224_vm4, %v544_v4  ;;  %v3875_v33 = vpack.i.bf16 %v510_v6, %v534_v7  ;;  %v499_v48 = vsel %vm177_vm1, 0.0, %v489_v40  ;;  %v518_v47 = vsel %vm126_vm5, %v516_v43, %v517_v36 }
 0x1f5   :  { %v490_v10 = vrot.slane %v481_v2, 6  ;;  %v3870_v11 = vpack.i.bf16 %v508_v8, %v532_v9  ;;  %v545_v16 = vrot.slane %v499_v48, 4  ;;  %v511_v20 = vrot.slane %v499_v48, 1  ;;  %v872_v8 = vld [vmem:[%s6017_s26] sm:$0xff]  ;;  %v873_v9 = vld [vmem:[%s6017_s26 + $0x8] sm:$0xff] }
 0x1f6   :  { %3876 = vrot.lane.b32.xlu1 %v3875_v33, %s3972_s22  ;;  %v535_v21 = vrot.slane %v499_v48, 3  ;;  %v520_v41 = vsel %vm126_vm5, %v517_v36, %v519_v37  ;;  %v521_v59 = vrot.slane %v499_v48, 2  ;;  %v3492_v33 = vpack.c.bf16 %v873_v9, %v872_v8  ;;  %v889_v36 = vld [vmem:[%s6017_s26 + $0x88] sm:$0xff] }
 0x1f7   :  { %v491_v12 = vsel %vm177_vm1, %v489_v40, %v490_v10  ;;  %v501_v13 = vsel %vm177_vm1, %v490_v10, 0.0  ;;  %3871 = vrot.lane.b32.xlu0 %v3870_v11, %s3972_s22  ;;  %v874_v10 = vld [vmem:[%s6017_s26 + $0x10] sm:$0xff]  ;;  %v875_v11 = vld [vmem:[%s6017_s26 + $0x18] sm:$0xff] }
 0x1f8   :  { %v514_v14 = vrot.slane %v501_v13, 1  ;;  %v538_v42 = vrot.slane %v501_v13, 3  ;;  %v548_v15 = vrot.slane %v501_v13, 4  ;;  %v546_v17 = vrot.slane %v491_v12, 4 }
 0x1f9   :  { %v512_v18 = vrot.slane %v491_v12, 1  ;;  %v536_v19 = vrot.slane %v491_v12, 3  ;;  %v522_v54 = vrot.slane %v491_v12, 2  ;;  %v524_v56 = vrot.slane %v501_v13, 2  ;;  %v877_v13 = vld [vmem:[%s6017_s26 + $0x28] sm:$0xff] }
 0x1fa   :  { %v547_v22 = vsel %vm152_vm6, %v545_v16, %v546_v17  ;;  %v549_v25 = vsel %vm152_vm6, %v546_v17, %v548_v15  ;;  %v879_v15 = vld [vmem:[%s6017_s26 + $0x38] sm:$0xff]  ;;  %v880_v17 = vld [vmem:[%s6017_s26 + $0x40] sm:$0xff] }
 0x1fb   :  { %v515_v26 = vsel %vm115_vm2, %v512_v18, %v514_v14  ;;  %v539_v27 = vsel %vm141_vm3, %v536_v19, %v538_v42  ;;  %3309 = vmatprep.mubr.msk.f32.mxu1 %vm224_vm4, %v547_v22  ;;  %v513_v29 = vsel %vm115_vm2, %v511_v20, %v512_v18  ;;  %v537_v30 = vsel %vm141_vm3, %v535_v21, %v536_v19  ;;  %v878_v42 = vld [vmem:[%s6017_s26 + $0x30] sm:$0xff]  ;;  %v881_v18 = vld [vmem:[%s6017_s26 + $0x48] sm:$0xff]  ;;  %v883_v21 = vld [vmem:[%s6017_s26 + $0x58] sm:$0xff] }
 0x1fc   :  { %v3885_v28 = vpack.i.bf16 %v515_v26, %v539_v27  ;;  %3310 = vmatmul.mubr.msk.f32.gmra.mrb[10].mxu1 %vm224_vm4, %v549_v25  ;;  %v3880_v35 = vpack.i.bf16 %v513_v29, %v537_v30  ;;  %v525_v1 = vsel %vm126_vm5, %v522_v54, %v524_v56  ;;  %v3501_v16 = vpack.c.bf16 %v879_v15, %v878_v42  ;;  %v882_v20 = vld [vmem:[%s6017_s26 + $0x50] sm:$0xff]  ;;  %v884_v25 = vld [vmem:[%s6017_s26 + $0x60] sm:$0xff]  ;;  %v885_v26 = vld [vmem:[%s6017_s26 + $0x68] sm:$0xff] }
 0x1fd   :  { %v3504_v19 = vpack.c.bf16 %v881_v18, %v880_v17  ;;  %v3507_v22 = vpack.c.bf16 %v883_v21, %v882_v20  ;;  %v3510_v27 = vpack.c.bf16 %v885_v26, %v884_v25  ;;  %v887_v29 = vld [vmem:[%s6017_s26 + $0x78] sm:$0xff] }
 0x1fe   :  { %3886 = vrot.lane.b32.xlu1 %v3885_v28, %s3972_s22  ;;  %3881 = vrot.lane.b32.xlu0 %v3880_v35, %s3972_s22  ;;  %v886_v28 = vld [vmem:[%s6017_s26 + $0x70] sm:$0xff]  ;;  %v888_v35 = vld [vmem:[%s6017_s26 + $0x80] sm:$0xff] }
 0x1ff   :  { %v3513_v30 = vpack.c.bf16 %v887_v29, %v886_v28  ;;  %v3516_v37 = vpack.c.bf16 %v889_v36, %v888_v35 }
 0x268   :  { %v3877_v38 = vpop.permute.xlu1 %3876 }
 0x269   :  { %v3872_v39 = vpop.permute.xlu0 %3871  ;;  %v3878_v44 = vunpack.i.l.bf16 %v3877_v38  ;;  %v3879_v50 = vunpack.i.h.bf16 %v3877_v38  ;;  %v890_v38 = vld [vmem:[%s6017_s26 + $0x90] sm:$0xff] }
 0x26a   :  { %v3874_v45 = vunpack.i.h.bf16 %v3872_v39  ;;  %v3873_v46 = vunpack.i.l.bf16 %v3872_v39  ;;  %v891_v39 = vld [vmem:[%s6017_s26 + $0x98] sm:$0xff] }
 0x26b   :  { %v579_v53 = vsel %vm224_vm4, %v520_v41, %v3878_v44  ;;  %v575_v58 = vsel %vm224_vm4, %v4522_v52, %v3879_v50  ;;  %v3519_v43 = vpack.c.bf16 %v891_v39, %v890_v38  ;;  %v892_v44 = vld [vmem:[%s6017_s26 + $0xa0] sm:$0xff] }
 0x26c   :  { %v578_v31 = vsel %vm224_vm4, %v518_v47, %v3873_v46  ;;  %v574_v49 = vsel %vm224_vm4, %v4519_v51, %v3874_v45  ;;  %v523_v51 = vsel %vm126_vm5, %v521_v59, %v522_v54  ;;  %v893_v45 = vld [vmem:[%s6017_s26 + $0xa8] sm:$0xff]  ;;  %v894_v47 = vld [vmem:[%s6017_s26 + $0xb0] sm:$0xff]  ;;  %v2939_v41 = vld [vmem:[%s6018_s24] ss:$0 sm:$0xff] }
 0x26d   :  { %701 = vmatprep.mubr.f32.mxu0 %v578_v31  ;;  %v3522_v46 = vpack.c.bf16 %v893_v45, %v892_v44  ;;  %v895_v31 = vld [vmem:[%s6017_s26 + $0xb8] sm:$0xff] }
 0x26e   :  { %702 = vmatmul.mubr.f32.vlgmr.msra.gmra.mrb[8].mxu0 %v574_v49  ;;  %v3525_v49 = vpack.c.bf16 %v895_v31, %v894_v47 }
 0x26f   :  { %706 = vmatprep.mubr.f32.mxu0 %v579_v53  ;;  %3493 = vmatpush1.bf16.msra.mxu0 %v3492_v33 }
 0x270   :  { %v3887_v55 = vpop.permute.xlu1 %3886  ;;  %v3882_v57 = vpop.permute.xlu0 %3881  ;;  %3494 = vmatprep.subr.bf16.mxu0 %v3971_v5 }
 0x271   :  { %v3888_v60 = vunpack.i.l.bf16 %v3887_v55  ;;  %v3884_v61 = vunpack.i.h.bf16 %v3882_v57  ;;  %v3883_v62 = vunpack.i.l.bf16 %v3882_v57  ;;  %v3889_v0 = vunpack.i.h.bf16 %v3887_v55 }
 0x272   :  { %707 = vmatmul.mubr.f32.gmra.mrb[10].mxu0 %v575_v58 }
 0x273   :  { %v580_v40 = vsel %vm224_vm4, %v523_v51, %v3883_v62  ;;  %v576_v63 = vsel %vm224_vm4, %v499_v48, %v3884_v61  ;;  %v581_v2 = vsel %vm224_vm4, %v525_v1, %v3888_v60  ;;  %v577_v52 = vsel %vm224_vm4, %v491_v12, %v3889_v0  ;;  %v876_v12 = vld [vmem:[%s6017_s26 + $0x20] sm:$0xff] }
 0x274   :  { %711 = vmatprep.mubr.f32.mxu0 %v580_v40  ;;  %v3495_v48 = vpack.c.bf16 %v875_v11, %v874_v10  ;;  %v3498_v14 = vpack.c.bf16 %v877_v13, %v876_v12 }
 0x276   :  { %712 = vmatmul.mubr.f32.gmra.mrb[12].mxu0 %v576_v63 }
 0x277   :  { %716 = vmatprep.mubr.f32.mxu0 %v581_v2  ;;  %3496 = vmatpush1.bf16.msra.mxu0 %v3495_v48 }
 0x278   :  { %3497 = vmatprep.subr.bf16.mxu0 %v3971_v5 }
 0x27a   :  { %717 = vmatmul.mubr.f32.gmra.mrb[14].mxu0 %v577_v52 }
 0x27b   :  { %3499 = vmatpush1.bf16.msra.mxu0 %v3498_v14 }
 0x27c   :  { %3500 = vmatprep.subr.bf16.mxu0 %v3971_v5 }
 0x27f   :  { %3502 = vmatpush1.bf16.msra.mxu0 %v3501_v16 }
 0x280   :  { %3503 = vmatprep.subr.bf16.mxu0 %v3971_v5 }
 0x283   :  { %3505 = vmatpush1.bf16.msra.mxu0 %v3504_v19 }
 0x284   :  { %3506 = vmatprep.subr.bf16.mxu0 %v3971_v5 }
 0x287   :  { %3508 = vmatpush1.bf16.msra.mxu0 %v3507_v22 }
 0x288   :  { %3509 = vmatprep.subr.bf16.mxu0 %v3971_v5 }
 0x28b   :  { %3511 = vmatpush1.bf16.msra.mxu0 %v3510_v27 }
 0x28c   :  { %3512 = vmatprep.subr.bf16.mxu0 %v3971_v5 }
 0x28f   :  { %3514 = vmatpush1.bf16.msra.mxu0 %v3513_v30 }
 0x290   :  { %3515 = vmatprep.subr.bf16.mxu0 %v3971_v5 }
 0x293   :  { %3517 = vmatpush1.bf16.msra.mxu0 %v3516_v37 }
 0x294   :  { %3518 = vmatprep.subr.bf16.mxu0 %v3971_v5 }
 0x297   :  { %3520 = vmatpush1.bf16.msra.mxu0 %v3519_v43 }
 0x298   :  { %3521 = vmatprep.subr.bf16.mxu0 %v3971_v5 }
 0x29b   :  { %3523 = vmatpush1.bf16.msra.mxu0 %v3522_v46 }
 0x29c   :  { %3524 = vmatprep.subr.bf16.mxu0 %v3971_v5 }
 0x29f   :  { %3526 = vmatpush1.bf16.msra.mxu0 %v3525_v49 }
 0x2c7   :  { %v4577_v3 = vpop.f32.mrb[8].mxu1 }
 0x2c8   :  { %v4579_v4 = vpop.f32.mrb[9].mxu1 }
 0x2cf   :  { %v4581_v6 = vpop.f32.mrb[10].mxu1 }
 0x2d0   :  { %v4583_v7 = vpop.f32.mrb[11].mxu1 }
 0x341   :  { %v3057_v50 = vpop.f32.mrb[8].mxu0 }
 0x342   :  { %v3058_v53 = vpop.f32.mrb[9].mxu0 }
 0x343   :  { %v3059_v54 = vadd.f32 %v3058_v53, %v3057_v50 }
 0x345   :  { %v704_v55 = vadd.f32 %v3059_v54, %v2939_v41  ;;  %v3060_v56 = vpop.f32.mrb[10].mxu0 }
 0x346   :  { %v3061_v57 = vpop.f32.mrb[11].mxu0 }
 0x347   :  { %v789_v58 = vadd.f32 %v4579_v4, %v704_v55  ;;  %v3062_v59 = vadd.f32 %v3061_v57, %v3060_v56  ;;  %v1160_v55 = vld [vmem:[%s5987_s4 + $0x80] sm:$0xff]  ;;  %v1161_v56 = vld [vmem:[%s5987_s4 + $0x88] sm:$0xff] }
 0x348   :  { %v1144_v57 = vld [vmem:[%s5987_s4] sm:$0xff] }
 0x349   :  { %v807_v60 = vmax.f32 %v789_v58, 0.0  ;;  %v709_v61 = vadd.f32 %v3062_v59, %v2939_v41  ;;  %v3063_v62 = vpop.f32.mrb[12].mxu0  ;;  %v3527_v58 = vpack.c.bf16 %v1161_v56, %v1160_v55  ;;  %v1145_v59 = vld [vmem:[%s5987_s4 + $0x8] sm:$0xff] }
 0x34a   :  { %v3064_v51 = vpop.f32.mrb[13].mxu0 }
 0x34b   :  { %v816_v40 = vrot.slane %v807_v60, 7  ;;  %v794_v63 = vadd.f32 %v4577_v3, %v709_v61  ;;  %v3065_v0 = vadd.f32 %v3064_v51, %v3063_v62  ;;  %v1162_v60 = vld [vmem:[%s5987_s4 + $0x90] sm:$0xff]  ;;  %v1163_v61 = vld [vmem:[%s5987_s4 + $0x98] sm:$0xff]  ;;  %v3529_v62 = vpack.c.bf16 %v1145_v59, %v1144_v57  ;;  %3528 = vmatprep.subr.bf16.mxu1 %v3527_v58 }
 0x34c   :  { %v3531_v51 = vpack.c.bf16 %v1163_v61, %v1162_v60 }
 0x34d   :  { %v828_v1 = vsel %vm815_vm7, 0.0, %v816_v40  ;;  %v808_v2 = vmax.f32 %v794_v63, 0.0  ;;  %v714_v52 = vadd.f32 %v3065_v0, %v2939_v41  ;;  %v3066_v8 = vpop.f32.mrb[14].mxu0  ;;  %v1147_v63 = vld [vmem:[%s5987_s4 + $0x18] sm:$0xff]  ;;  %v1164_v0 = vld [vmem:[%s5987_s4 + $0xa0] sm:$0xff]  ;;  %3530 = vmatpush3.bf16.msra.mxu1 %v3529_v62 }
 0x34e   :  { %v3067_v9 = vpop.f32.mrb[15].mxu0  ;;  %v846_v11 = vrot.slane %v828_v1, 2  ;;  %v836_v48 = vrot.slane %v828_v1, 1  ;;  %3532 = vmatprep.subr.bf16.mxu1 %v3531_v51 }
 0x34f   :  { %v817_v10 = vrot.slane %v808_v2, 7  ;;  %v799_v33 = vadd.f32 %v4583_v7, %v714_v52  ;;  %v3068_v4 = vadd.f32 %v3067_v9, %v3066_v8  ;;  %v1148_v8 = vld [vmem:[%s5987_s4 + $0x20] sm:$0xff]  ;;  %v1149_v9 = vld [vmem:[%s5987_s4 + $0x28] sm:$0xff] }
 0x351   :  { %v818_v12 = vsel %vm815_vm7, %v816_v40, %v817_v10  ;;  %v809_v13 = vmax.f32 %v799_v33, 0.0  ;;  %v719_v14 = vadd.f32 %v3068_v4, %v2939_v41  ;;  %v830_v42 = vsel %vm815_vm7, %v817_v10, 0.0  ;;  %v1146_v40 = vld [vmem:[%s5987_s4 + $0x10] sm:$0xff]  ;;  %v1167_v33 = vld [vmem:[%s5987_s4 + $0xb8] sm:$0xff] }
 0x352   :  { %v847_v3 = vrot.slane %v818_v12, 2  ;;  %v837_v15 = vrot.slane %v818_v12, 1  ;;  %v839_v16 = vrot.slane %v830_v42, 1  ;;  %v849_v17 = vrot.slane %v830_v42, 2  ;;  %v1166_v10 = vld [vmem:[%s5987_s4 + $0xb0] sm:$0xff] }
 0x353   :  { %v819_v18 = vrot.slane %v809_v13, 7  ;;  %v804_v19 = vadd.f32 %v4581_v6, %v719_v14  ;;  %v3533_v2 = vpack.c.bf16 %v1147_v63, %v1146_v40  ;;  %v3537_v4 = vpack.c.bf16 %v1149_v9, %v1148_v8  ;;  %v1168_v13 = vld [vmem:[%s5987_s4 + $0xc0] sm:$0xff]  ;;  %v1169_v14 = vld [vmem:[%s5987_s4 + $0xc8] sm:$0xff] }
 0x354   :  { %v848_v20 = vsel %vm126_vm5, %v846_v11, %v847_v3  ;;  %v840_v7 = vsel %vm115_vm2, %v837_v15, %v839_v16  ;;  %v838_v21 = vsel %vm115_vm2, %v836_v48, %v837_v15  ;;  %v850_v22 = vsel %vm126_vm5, %v847_v3, %v849_v17  ;;  %v1150_v48 = vld [vmem:[%s5987_s4 + $0x30] sm:$0xff]  ;;  %v1152_v15 = vld [vmem:[%s5987_s4 + $0x40] sm:$0xff]  ;;  %v1153_v16 = vld [vmem:[%s5987_s4 + $0x48] sm:$0xff] }
 0x355   :  { %v810_v25 = vmax.f32 %v804_v19, 0.0  ;;  %2945 = vmatprep.mubr.msk.f32.mxu0 %vm224_vm4, %v848_v20  ;;  %858 = vrot.lane.b32.xlu1 %v840_v7, %s3972_s22  ;;  %v829_v26 = vsel %vm815_vm7, 0.0, %v819_v18  ;;  %v3539_v11 = vpack.c.bf16 %v1167_v33, %v1166_v10  ;;  %v3543_v3 = vpack.c.bf16 %v1169_v14, %v1168_v13  ;;  %v1170_v17 = vld [vmem:[%s5987_s4 + $0xd0] sm:$0xff] }
 0x356   :  { %856 = vrot.lane.b32.xlu0 %v838_v21, %s3972_s22  ;;  %v841_v35 = vrot.slane %v829_v26, 1  ;;  %v851_v45 = vrot.slane %v829_v26, 2  ;;  %3534 = vmatpush3.bf16.msra.mxu1 %v3533_v2  ;;  %v3545_v19 = vpack.c.bf16 %v1153_v16, %v1152_v15  ;;  %v1154_v7 = vld [vmem:[%s5987_s4 + $0x50] sm:$0xff]  ;;  %v1155_v21 = vld [vmem:[%s5987_s4 + $0x58] sm:$0xff] }
 0x357   :  { %v820_v27 = vrot.slane %v810_v25, 7  ;;  %v1173_v25 = vld [vmem:[%s5987_s4 + $0xe8] sm:$0xff] }
 0x359   :  { %v821_v6 = vsel %vm815_vm7, %v819_v18, %v820_v27  ;;  %v831_v28 = vsel %vm815_vm7, %v820_v27, 0.0  ;;  %v1171_v18 = vld [vmem:[%s5987_s4 + $0xd8] sm:$0xff] }
 0x35a   :  { %v842_v29 = vrot.slane %v821_v6, 1  ;;  %v844_v30 = vrot.slane %v831_v28, 1  ;;  %v852_v44 = vrot.slane %v821_v6, 2  ;;  %v854_v31 = vrot.slane %v831_v28, 2  ;;  %v1157_v28 = vld [vmem:[%s5987_s4 + $0x68] sm:$0xff] }
 0x35b   :  { %v3547_v20 = vpack.c.bf16 %v1171_v18, %v1170_v17 }
 0x35c   :  { %v845_v36 = vsel %vm115_vm2, %v842_v29, %v844_v30  ;;  %v843_v37 = vsel %vm115_vm2, %v841_v35, %v842_v29  ;;  %v853_v47 = vsel %vm126_vm5, %v851_v45, %v852_v44  ;;  %v855_v53 = vsel %vm126_vm5, %v852_v44, %v854_v31  ;;  %v1174_v29 = vld [vmem:[%s5987_s4 + $0xf0] sm:$0xff]  ;;  %v1175_v30 = vld [vmem:[%s5987_s4 + $0xf8] sm:$0xff] }
 0x35d   :  { %862 = vrot.lane.b32.xlu1 %v845_v36, %s3972_s22  ;;  %860 = vrot.lane.b32.xlu0 %v843_v37, %s3972_s22  ;;  %v3555_v36 = vpack.c.bf16 %v1175_v30, %v1174_v29  ;;  %v2944_v37 = vld [vmem:[%s5988_s12] ss:$0 sm:$0xff] }
 0x3c7   :  { %v859_v43 = vpop.permute.xlu1 %858 }
 0x3c8   :  { %v857_v38 = vpop.permute.xlu0 %856  ;;  %v869_v46 = vsel %vm224_vm4, %v818_v12, %v859_v43  ;;  %v1151_v12 = vld [vmem:[%s5987_s4 + $0x38] sm:$0xff] }
 0x3c9   :  { %v868_v39 = vsel %vm224_vm4, %v828_v1, %v857_v38  ;;  %v1165_v1 = vld [vmem:[%s5987_s4 + $0xa8] sm:$0xff]  ;;  %v3541_v42 = vpack.c.bf16 %v1151_v12, %v1150_v48 }
 0x3ca   :  { %976 = vmatmul.mubr.f32.vlgmr.msra.gmra.mrb[16].mxu0 %v868_v39  ;;  %v3535_v52 = vpack.c.bf16 %v1165_v1, %v1164_v0 }
 0x3cb   :  { %2946 = vmatprep.mubr.msk.f32.mxu0 %vm224_vm4, %v850_v22  ;;  %v1172_v22 = vld [vmem:[%s5987_s4 + $0xe0] sm:$0xff] }
 0x3cc   :  { %3536 = vmatprep.subr.bf16.mxu1 %v3535_v52  ;;  %v3551_v27 = vpack.c.bf16 %v1173_v25, %v1172_v22 }
 0x3cd   :  { %3538 = vmatpush3.bf16.msra.mxu1 %v3537_v4 }
 0x3ce   :  { %981 = vmatmul.mubr.f32.gmra.mrb[18].mxu0 %v869_v46  ;;  %3540 = vmatprep.subr.bf16.mxu1 %v3539_v11 }
 0x3cf   :  { %2947 = vmatprep.mubr.msk.f32.mxu0 %vm224_vm4, %v853_v47  ;;  %v861_v49 = vpop.permute.xlu0 %860  ;;  %v863_v41 = vpop.permute.xlu1 %862 }
 0x3d0   :  { %v870_v50 = vsel %vm224_vm4, %v829_v26, %v861_v49  ;;  %v871_v54 = vsel %vm224_vm4, %v821_v6, %v863_v41  ;;  %v3549_v26 = vpack.c.bf16 %v1155_v21, %v1154_v7  ;;  %v1156_v6 = vld [vmem:[%s5987_s4 + $0x60] sm:$0xff]  ;;  %v1158_v49 = vld [vmem:[%s5987_s4 + $0x70] sm:$0xff] }
 0x3d1   :  { %3542 = vmatpush3.bf16.msra.mxu1 %v3541_v42  ;;  %v3553_v35 = vpack.c.bf16 %v1157_v28, %v1156_v6 }
 0x3d2   :  { %986 = vmatmul.mubr.f32.gmra.mrb[20].mxu0 %v870_v50  ;;  %3544 = vmatprep.subr.bf16.mxu1 %v3543_v3  ;;  %v1159_v50 = vld [vmem:[%s5987_s4 + $0x78] sm:$0xff] }
 0x3d3   :  { %2948 = vmatprep.mubr.msk.f32.mxu0 %vm224_vm4, %v855_v53 }
 0x3d5   :  { %3546 = vmatpush3.bf16.msra.mxu1 %v3545_v19 }
 0x3d6   :  { %991 = vmatmul.mubr.f32.gmra.mrb[22].mxu0 %v871_v54  ;;  %3548 = vmatprep.subr.bf16.mxu1 %v3547_v20  ;;  %v3557_v54 = vpack.c.bf16 %v1159_v50, %v1158_v49 }
 0x3d9   :  { %3550 = vmatpush3.bf16.msra.mxu1 %v3549_v26 }
 0x3da   :  { %3552 = vmatprep.subr.bf16.mxu1 %v3551_v27 }
 0x3dd   :  { %3554 = vmatpush3.bf16.msra.mxu1 %v3553_v35 }
 0x3de   :  { %3556 = vmatprep.subr.bf16.mxu1 %v3555_v36 }
 0x3e1   :  { %3558 = vmatpush3.bf16.msra.mxu1 %v3557_v54 }
 0x3e2   :  { %3559 = vmatprep.subr.bf16.mxu1 %v3971_v5 }
 0x49d   :  { %v977_v38 = vpop.f32.mrb[16].mxu0 }
 0x49e   :  { %v978_v39 = vadd.f32 %v2944_v37, %v977_v38  ;;  %v979_v43 = vpop.f32.mrb[17].mxu0 }
 0x4a0   :  { %v996_v44 = vmax.f32 %v978_v39, 0.0 }
 0x4a1   :  { %v982_v45 = vpop.f32.mrb[18].mxu0 }
 0x4a2   :  { %v4795_v46 = vadd.f32 %v996_v44, %v4271_v23  ;;  %v983_v47 = vadd.f32 %v2944_v37, %v982_v45  ;;  %v984_v31 = vpop.f32.mrb[19].mxu0 }
 0x4a3   :  { %v1177_v31 = vld [vmem:[%s5987_s4 + $0x108] sm:$0xff] }
 0x4a4   :  { %v1008_v41 = vrot.slane %v4795_v46, 5  ;;  %v997_v53 = vmax.f32 %v983_v47, 0.0  ;;  %v1176_v47 = vld [vmem:[%s5987_s4 + $0x100] sm:$0xff] }
 0x4a5   :  { %v987_v55 = vpop.f32.mrb[20].mxu0 }
 0x4a6   :  { %v4805_v56 = vsel %vm94_vm0, 0.0, %v1008_v41  ;;  %v4808_v23 = vadd.f32 %v997_v53, %v4286_v32  ;;  %v988_v57 = vadd.f32 %v2944_v37, %v987_v55  ;;  %v989_v58 = vpop.f32.mrb[21].mxu0 }
 0x4a7   :  { %v1028_v62 = vrot.slane %v4805_v56, 1  ;;  %v1052_v51 = vrot.slane %v4805_v56, 3  ;;  %v1076_v30 = vrot.slane %v4805_v56, 5 }
 0x4a8   :  { %v1009_v59 = vrot.slane %v4808_v23, 5  ;;  %v998_v60 = vmax.f32 %v988_v57, 0.0 }
 0x4a9   :  { %v992_v61 = vpop.f32.mrb[22].mxu0 }
 0x4aa   :  { %v4815_v40 = vsel %vm94_vm0, %v1008_v41, %v1009_v59  ;;  %v4818_v63 = vsel %vm94_vm0, %v1009_v59, 0.0  ;;  %v4821_v32 = vadd.f32 %v998_v60, %v4273_v24  ;;  %v993_v0 = vadd.f32 %v2944_v37, %v992_v61  ;;  %v994_v1 = vpop.f32.mrb[23].mxu0 }
 0x4ab   :  { %v1029_v2 = vrot.slane %v4815_v40, 1  ;;  %v1031_v52 = vrot.slane %v4818_v63, 1  ;;  %v1053_v8 = vrot.slane %v4815_v40, 3  ;;  %v1055_v9 = vrot.slane %v4818_v63, 3 }
 0x4ac   :  { %v1011_v10 = vrot.slane %v4821_v32, 5  ;;  %v999_v33 = vmax.f32 %v993_v0, 0.0  ;;  %v1077_v28 = vrot.slane %v4815_v40, 5  ;;  %v1079_v29 = vrot.slane %v4818_v63, 5 }
 0x4ad   :  { %v1032_v4 = vsel %vm115_vm2, %v1029_v2, %v1031_v52  ;;  %v1056_v11 = vsel %vm141_vm3, %v1053_v8, %v1055_v9  ;;  %v1030_v24 = vsel %vm115_vm2, %v1028_v62, %v1029_v2  ;;  %v1054_v48 = vsel %vm141_vm3, %v1052_v51, %v1053_v8  ;;  %v1178_v62 = vld [vmem:[%s5987_s4 + $0x110] sm:$0xff]  ;;  %v1179_v51 = vld [vmem:[%s5987_s4 + $0x118] sm:$0xff]  ;;  %v1180_v9 = vld [vmem:[%s5987_s4 + $0x120] sm:$0xff] }
 0x4ae   :  { %v4833_v12 = vadd.f32 %v999_v33, %v4291_v34  ;;  %v3895_v13 = vpack.i.bf16 %v1032_v4, %v1056_v11  ;;  %v3890_v14 = vpack.i.bf16 %v1030_v24, %v1054_v48  ;;  %v4836_v42 = vsel %vm94_vm0, 0.0, %v1011_v10 }
 0x4af   :  { %v1033_v34 = vrot.slane %v4836_v42, 1  ;;  %v1057_v17 = vrot.slane %v4836_v42, 3  ;;  %v1080_v35 = vsel %vm94_vm0, %v1077_v28, %v1079_v29  ;;  %v1078_v36 = vsel %vm94_vm0, %v1076_v30, %v1077_v28  ;;  %v1184_v28 = vld [vmem:[%s5987_s4 + $0x140] sm:$0xff]  ;;  %v1185_v29 = vld [vmem:[%s5987_s4 + $0x148] sm:$0xff] }
 0x4b0   :  { %v1012_v3 = vrot.slane %v4833_v12, 5  ;;  %3896 = vrot.lane.b32.xlu1 %v3895_v13, %s3972_s22  ;;  %3891 = vrot.lane.b32.xlu0 %v3890_v14, %s3972_s22  ;;  %v1081_v39 = vrot.slane %v4836_v42, 5  ;;  %v1039_v45 = vrot.slane %v4815_v40, 2  ;;  %v1038_v41 = vrot.slane %v4805_v56, 2 }
 0x4b1   :  { %v1041_v53 = vrot.slane %v4818_v63, 2  ;;  %v3560_v59 = vpack.c.bf16 %v1177_v31, %v1176_v47  ;;  %v3563_v52 = vpack.c.bf16 %v1179_v51, %v1178_v62  ;;  %v1043_v24 = vrot.slane %v4836_v42, 2  ;;  %v1190_v47 = vld [vmem:[%s5987_s4 + $0x170] sm:$0xff]  ;;  %v1191_v31 = vld [vmem:[%s5987_s4 + $0x178] sm:$0xff] }
 0x4b2   :  { %v4842_v15 = vsel %vm94_vm0, %v1011_v10, %v1012_v3  ;;  %v4845_v16 = vsel %vm94_vm0, %v1012_v3, 0.0  ;;  %v1040_v58 = vsel %vm126_vm5, %v1038_v41, %v1039_v45  ;;  %v1181_v10 = vld [vmem:[%s5987_s4 + $0x128] sm:$0xff]  ;;  %v1199_v62 = vld [vmem:[%s5987_s4 + $0x1b8] sm:$0xff] }
 0x4b3   :  { %v1034_v18 = vrot.slane %v4842_v15, 1  ;;  %v1036_v19 = vrot.slane %v4845_v16, 1  ;;  %v1058_v20 = vrot.slane %v4842_v15, 3  ;;  %v1060_v7 = vrot.slane %v4845_v16, 3  ;;  %v1193_v41 = vld [vmem:[%s5987_s4 + $0x188] sm:$0xff] }
 0x4b4   :  { %v1082_v37 = vrot.slane %v4842_v15, 5  ;;  %v1084_v38 = vrot.slane %v4845_v16, 5  ;;  %v1042_v1 = vsel %vm126_vm5, %v1039_v45, %v1041_v53  ;;  %v1044_v8 = vrot.slane %v4842_v15, 2 }
 0x4b5   :  { %v1037_v21 = vsel %vm115_vm2, %v1034_v18, %v1036_v19  ;;  %v1061_v22 = vsel %vm141_vm3, %v1058_v20, %v1060_v7  ;;  %v1035_v25 = vsel %vm115_vm2, %v1033_v34, %v1034_v18  ;;  %v1059_v26 = vsel %vm141_vm3, %v1057_v17, %v1058_v20  ;;  %v1182_v20 = vld [vmem:[%s5987_s4 + $0x130] sm:$0xff]  ;;  %v1183_v7 = vld [vmem:[%s5987_s4 + $0x138] sm:$0xff] }
 0x4b6   :  { %v3905_v27 = vpack.i.bf16 %v1037_v21, %v1061_v22  ;;  %v3900_v6 = vpack.i.bf16 %v1035_v25, %v1059_v26  ;;  %v1085_v43 = vsel %vm94_vm0, %v1082_v37, %v1084_v38  ;;  %v1083_v44 = vsel %vm94_vm0, %v1081_v39, %v1082_v37  ;;  %v1186_v37 = vld [vmem:[%s5987_s4 + $0x150] sm:$0xff]  ;;  %v1187_v38 = vld [vmem:[%s5987_s4 + $0x158] sm:$0xff] }
 0x4b7   :  { %v1046_v48 = vrot.slane %v4845_v16, 2  ;;  %v1045_v34 = vsel %vm126_vm5, %v1043_v24, %v1044_v8  ;;  %v3566_v17 = vpack.c.bf16 %v1181_v10, %v1180_v9  ;;  %v1087_v26 = vrot.slane %v4815_v40, 6 }
 0x4b8   :  { %3906 = vrot.lane.b32.xlu1 %v3905_v27, %s3972_s22  ;;  %3901 = vrot.lane.b32.xlu0 %v3900_v6, %s3972_s22  ;;  %v3569_v27 = vpack.c.bf16 %v1183_v7, %v1182_v20  ;;  %v1086_v6 = vrot.slane %v4805_v56, 6  ;;  %v3575_v39 = vpack.c.bf16 %v1187_v38, %v1186_v37  ;;  %v1065_v9 = vrot.slane %v4818_v63, 4  ;;  %v1521_v7 = vld [vmem:[%s5989_s5 + $0x100] sm:$0xff]  ;;  %v1506_v37 = vld [vmem:[%s5989_s5 + $0x88] sm:$0xff] }
 0x4b9   :  { %v1047_v22 = vsel %vm126_vm5, %v1044_v8, %v1046_v48  ;;  %v1068_v24 = vrot.slane %v4842_v15, 4  ;;  %v1489_v38 = vld [vmem:[%s5989_s5] sm:$0xff] }
 0x4bc   :  { %1122 = vrot.lane.b32.xlu1 %v1080_v35, %s3972_s22  ;;  %1120 = vrot.lane.b32.xlu0 %v1078_v36, %s3972_s22  ;;  %v1088_v35 = vsel %vm177_vm1, %v1086_v6, %v1087_v26  ;;  %v3572_v36 = vpack.c.bf16 %v1185_v29, %v1184_v28  ;;  %v1526_v6 = vld [vmem:[%s5989_s5 + $0x128] sm:$0xff]  ;;  %v1527_v29 = vld [vmem:[%s5989_s5 + $0x130] sm:$0xff] }
 0x4c0   :  { %1126 = vrot.lane.b32.xlu1 %v1085_v43, %s3972_s22  ;;  %1124 = vrot.lane.b32.xlu0 %v1083_v44, %s3972_s22  ;;  %v1188_v43 = vld [vmem:[%s5987_s4 + $0x160] sm:$0xff]  ;;  %v1189_v44 = vld [vmem:[%s5987_s4 + $0x168] sm:$0xff] }
 0x4c1   :  { %v3578_v45 = vpack.c.bf16 %v1189_v44, %v1188_v43  ;;  %v1490_v43 = vld [vmem:[%s5989_s5 + $0x8] sm:$0xff]  ;;  %v1507_v44 = vld [vmem:[%s5989_s5 + $0x90] sm:$0xff] }
 0x522   :  { %v3897_v49 = vpop.permute.xlu1 %3896  ;;  %v3892_v50 = vpop.permute.xlu0 %3891 }
 0x523   :  { %v3898_v54 = vunpack.i.l.bf16 %v3897_v49  ;;  %v3894_v55 = vunpack.i.h.bf16 %v3892_v50  ;;  %v3893_v57 = vunpack.i.l.bf16 %v3892_v50  ;;  %v3899_v0 = vunpack.i.h.bf16 %v3897_v49  ;;  %v1192_v50 = vld [vmem:[%s5987_s4 + $0x180] sm:$0xff] }
 0x524   :  { %v3581_v49 = vpack.c.bf16 %v1191_v31, %v1190_v47  ;;  %v3584_v53 = vpack.c.bf16 %v1193_v41, %v1192_v50  ;;  %v3597_v47 = vpack.c.bf16 %v1490_v43, %v1489_v38  ;;  %v1492_v50 = vld [vmem:[%s5989_s5 + $0x18] sm:$0xff]  ;;  %v1509_v41 = vld [vmem:[%s5989_s5 + $0xa0] sm:$0xff] }
 0x525   :  { %v1136_v60 = vsel %vm224_vm4, %v1040_v58, %v3893_v57  ;;  %v1132_v61 = vsel %vm224_vm4, %v4805_v56, %v3894_v55  ;;  %v1137_v2 = vsel %vm224_vm4, %v1042_v1, %v3898_v54  ;;  %v1133_v11 = vsel %vm224_vm4, %v4815_v40, %v3899_v0  ;;  %v1194_v54 = vld [vmem:[%s5987_s4 + $0x190] sm:$0xff]  ;;  %v1195_v55 = vld [vmem:[%s5987_s4 + $0x198] sm:$0xff]  ;;  %v1196_v58 = vld [vmem:[%s5987_s4 + $0x1a0] sm:$0xff] }
 0x526   :  { %1279 = vmatprep.mubr.f32.mxu1 %v1136_v60  ;;  %v3587_v57 = vpack.c.bf16 %v1195_v55, %v1194_v54  ;;  %v1063_v0 = vrot.slane %v4815_v40, 4  ;;  %v1062_v1 = vrot.slane %v4805_v56, 4  ;;  %v1092_v40 = vrot.slane %v4842_v15, 6 }
 0x527   :  { %1280 = vmatmul.mubr.f32.vlgmr.msra.gmra.mrb[12].mxu1 %v1132_v61  ;;  %v1198_v61 = vld [vmem:[%s5987_s4 + $0x1b0] sm:$0xff] }
 0x528   :  { %3561 = vmatpush1.bf16.msra.mxu1 %v3560_v59  ;;  %1284 = vmatprep.mubr.f32.mxu1 %v1137_v2  ;;  %v1197_v59 = vld [vmem:[%s5987_s4 + $0x1a8] sm:$0xff]  ;;  %v3593_v51 = vpack.c.bf16 %v1199_v62, %v1198_v61  ;;  %v1064_v8 = vsel %vm152_vm6, %v1062_v1, %v1063_v0  ;;  %v1066_v56 = vsel %vm152_vm6, %v1063_v0, %v1065_v9  ;;  %v1496_v0 = vld [vmem:[%s5989_s5 + $0x38] sm:$0xff]  ;;  %v1513_v1 = vld [vmem:[%s5989_s5 + $0xc0] sm:$0xff] }
 0x529   :  { %3562 = vmatprep.subr.bf16.mxu1 %v3971_v5  ;;  %v3590_v60 = vpack.c.bf16 %v1197_v59, %v1196_v58  ;;  %v1494_v58 = vld [vmem:[%s5989_s5 + $0x28] sm:$0xff]  ;;  %v1511_v59 = vld [vmem:[%s5989_s5 + $0xb0] sm:$0xff]  ;;  %v1497_v9 = vld [vmem:[%s5989_s5 + $0x40] sm:$0xff] }
 0x52a   :  { %v3907_v33 = vpop.permute.xlu1 %3906  ;;  %v3902_v4 = vpop.permute.xlu0 %3901 }
 0x52b   :  { %v3908_v13 = vunpack.i.l.bf16 %v3907_v33  ;;  %v3904_v14 = vunpack.i.h.bf16 %v3902_v4  ;;  %v3903_v3 = vunpack.i.l.bf16 %v3902_v4  ;;  %1285 = vmatmul.mubr.f32.gmra.mrb[14].mxu1 %v1133_v11  ;;  %v3909_v21 = vunpack.i.h.bf16 %v3907_v33 }
 0x52c   :  { %3564 = vmatpush1.bf16.msra.mxu1 %v3563_v52  ;;  %v1089_v52 = vrot.slane %v4818_v63, 6  ;;  %v1091_v11 = vrot.slane %v4836_v42, 6 }
 0x52d   :  { %v1138_v18 = vsel %vm224_vm4, %v1045_v34, %v3903_v3  ;;  %3565 = vmatprep.subr.bf16.mxu1 %v3971_v5  ;;  %v1134_v19 = vsel %vm224_vm4, %v4836_v42, %v3904_v14  ;;  %v1139_v25 = vsel %vm224_vm4, %v1047_v22, %v3908_v13  ;;  %v1135_v30 = vsel %vm224_vm4, %v4842_v15, %v3909_v21  ;;  %v1523_v22 = vld [vmem:[%s5989_s5 + $0x110] sm:$0xff] }
 0x52e   :  { %1289 = vmatprep.mubr.f32.mxu1 %v1138_v18  ;;  %v1121_v2 = vpop.permute.xlu0 %1120  ;;  %v1123_v33 = vpop.permute.xlu1 %1122  ;;  %v1090_v4 = vsel %vm177_vm1, %v1087_v26, %v1089_v52  ;;  %v1093_v63 = vsel %vm177_vm1, %v1091_v11, %v1092_v40  ;;  %v1067_v14 = vrot.slane %v4836_v42, 4  ;;  %v1094_v3 = vrot.slane %v4845_v16, 6  ;;  %v1499_v11 = vld [vmem:[%s5989_s5 + $0x50] sm:$0xff] }
 0x52f   :  { %1290 = vmatmul.mubr.f32.gmra.mrb[16].mxu1 %v1134_v19  ;;  %v1140_v10 = vsel %vm224_vm4, %v1064_v8, %v1121_v2  ;;  %v1141_v48 = vsel %vm224_vm4, %v1066_v56, %v1123_v33  ;;  %v1514_v2 = vld [vmem:[%s5989_s5 + $0xc8] sm:$0xff]  ;;  %v1515_v33 = vld [vmem:[%s5989_s5 + $0xd0] sm:$0xff] }
 0x530   :  { %3567 = vmatpush1.bf16.msra.mxu1 %v3566_v17  ;;  %1294 = vmatprep.mubr.f32.mxu1 %v1139_v25  ;;  %v1069_v34 = vsel %vm152_vm6, %v1067_v14, %v1068_v24  ;;  %v1070_v17 = vrot.slane %v4845_v16, 4  ;;  %v1095_v15 = vsel %vm177_vm1, %v1092_v40, %v1094_v3  ;;  %v1522_v16 = vld [vmem:[%s5989_s5 + $0x108] sm:$0xff]  ;;  %v1524_v25 = vld [vmem:[%s5989_s5 + $0x118] sm:$0xff]  ;;  %v3611_v8 = vpack.c.bf16 %v1514_v2, %v1513_v1  ;;  %v1501_v3 = vld [vmem:[%s5989_s5 + $0x60] sm:$0xff] }
 0x531   :  { %3568 = vmatprep.subr.bf16.mxu1 %v3971_v5  ;;  %v3627_v21 = vpack.c.bf16 %v1522_v16, %v1521_v7  ;;  %v3631_v26 = vpack.c.bf16 %v1524_v25, %v1523_v22 }
 0x532   :  { %v1125_v13 = vpop.permute.xlu0 %1124  ;;  %v1127_v19 = vpop.permute.xlu1 %1126  ;;  %v1071_v20 = vsel %vm152_vm6, %v1068_v24, %v1070_v17  ;;  %v1500_v24 = vld [vmem:[%s5989_s5 + $0x58] sm:$0xff] }
 0x533   :  { %1295 = vmatmul.mubr.f32.gmra.mrb[18].mxu1 %v1135_v30  ;;  %v1142_v18 = vsel %vm224_vm4, %v1069_v34, %v1125_v13  ;;  %v1143_v42 = vsel %vm224_vm4, %v1071_v20, %v1127_v19  ;;  %v1528_v30 = vld [vmem:[%s5989_s5 + $0x138] sm:$0xff]  ;;  %v1518_v13 = vld [vmem:[%s5989_s5 + $0xe8] sm:$0xff] }
 0x534   :  { %3570 = vmatpush1.bf16.msra.mxu1 %v3569_v27  ;;  %2950 = vmatprep.mubr.msk.f32.mxu1 %vm224_vm4, %v1088_v35  ;;  %v1525_v27 = vld [vmem:[%s5989_s5 + $0x120] sm:$0xff]  ;;  %v3639_v35 = vpack.c.bf16 %v1528_v30, %v1527_v29  ;;  %v1502_v34 = vld [vmem:[%s5989_s5 + $0x68] sm:$0xff] }
 0x535   :  { %3571 = vmatprep.subr.bf16.mxu1 %v3971_v5  ;;  %v3635_v28 = vpack.c.bf16 %v1526_v6, %v1525_v27  ;;  %v3621_v17 = vpack.c.bf16 %v1502_v34, %v1501_v3  ;;  %v2949_v6 = vld [vmem:[%s5990_s13] ss:$0 sm:$0xff] }
 0x538   :  { %3573 = vmatpush1.bf16.msra.mxu1 %v3572_v36  ;;  %v1505_v36 = vld [vmem:[%s5989_s5 + $0x80] sm:$0xff] }
 0x539   :  { %3574 = vmatprep.subr.bf16.mxu1 %v3971_v5 }
 0x53c   :  { %3576 = vmatpush1.bf16.msra.mxu1 %v3575_v39  ;;  %v3595_v39 = vpack.c.bf16 %v1506_v37, %v1505_v36 }
 0x53d   :  { %3577 = vmatprep.subr.bf16.mxu1 %v3971_v5 }
 0x53e   :  { %3596 = vmatprep.subr.bf16.mxu0 %v3595_v39 }
 0x53f   :  { %3598 = vmatpush3.bf16.msra.mxu0 %v3597_v47  ;;  %v1520_v47 = vld [vmem:[%s5989_s5 + $0xf8] sm:$0xff] }
 0x540   :  { %3579 = vmatpush1.bf16.msra.mxu1 %v3578_v45  ;;  %v1508_v45 = vld [vmem:[%s5989_s5 + $0x98] sm:$0xff] }
 0x541   :  { %3580 = vmatprep.subr.bf16.mxu1 %v3971_v5  ;;  %v3599_v31 = vpack.c.bf16 %v1508_v45, %v1507_v44  ;;  %v1519_v45 = vld [vmem:[%s5989_s5 + $0xf0] sm:$0xff] }
 0x543   :  { %3600 = vmatprep.subr.bf16.mxu0 %v3599_v31  ;;  %v1503_v31 = vld [vmem:[%s5989_s5 + $0x70] sm:$0xff] }
 0x544   :  { %3582 = vmatpush1.bf16.msra.mxu1 %v3581_v49  ;;  %v1491_v49 = vld [vmem:[%s5989_s5 + $0x10] sm:$0xff] }
 0x545   :  { %3583 = vmatprep.subr.bf16.mxu1 %v3971_v5  ;;  %v3601_v54 = vpack.c.bf16 %v1492_v50, %v1491_v49 }
 0x547   :  { %3602 = vmatpush3.bf16.msra.mxu0 %v3601_v54 }
 0x548   :  { %3585 = vmatpush1.bf16.msra.mxu1 %v3584_v53  ;;  %v1510_v53 = vld [vmem:[%s5989_s5 + $0xa8] sm:$0xff] }
 0x549   :  { %3586 = vmatprep.subr.bf16.mxu1 %v3971_v5  ;;  %v3603_v55 = vpack.c.bf16 %v1510_v53, %v1509_v41  ;;  %v3623_v41 = vpack.c.bf16 %v1520_v47, %v1519_v45  ;;  %v1504_v53 = vld [vmem:[%s5989_s5 + $0x78] sm:$0xff] }
 0x54b   :  { %3604 = vmatprep.subr.bf16.mxu0 %v3603_v55  ;;  %v3625_v55 = vpack.c.bf16 %v1504_v53, %v1503_v31 }
 0x54c   :  { %3588 = vmatpush1.bf16.msra.mxu1 %v3587_v57  ;;  %v1493_v57 = vld [vmem:[%s5989_s5 + $0x20] sm:$0xff] }
 0x54d   :  { %3589 = vmatprep.subr.bf16.mxu1 %v3971_v5  ;;  %v3605_v61 = vpack.c.bf16 %v1494_v58, %v1493_v57 }
 0x54f   :  { %3606 = vmatpush3.bf16.msra.mxu0 %v3605_v61 }
 0x550   :  { %3591 = vmatpush1.bf16.msra.mxu1 %v3590_v60  ;;  %v1512_v60 = vld [vmem:[%s5989_s5 + $0xb8] sm:$0xff] }
 0x551   :  { %3592 = vmatprep.subr.bf16.mxu1 %v3971_v5  ;;  %v3607_v62 = vpack.c.bf16 %v1512_v60, %v1511_v59 }
 0x553   :  { %3608 = vmatprep.subr.bf16.mxu0 %v3607_v62 }
 0x554   :  { %3594 = vmatpush1.bf16.msra.mxu1 %v3593_v51  ;;  %v1495_v51 = vld [vmem:[%s5989_s5 + $0x30] sm:$0xff] }
 0x555   :  { %3628 = vmatprep.subr.bf16.mxu1 %v3627_v21  ;;  %v3609_v52 = vpack.c.bf16 %v1496_v0, %v1495_v51 }
 0x557   :  { %1365 = vmatmul.mubr.f32.vlgmr.msra.gmra.mrb[20].mxu1 %v1140_v10  ;;  %v1498_v10 = vld [vmem:[%s5989_s5 + $0x48] sm:$0xff]  ;;  %3610 = vmatpush3.bf16.msra.mxu0 %v3609_v52 }
 0x558   :  { %2951 = vmatprep.mubr.msk.f32.mxu1 %vm224_vm4, %v1090_v4  ;;  %3630 = vmatpush3.bf16.msra.mxu1 %v3627_v21  ;;  %v1516_v4 = vld [vmem:[%s5989_s5 + $0xd8] sm:$0xff]  ;;  %v3613_v40 = vpack.c.bf16 %v1498_v10, %v1497_v9 }
 0x559   :  { %3632 = vmatprep.subr.bf16.mxu1 %v3631_v26  ;;  %3612 = vmatprep.subr.bf16.mxu0 %v3611_v8  ;;  %v3615_v56 = vpack.c.bf16 %v1516_v4, %v1515_v33 }
 0x55b   :  { %1370 = vmatmul.mubr.f32.gmra.mrb[22].mxu1 %v1141_v48  ;;  %v1517_v48 = vld [vmem:[%s5989_s5 + $0xe0] sm:$0xff]  ;;  %3614 = vmatpush3.bf16.msra.mxu0 %v3613_v40 }
 0x55c   :  { %2952 = vmatprep.mubr.msk.f32.mxu1 %vm224_vm4, %v1093_v63  ;;  %3634 = vmatpush3.bf16.msra.mxu1 %v3631_v26  ;;  %v3617_v63 = vpack.c.bf16 %v1500_v24, %v1499_v11  ;;  %v3619_v14 = vpack.c.bf16 %v1518_v13, %v1517_v48 }
 0x55d   :  { %3636 = vmatprep.subr.bf16.mxu1 %v3635_v28  ;;  %3616 = vmatprep.subr.bf16.mxu0 %v3615_v56 }
 0x55f   :  { %1375 = vmatmul.mubr.f32.gmra.mrb[24].mxu1 %v1142_v18  ;;  %3618 = vmatpush3.bf16.msra.mxu0 %v3617_v63 }
 0x560   :  { %2953 = vmatprep.mubr.msk.f32.mxu1 %vm224_vm4, %v1095_v15  ;;  %3638 = vmatpush3.bf16.msra.mxu1 %v3635_v28 }
 0x561   :  { %3640 = vmatprep.subr.bf16.mxu1 %v3639_v35  ;;  %3620 = vmatprep.subr.bf16.mxu0 %v3619_v14 }
 0x563   :  { %1380 = vmatmul.mubr.f32.gmra.mrb[26].mxu1 %v1143_v42  ;;  %3622 = vmatpush3.bf16.msra.mxu0 %v3621_v17 }
 0x564   :  { %3642 = vmatpush3.bf16.msra.mxu1 %v3639_v35  ;;  %3624 = vmatprep.subr.bf16.mxu0 %v3623_v41 }
 0x565   :  { %3643 = vmatprep.subr.bf16.mxu1 %v3971_v5 }
 0x567   :  { %3626 = vmatpush3.bf16.msra.mxu0 %v3625_v55 }
 0x5fa   :  { %v3113_v18 = vpop.f32.mrb[12].mxu1 }
 0x5fb   :  { %v3114_v19 = vpop.f32.mrb[13].mxu1 }
 0x5fc   :  { %v3115_v15 = vadd.f32 %v3114_v19, %v3113_v18 }
 0x5fe   :  { %v3116_v20 = vpop.f32.mrb[14].mxu1  ;;  %v1282_v28 = vadd.f32 %v3115_v15, %v2949_v6 }
 0x5ff   :  { %v3117_v42 = vpop.f32.mrb[15].mxu1 }
 0x600   :  { %v3118_v7 = vadd.f32 %v3117_v42, %v3116_v20 }
 0x602   :  { %v3119_v16 = vpop.f32.mrb[16].mxu1  ;;  %v1287_v37 = vadd.f32 %v3118_v7, %v2949_v6 }
 0x603   :  { %v3120_v21 = vpop.f32.mrb[17].mxu1 }
 0x604   :  { %v3121_v22 = vadd.f32 %v3120_v21, %v3119_v16 }
 0x606   :  { %v3122_v25 = vpop.f32.mrb[18].mxu1  ;;  %v1292_v50 = vadd.f32 %v3121_v22, %v2949_v6 }
 0x607   :  { %v3123_v26 = vpop.f32.mrb[19].mxu1 }
 0x608   :  { %v3124_v27 = vadd.f32 %v3123_v26, %v3122_v25 }
 0x60a   :  { %v1297_v0 = vadd.f32 %v3124_v27, %v2949_v6 }
 0x62a   :  { %v1366_v29 = vpop.f32.mrb[20].mxu1 }
 0x62b   :  { %v1367_v30 = vadd.f32 %v1366_v29, %v1282_v28  ;;  %v1368_v35 = vpop.f32.mrb[21].mxu1 }
 0x62d   :  { %v1385_v36 = vmax.f32 %v1367_v30, 0.0 }
 0x62e   :  { %v1371_v38 = vpop.f32.mrb[22].mxu1 }
 0x62f   :  { %v1372_v39 = vadd.f32 %v1371_v38, %v1287_v37  ;;  %v1373_v43 = vpop.f32.mrb[23].mxu1  ;;  %v1393_v44 = vrot.slane %v1385_v36, 6 }
 0x631   :  { %v1386_v49 = vmax.f32 %v1372_v39, 0.0  ;;  %v5131_v60 = vsel %vm177_vm1, 0.0, %v1393_v44 }
 0x632   :  { %v1376_v54 = vpop.f32.mrb[24].mxu1  ;;  %v1447_v33 = vrot.slane %v5131_v60, 4  ;;  %v1413_v24 = vrot.slane %v5131_v60, 1  ;;  %v1437_v48 = vrot.slane %v5131_v60, 3  ;;  %v1423_v41 = vrot.slane %v5131_v60, 2 }
 0x633   :  { %v1394_v57 = vrot.slane %v1386_v49, 6  ;;  %v1377_v58 = vadd.f32 %v1376_v54, %v1292_v50  ;;  %v1378_v59 = vpop.f32.mrb[25].mxu1 }
 0x635   :  { %v5134_v61 = vsel %vm177_vm1, %v1393_v44, %v1394_v57  ;;  %v5137_v62 = vsel %vm177_vm1, %v1394_v57, 0.0  ;;  %v1387_v51 = vmax.f32 %v1377_v58, 0.0 }
 0x636   :  { %v1416_v1 = vrot.slane %v5137_v62, 1  ;;  %v1440_v2 = vrot.slane %v5137_v62, 3  ;;  %v1450_v52 = vrot.slane %v5137_v62, 4  ;;  %v1381_v8 = vpop.f32.mrb[26].mxu1  ;;  %v1448_v4 = vrot.slane %v5134_v61, 4 }
 0x637   :  { %v1382_v9 = vadd.f32 %v1381_v8, %v1297_v0  ;;  %v1383_v10 = vpop.f32.mrb[27].mxu1  ;;  %v1414_v40 = vrot.slane %v5134_v61, 1  ;;  %v1396_v56 = vrot.slane %v1387_v51, 6  ;;  %v1438_v11 = vrot.slane %v5134_v61, 3 }
 0x638   :  { %v1449_v63 = vsel %vm152_vm6, %v1447_v33, %v1448_v4  ;;  %v1451_v14 = vsel %vm152_vm6, %v1448_v4, %v1450_v52  ;;  %v1424_v47 = vrot.slane %v5134_v61, 2  ;;  %v1426_v31 = vrot.slane %v5137_v62, 2 }
 0x639   :  { %v1388_v13 = vmax.f32 %v1382_v9, 0.0  ;;  %3328 = vmatprep.mubr.msk.f32.mxu1 %vm224_vm4, %v1449_v63  ;;  %v1417_v3 = vsel %vm115_vm2, %v1414_v40, %v1416_v1  ;;  %v1441_v34 = vsel %vm141_vm3, %v1438_v11, %v1440_v2  ;;  %v1415_v17 = vsel %vm115_vm2, %v1413_v24, %v1414_v40 }
 0x63a   :  { %v1439_v18 = vsel %vm141_vm3, %v1437_v48, %v1438_v11  ;;  %3329 = vmatmul.mubr.msk.f32.vlgmr.msra.gmra.mrb[28].mxu1 %vm224_vm4, %v1451_v14  ;;  %v3915_v15 = vpack.i.bf16 %v1417_v3, %v1441_v34  ;;  %v1406_v42 = vsel %vm177_vm1, 0.0, %v1396_v56  ;;  %v1425_v57 = vsel %vm126_vm5, %v1423_v41, %v1424_v47 }
 0x63b   :  { %v1397_v19 = vrot.slane %v1388_v13, 6  ;;  %v3910_v20 = vpack.i.bf16 %v1415_v17, %v1439_v18  ;;  %v1452_v26 = vrot.slane %v1406_v42, 4  ;;  %v1418_v29 = vrot.slane %v1406_v42, 1  ;;  %v1778_v17 = vld [vmem:[%s5991_s6] sm:$0xff]  ;;  %v1779_v18 = vld [vmem:[%s5991_s6 + $0x8] sm:$0xff] }
 0x63c   :  { %3916 = vrot.lane.b32.xlu1 %v3915_v15, %s3972_s22  ;;  %v1442_v30 = vrot.slane %v1406_v42, 3  ;;  %v1427_v0 = vsel %vm126_vm5, %v1424_v47, %v1426_v31  ;;  %v1428_v10 = vrot.slane %v1406_v42, 2  ;;  %v3644_v15 = vpack.c.bf16 %v1779_v18, %v1778_v17  ;;  %v1795_v47 = vld [vmem:[%s5991_s6 + $0x88] sm:$0xff] }
 0x63d   :  { %v1398_v7 = vsel %vm177_vm1, %v1396_v56, %v1397_v19  ;;  %v1408_v16 = vsel %vm177_vm1, %v1397_v19, 0.0  ;;  %3911 = vrot.lane.b32.xlu0 %v3910_v20, %s3972_s22  ;;  %v1780_v19 = vld [vmem:[%s5991_s6 + $0x10] sm:$0xff]  ;;  %v1781_v20 = vld [vmem:[%s5991_s6 + $0x18] sm:$0xff] }
 0x63e   :  { %v1421_v21 = vrot.slane %v1408_v16, 1  ;;  %v1445_v22 = vrot.slane %v1408_v16, 3  ;;  %v1455_v25 = vrot.slane %v1408_v16, 4  ;;  %v1453_v27 = vrot.slane %v1398_v7, 4  ;;  %3645 = vmatpush1.bf16.msra.mxu1 %v3644_v15 }
 0x63f   :  { %v1419_v6 = vrot.slane %v1398_v7, 1  ;;  %v1443_v28 = vrot.slane %v1398_v7, 3  ;;  %v1429_v1 = vrot.slane %v1398_v7, 2  ;;  %v1431_v52 = vrot.slane %v1408_v16, 2  ;;  %3646 = vmatprep.subr.bf16.mxu1 %v3971_v5  ;;  %v1783_v16 = vld [vmem:[%s5991_s6 + $0x28] sm:$0xff] }
 0x640   :  { %v1454_v35 = vsel %vm152_vm6, %v1452_v26, %v1453_v27  ;;  %v1456_v36 = vsel %vm152_vm6, %v1453_v27, %v1455_v25  ;;  %v1785_v25 = vld [vmem:[%s5991_s6 + $0x38] sm:$0xff]  ;;  %v1786_v27 = vld [vmem:[%s5991_s6 + $0x40] sm:$0xff] }
 0x641   :  { %v1422_v37 = vsel %vm115_vm2, %v1419_v6, %v1421_v21  ;;  %v1446_v38 = vsel %vm141_vm3, %v1443_v28, %v1445_v22  ;;  %3331 = vmatprep.mubr.msk.f32.mxu1 %vm224_vm4, %v1454_v35  ;;  %v1420_v43 = vsel %vm115_vm2, %v1418_v29, %v1419_v6  ;;  %v1444_v44 = vsel %vm141_vm3, %v1442_v30, %v1443_v28  ;;  %v1784_v22 = vld [vmem:[%s5991_s6 + $0x30] sm:$0xff]  ;;  %v1787_v6 = vld [vmem:[%s5991_s6 + $0x48] sm:$0xff]  ;;  %v1789_v30 = vld [vmem:[%s5991_s6 + $0x58] sm:$0xff] }
 0x642   :  { %v3925_v39 = vpack.i.bf16 %v1422_v37, %v1446_v38  ;;  %3332 = vmatmul.mubr.msk.f32.gmra.mrb[30].mxu1 %vm224_vm4, %v1456_v36  ;;  %v3920_v45 = vpack.i.bf16 %v1420_v43, %v1444_v44  ;;  %v1432_v48 = vsel %vm126_vm5, %v1429_v1, %v1431_v52  ;;  %v3653_v26 = vpack.c.bf16 %v1785_v25, %v1784_v22  ;;  %v1788_v29 = vld [vmem:[%s5991_s6 + $0x50] sm:$0xff]  ;;  %v1790_v36 = vld [vmem:[%s5991_s6 + $0x60] sm:$0xff]  ;;  %v1791_v37 = vld [vmem:[%s5991_s6 + $0x68] sm:$0xff] }
 0x643   :  { %v3656_v28 = vpack.c.bf16 %v1787_v6, %v1786_v27  ;;  %v3659_v35 = vpack.c.bf16 %v1789_v30, %v1788_v29  ;;  %v3662_v38 = vpack.c.bf16 %v1791_v37, %v1790_v36  ;;  %v1793_v43 = vld [vmem:[%s5991_s6 + $0x78] sm:$0xff] }
 0x644   :  { %3926 = vrot.lane.b32.xlu1 %v3925_v39, %s3972_s22  ;;  %3921 = vrot.lane.b32.xlu0 %v3920_v45, %s3972_s22  ;;  %v1792_v39 = vld [vmem:[%s5991_s6 + $0x70] sm:$0xff]  ;;  %v1794_v45 = vld [vmem:[%s5991_s6 + $0x80] sm:$0xff] }
 0x645   :  { %v3665_v44 = vpack.c.bf16 %v1793_v43, %v1792_v39  ;;  %v3668_v31 = vpack.c.bf16 %v1795_v47, %v1794_v45 }
 0x6ae   :  { %v3917_v49 = vpop.permute.xlu1 %3916 }
 0x6af   :  { %v3912_v50 = vpop.permute.xlu0 %3911  ;;  %v3918_v53 = vunpack.i.l.bf16 %v3917_v49  ;;  %v3919_v51 = vunpack.i.h.bf16 %v3917_v49  ;;  %v1796_v49 = vld [vmem:[%s5991_s6 + $0x90] sm:$0xff] }
 0x6b0   :  { %v3914_v54 = vunpack.i.h.bf16 %v3912_v50  ;;  %v3913_v55 = vunpack.i.l.bf16 %v3912_v50  ;;  %v1797_v50 = vld [vmem:[%s5991_s6 + $0x98] sm:$0xff] }
 0x6b1   :  { %v1486_v62 = vsel %vm224_vm4, %v1427_v0, %v3918_v53  ;;  %v1482_v9 = vsel %vm224_vm4, %v5134_v61, %v3919_v51  ;;  %v3671_v41 = vpack.c.bf16 %v1797_v50, %v1796_v49  ;;  %v1798_v53 = vld [vmem:[%s5991_s6 + $0xa0] sm:$0xff] }
 0x6b2   :  { %v1485_v58 = vsel %vm224_vm4, %v1425_v57, %v3913_v55  ;;  %v1481_v59 = vsel %vm224_vm4, %v5131_v60, %v3914_v54  ;;  %v1430_v60 = vsel %vm126_vm5, %v1428_v10, %v1429_v1  ;;  %v1799_v54 = vld [vmem:[%s5991_s6 + $0xa8] sm:$0xff]  ;;  %v1800_v57 = vld [vmem:[%s5991_s6 + $0xb0] sm:$0xff]  ;;  %v2954_v0 = vld [vmem:[%s5992_s14] ss:$0 sm:$0xff] }
 0x6b3   :  { %1608 = vmatprep.mubr.f32.mxu0 %v1485_v58  ;;  %v3674_v55 = vpack.c.bf16 %v1799_v54, %v1798_v53  ;;  %v1801_v58 = vld [vmem:[%s5991_s6 + $0xb8] sm:$0xff] }
 0x6b4   :  { %1609 = vmatmul.mubr.f32.vlgmr.msra.gmra.mrb[24].mxu0 %v1481_v59  ;;  %v3677_v59 = vpack.c.bf16 %v1801_v58, %v1800_v57 }
 0x6b5   :  { %1613 = vmatprep.mubr.f32.mxu0 %v1486_v62 }
 0x6b6   :  { %v3927_v2 = vpop.permute.xlu1 %3926  ;;  %v3922_v8 = vpop.permute.xlu0 %3921 }
 0x6b7   :  { %v3928_v33 = vunpack.i.l.bf16 %v3927_v2  ;;  %v3924_v4 = vunpack.i.h.bf16 %v3922_v8  ;;  %v3923_v40 = vunpack.i.l.bf16 %v3922_v8  ;;  %v3929_v24 = vunpack.i.h.bf16 %v3927_v2 }
 0x6b8   :  { %1614 = vmatmul.mubr.f32.gmra.mrb[26].mxu0 %v1482_v9 }
 0x6b9   :  { %v1487_v56 = vsel %vm224_vm4, %v1430_v60, %v3923_v40  ;;  %v1483_v11 = vsel %vm224_vm4, %v1406_v42, %v3924_v4  ;;  %v1488_v13 = vsel %vm224_vm4, %v1432_v48, %v3928_v33  ;;  %v1484_v61 = vsel %vm224_vm4, %v1398_v7, %v3929_v24  ;;  %v1782_v7 = vld [vmem:[%s5991_s6 + $0x20] sm:$0xff] }
 0x6ba   :  { %1618 = vmatprep.mubr.f32.mxu0 %v1487_v56  ;;  %v3647_v42 = vpack.c.bf16 %v1781_v20, %v1780_v19  ;;  %v3650_v21 = vpack.c.bf16 %v1783_v16, %v1782_v7 }
 0x6bc   :  { %1619 = vmatmul.mubr.f32.gmra.mrb[28].mxu0 %v1483_v11  ;;  %3648 = vmatpush1.bf16.msra.mxu1 %v3647_v42 }
 0x6bd   :  { %1623 = vmatprep.mubr.f32.mxu0 %v1488_v13  ;;  %3649 = vmatprep.subr.bf16.mxu1 %v3971_v5 }
 0x6c0   :  { %1624 = vmatmul.mubr.f32.gmra.mrb[30].mxu0 %v1484_v61  ;;  %3651 = vmatpush1.bf16.msra.mxu1 %v3650_v21 }
 0x6c1   :  { %3652 = vmatprep.subr.bf16.mxu1 %v3971_v5 }
 0x6c4   :  { %3654 = vmatpush1.bf16.msra.mxu1 %v3653_v26 }
 0x6c5   :  { %3655 = vmatprep.subr.bf16.mxu1 %v3971_v5 }
 0x6c8   :  { %3657 = vmatpush1.bf16.msra.mxu1 %v3656_v28 }
 0x6c9   :  { %3658 = vmatprep.subr.bf16.mxu1 %v3971_v5 }
 0x6cc   :  { %3660 = vmatpush1.bf16.msra.mxu1 %v3659_v35 }
 0x6cd   :  { %3661 = vmatprep.subr.bf16.mxu1 %v3971_v5 }
 0x6d0   :  { %3663 = vmatpush1.bf16.msra.mxu1 %v3662_v38 }
 0x6d1   :  { %3664 = vmatprep.subr.bf16.mxu1 %v3971_v5 }
 0x6d4   :  { %3666 = vmatpush1.bf16.msra.mxu1 %v3665_v44 }
 0x6d5   :  { %3667 = vmatprep.subr.bf16.mxu1 %v3971_v5 }
 0x6d8   :  { %3669 = vmatpush1.bf16.msra.mxu1 %v3668_v31 }
 0x6d9   :  { %3670 = vmatprep.subr.bf16.mxu1 %v3971_v5 }
 0x6dc   :  { %3672 = vmatpush1.bf16.msra.mxu1 %v3671_v41 }
 0x6dd   :  { %3673 = vmatprep.subr.bf16.mxu1 %v3971_v5 }
 0x6e0   :  { %3675 = vmatpush1.bf16.msra.mxu1 %v3674_v55 }
 0x6e1   :  { %3676 = vmatprep.subr.bf16.mxu1 %v3971_v5 }
 0x6e4   :  { %3678 = vmatpush1.bf16.msra.mxu1 %v3677_v59 }
 0x70d   :  { %v5188_v63 = vpop.f32.mrb[28].mxu1 }
 0x70e   :  { %v5190_v14 = vpop.f32.mrb[29].mxu1 }
 0x715   :  { %v5192_v3 = vpop.f32.mrb[30].mxu1 }
 0x716   :  { %v5194_v34 = vpop.f32.mrb[31].mxu1 }
 0x787   :  { %v3157_v51 = vpop.f32.mrb[24].mxu0 }
 0x788   :  { %v3158_v62 = vpop.f32.mrb[25].mxu0 }
 0x789   :  { %v3159_v1 = vadd.f32 %v3158_v62, %v3157_v51 }
 0x78b   :  { %v1611_v2 = vadd.f32 %v3159_v1, %v2954_v0  ;;  %v3160_v52 = vpop.f32.mrb[26].mxu0 }
 0x78c   :  { %v3161_v8 = vpop.f32.mrb[27].mxu0 }
 0x78d   :  { %v1696_v9 = vadd.f32 %v5190_v14, %v1611_v2  ;;  %v3162_v10 = vadd.f32 %v3161_v8, %v3160_v52  ;;  %v2066_v2 = vld [vmem:[%s5993_s7 + $0x80] sm:$0xff]  ;;  %v2067_v52 = vld [vmem:[%s5993_s7 + $0x88] sm:$0xff] }
 0x78e   :  { %v2050_v8 = vld [vmem:[%s5993_s7] sm:$0xff] }
 0x78f   :  { %v1714_v33 = vmax.f32 %v1696_v9, 0.0  ;;  %v1616_v4 = vadd.f32 %v3162_v10, %v2954_v0  ;;  %v3163_v40 = vpop.f32.mrb[28].mxu0  ;;  %v3679_v9 = vpack.c.bf16 %v2067_v52, %v2066_v2  ;;  %v2051_v10 = vld [vmem:[%s5993_s7 + $0x8] sm:$0xff] }
 0x790   :  { %v3164_v60 = vpop.f32.mrb[29].mxu0 }
 0x791   :  { %v1722_v56 = vrot.slane %v1714_v33, 7  ;;  %v1701_v11 = vadd.f32 %v5188_v63, %v1616_v4  ;;  %v3165_v24 = vadd.f32 %v3164_v60, %v3163_v40  ;;  %v2068_v33 = vld [vmem:[%s5993_s7 + $0x90] sm:$0xff]  ;;  %v2069_v4 = vld [vmem:[%s5993_s7 + $0x98] sm:$0xff]  ;;  %v3681_v40 = vpack.c.bf16 %v2051_v10, %v2050_v8  ;;  %3680 = vmatprep.subr.bf16.mxu0 %v3679_v9 }
 0x792   :  { %v3683_v60 = vpack.c.bf16 %v2069_v4, %v2068_v33 }
 0x793   :  { %v1734_v48 = vsel %vm815_vm7, 0.0, %v1722_v56  ;;  %v1715_v13 = vmax.f32 %v1701_v11, 0.0  ;;  %v1621_v61 = vadd.f32 %v3165_v24, %v2954_v0  ;;  %v3166_v17 = vpop.f32.mrb[30].mxu0  ;;  %v2053_v11 = vld [vmem:[%s5993_s7 + $0x18] sm:$0xff]  ;;  %v2070_v24 = vld [vmem:[%s5993_s7 + $0xa0] sm:$0xff]  ;;  %3682 = vmatpush3.bf16.msra.mxu0 %v3681_v40 }
 0x794   :  { %v3167_v18 = vpop.f32.mrb[31].mxu0  ;;  %v1752_v14 = vrot.slane %v1734_v48, 2  ;;  %v1742_v42 = vrot.slane %v1734_v48, 1  ;;  %3684 = vmatprep.subr.bf16.mxu0 %v3683_v60 }
 0x795   :  { %v1723_v19 = vrot.slane %v1715_v13, 7  ;;  %v1706_v15 = vadd.f32 %v5194_v34, %v1621_v61  ;;  %v3168_v20 = vadd.f32 %v3167_v18, %v3166_v17  ;;  %v2054_v17 = vld [vmem:[%s5993_s7 + $0x20] sm:$0xff]  ;;  %v2055_v18 = vld [vmem:[%s5993_s7 + $0x28] sm:$0xff] }
 0x797   :  { %v1724_v7 = vsel %vm815_vm7, %v1722_v56, %v1723_v19  ;;  %v1716_v16 = vmax.f32 %v1706_v15, 0.0  ;;  %v1626_v21 = vadd.f32 %v3168_v20, %v2954_v0  ;;  %v1736_v22 = vsel %vm815_vm7, %v1723_v19, 0.0  ;;  %v2052_v56 = vld [vmem:[%s5993_s7 + $0x10] sm:$0xff]  ;;  %v2073_v15 = vld [vmem:[%s5993_s7 + $0xb8] sm:$0xff] }
 0x798   :  { %v1753_v63 = vrot.slane %v1724_v7, 2  ;;  %v1743_v25 = vrot.slane %v1724_v7, 1  ;;  %v1745_v26 = vrot.slane %v1736_v22, 1  ;;  %v1755_v27 = vrot.slane %v1736_v22, 2  ;;  %v2072_v19 = vld [vmem:[%s5993_s7 + $0xb0] sm:$0xff] }
 0x799   :  { %v1725_v6 = vrot.slane %v1716_v16, 7  ;;  %v1711_v28 = vadd.f32 %v5192_v3, %v1626_v21  ;;  %v3685_v13 = vpack.c.bf16 %v2053_v11, %v2052_v56  ;;  %v3689_v20 = vpack.c.bf16 %v2055_v18, %v2054_v17  ;;  %v2074_v16 = vld [vmem:[%s5993_s7 + $0xc0] sm:$0xff]  ;;  %v2075_v21 = vld [vmem:[%s5993_s7 + $0xc8] sm:$0xff] }
 0x79a   :  { %v1754_v29 = vsel %vm126_vm5, %v1752_v14, %v1753_v63  ;;  %v1746_v34 = vsel %vm115_vm2, %v1743_v25, %v1745_v26  ;;  %v1744_v30 = vsel %vm115_vm2, %v1742_v42, %v1743_v25  ;;  %v1756_v35 = vsel %vm126_vm5, %v1753_v63, %v1755_v27  ;;  %v2056_v42 = vld [vmem:[%s5993_s7 + $0x30] sm:$0xff]  ;;  %v2058_v25 = vld [vmem:[%s5993_s7 + $0x40] sm:$0xff]  ;;  %v2059_v26 = vld [vmem:[%s5993_s7 + $0x48] sm:$0xff] }
 0x79b   :  { %v1717_v36 = vmax.f32 %v1711_v28, 0.0  ;;  %2960 = vmatprep.mubr.msk.f32.mxu1 %vm224_vm4, %v1754_v29  ;;  %1764 = vrot.lane.b32.xlu1 %v1746_v34, %s3972_s22  ;;  %v1735_v37 = vsel %vm815_vm7, 0.0, %v1725_v6  ;;  %v3691_v14 = vpack.c.bf16 %v2073_v15, %v2072_v19  ;;  %v3695_v63 = vpack.c.bf16 %v2075_v21, %v2074_v16  ;;  %v2076_v27 = vld [vmem:[%s5993_s7 + $0xd0] sm:$0xff] }
 0x79c   :  { %1762 = vrot.lane.b32.xlu0 %v1744_v30, %s3972_s22  ;;  %v1747_v45 = vrot.slane %v1735_v37, 1  ;;  %v1757_v54 = vrot.slane %v1735_v37, 2  ;;  %3686 = vmatpush3.bf16.msra.mxu0 %v3685_v13  ;;  %v3697_v28 = vpack.c.bf16 %v2059_v26, %v2058_v25  ;;  %v2060_v34 = vld [vmem:[%s5993_s7 + $0x50] sm:$0xff]  ;;  %v2061_v30 = vld [vmem:[%s5993_s7 + $0x58] sm:$0xff] }
 0x79d   :  { %v1726_v38 = vrot.slane %v1717_v36, 7  ;;  %v2079_v36 = vld [vmem:[%s5993_s7 + $0xe8] sm:$0xff] }
 0x79f   :  { %v1727_v3 = vsel %vm815_vm7, %v1725_v6, %v1726_v38  ;;  %v1737_v39 = vsel %vm815_vm7, %v1726_v38, 0.0  ;;  %v2077_v6 = vld [vmem:[%s5993_s7 + $0xd8] sm:$0xff] }
 0x7a0   :  { %v1748_v43 = vrot.slane %v1727_v3, 1  ;;  %v1750_v44 = vrot.slane %v1737_v39, 1  ;;  %v1758_v53 = vrot.slane %v1727_v3, 2  ;;  %v1760_v58 = vrot.slane %v1737_v39, 2  ;;  %v2063_v39 = vld [vmem:[%s5993_s7 + $0x68] sm:$0xff] }
 0x7a1   :  { %v3699_v29 = vpack.c.bf16 %v2077_v6, %v2076_v27 }
 0x7a2   :  { %v1751_v47 = vsel %vm115_vm2, %v1748_v43, %v1750_v44  ;;  %v1749_v31 = vsel %vm115_vm2, %v1747_v45, %v1748_v43  ;;  %v1759_v57 = vsel %vm126_vm5, %v1757_v54, %v1758_v53  ;;  %v1761_v62 = vsel %vm126_vm5, %v1758_v53, %v1760_v58  ;;  %v2080_v43 = vld [vmem:[%s5993_s7 + $0xf0] sm:$0xff]  ;;  %v2081_v44 = vld [vmem:[%s5993_s7 + $0xf8] sm:$0xff] }
 0x7a3   :  { %1768 = vrot.lane.b32.xlu1 %v1751_v47, %s3972_s22  ;;  %1766 = vrot.lane.b32.xlu0 %v1749_v31, %s3972_s22  ;;  %v3707_v47 = vpack.c.bf16 %v2081_v44, %v2080_v43  ;;  %v2959_v31 = vld [vmem:[%s5994_s15] ss:$0 sm:$0xff] }
 0x80d   :  { %v1765_v41 = vpop.permute.xlu1 %1764 }
 0x80e   :  { %v1763_v49 = vpop.permute.xlu0 %1762  ;;  %v1775_v55 = vsel %vm224_vm4, %v1724_v7, %v1765_v41  ;;  %v2057_v7 = vld [vmem:[%s5993_s7 + $0x38] sm:$0xff] }
 0x80f   :  { %v1774_v50 = vsel %vm224_vm4, %v1734_v48, %v1763_v49  ;;  %v2071_v48 = vld [vmem:[%s5993_s7 + $0xa8] sm:$0xff]  ;;  %v3693_v22 = vpack.c.bf16 %v2057_v7, %v2056_v42 }
 0x810   :  { %1882 = vmatmul.mubr.f32.vlgmr.msra.gmra.mrb[32].mxu1 %v1774_v50  ;;  %v3687_v61 = vpack.c.bf16 %v2071_v48, %v2070_v24 }
 0x811   :  { %2961 = vmatprep.mubr.msk.f32.mxu1 %vm224_vm4, %v1756_v35  ;;  %v2078_v35 = vld [vmem:[%s5993_s7 + $0xe0] sm:$0xff] }
 0x812   :  { %3688 = vmatprep.subr.bf16.mxu0 %v3687_v61  ;;  %v3703_v38 = vpack.c.bf16 %v2079_v36, %v2078_v35 }
 0x813   :  { %3690 = vmatpush3.bf16.msra.mxu0 %v3689_v20 }
 0x814   :  { %1887 = vmatmul.mubr.f32.gmra.mrb[34].mxu1 %v1775_v55  ;;  %3692 = vmatprep.subr.bf16.mxu0 %v3691_v14 }
 0x815   :  { %2962 = vmatprep.mubr.msk.f32.mxu1 %vm224_vm4, %v1759_v57  ;;  %v1767_v59 = vpop.permute.xlu0 %1766  ;;  %v1769_v0 = vpop.permute.xlu1 %1768 }
 0x816   :  { %v1776_v51 = vsel %vm224_vm4, %v1735_v37, %v1767_v59  ;;  %v1777_v1 = vsel %vm224_vm4, %v1727_v3, %v1769_v0  ;;  %v3701_v37 = vpack.c.bf16 %v2061_v30, %v2060_v34  ;;  %v2062_v3 = vld [vmem:[%s5993_s7 + $0x60] sm:$0xff]  ;;  %v2064_v59 = vld [vmem:[%s5993_s7 + $0x70] sm:$0xff] }
 0x817   :  { %3694 = vmatpush3.bf16.msra.mxu0 %v3693_v22  ;;  %v3705_v45 = vpack.c.bf16 %v2063_v39, %v2062_v3 }
 0x818   :  { %1892 = vmatmul.mubr.f32.gmra.mrb[36].mxu1 %v1776_v51  ;;  %3696 = vmatprep.subr.bf16.mxu0 %v3695_v63  ;;  %v2065_v51 = vld [vmem:[%s5993_s7 + $0x78] sm:$0xff] }
 0x819   :  { %2963 = vmatprep.mubr.msk.f32.mxu1 %vm224_vm4, %v1761_v62 }
 0x81b   :  { %3698 = vmatpush3.bf16.msra.mxu0 %v3697_v28 }
 0x81c   :  { %1897 = vmatmul.mubr.f32.gmra.mrb[38].mxu1 %v1777_v1  ;;  %3700 = vmatprep.subr.bf16.mxu0 %v3699_v29  ;;  %v3709_v1 = vpack.c.bf16 %v2065_v51, %v2064_v59 }
 0x81f   :  { %3702 = vmatpush3.bf16.msra.mxu0 %v3701_v37 }
 0x820   :  { %3704 = vmatprep.subr.bf16.mxu0 %v3703_v38 }
 0x823   :  { %3706 = vmatpush3.bf16.msra.mxu0 %v3705_v45 }
 0x824   :  { %3708 = vmatprep.subr.bf16.mxu0 %v3707_v47 }
 0x827   :  { %3710 = vmatpush3.bf16.msra.mxu0 %v3709_v1 }
 0x828   :  { %3711 = vmatprep.subr.bf16.mxu0 %v3971_v5 }
 0x8e3   :  { %v1883_v49 = vpop.f32.mrb[32].mxu1 }
 0x8e4   :  { %v1884_v50 = vadd.f32 %v2959_v31, %v1883_v49  ;;  %v1885_v41 = vpop.f32.mrb[33].mxu1 }
 0x8e6   :  { %v1902_v53 = vmax.f32 %v1884_v50, 0.0 }
 0x8e7   :  { %v1888_v54 = vpop.f32.mrb[34].mxu1 }
 0x8e8   :  { %v5406_v55 = vadd.f32 %v1902_v53, %v4795_v46  ;;  %v1889_v57 = vadd.f32 %v2959_v31, %v1888_v54  ;;  %v1890_v58 = vpop.f32.mrb[35].mxu1 }
 0x8e9   :  { %v2083_v58 = vld [vmem:[%s5993_s7 + $0x108] sm:$0xff] }
 0x8ea   :  { %v1914_v0 = vrot.slane %v5406_v55, 5  ;;  %v1903_v62 = vmax.f32 %v1889_v57, 0.0  ;;  %v2082_v57 = vld [vmem:[%s5993_s7 + $0x100] sm:$0xff] }
 0x8eb   :  { %v1893_v2 = vpop.f32.mrb[36].mxu1 }
 0x8ec   :  { %v5416_v52 = vsel %vm94_vm0, 0.0, %v1914_v0  ;;  %v5419_v46 = vadd.f32 %v1903_v62, %v4808_v23  ;;  %v1894_v8 = vadd.f32 %v2959_v31, %v1893_v2  ;;  %v1895_v9 = vpop.f32.mrb[37].mxu1 }
 0x8ed   :  { %v1934_v40 = vrot.slane %v5416_v52, 1  ;;  %v1958_v60 = vrot.slane %v5416_v52, 3  ;;  %v1982_v44 = vrot.slane %v5416_v52, 5 }
 0x8ee   :  { %v1915_v10 = vrot.slane %v5419_v46, 5  ;;  %v1904_v33 = vmax.f32 %v1894_v8, 0.0 }
 0x8ef   :  { %v1898_v4 = vpop.f32.mrb[38].mxu1 }
 0x8f0   :  { %v5426_v56 = vsel %vm94_vm0, %v1914_v0, %v1915_v10  ;;  %v5429_v11 = vsel %vm94_vm0, %v1915_v10, 0.0  ;;  %v5432_v23 = vadd.f32 %v1904_v33, %v4821_v32  ;;  %v1899_v24 = vadd.f32 %v2959_v31, %v1898_v4  ;;  %v1900_v48 = vpop.f32.mrb[39].mxu1 }
 0x8f1   :  { %v1935_v13 = vrot.slane %v5426_v56, 1  ;;  %v1937_v61 = vrot.slane %v5429_v11, 1  ;;  %v1959_v17 = vrot.slane %v5426_v56, 3  ;;  %v1961_v18 = vrot.slane %v5429_v11, 3 }
 0x8f2   :  { %v1917_v19 = vrot.slane %v5432_v23, 5  ;;  %v1905_v15 = vmax.f32 %v1899_v24, 0.0  ;;  %v1983_v39 = vrot.slane %v5426_v56, 5  ;;  %v1985_v43 = vrot.slane %v5429_v11, 5 }
 0x8f3   :  { %v1938_v20 = vsel %vm115_vm2, %v1935_v13, %v1937_v61  ;;  %v1962_v14 = vsel %vm141_vm3, %v1959_v17, %v1961_v18  ;;  %v1936_v32 = vsel %vm115_vm2, %v1934_v40, %v1935_v13  ;;  %v1960_v42 = vsel %vm141_vm3, %v1958_v60, %v1959_v17  ;;  %v2084_v40 = vld [vmem:[%s5993_s7 + $0x110] sm:$0xff]  ;;  %v2085_v60 = vld [vmem:[%s5993_s7 + $0x118] sm:$0xff]  ;;  %v2086_v18 = vld [vmem:[%s5993_s7 + $0x120] sm:$0xff] }
 0x8f4   :  { %v5444_v7 = vadd.f32 %v1905_v15, %v4833_v12  ;;  %v3935_v16 = vpack.i.bf16 %v1938_v20, %v1962_v14  ;;  %v3930_v21 = vpack.i.bf16 %v1936_v32, %v1960_v42  ;;  %v5447_v22 = vsel %vm94_vm0, 0.0, %v1917_v19 }
 0x8f5   :  { %v1939_v12 = vrot.slane %v5447_v22, 1  ;;  %v1963_v27 = vrot.slane %v5447_v22, 3  ;;  %v1986_v45 = vsel %vm94_vm0, %v1983_v39, %v1985_v43  ;;  %v1984_v47 = vsel %vm94_vm0, %v1982_v44, %v1983_v39  ;;  %v2090_v39 = vld [vmem:[%s5993_s7 + $0x140] sm:$0xff]  ;;  %v2091_v43 = vld [vmem:[%s5993_s7 + $0x148] sm:$0xff] }
 0x8f6   :  { %v1918_v63 = vrot.slane %v5444_v7, 5  ;;  %3936 = vrot.lane.b32.xlu1 %v3935_v16, %s3972_s22  ;;  %3931 = vrot.lane.b32.xlu0 %v3930_v21, %s3972_s22  ;;  %v1987_v50 = vrot.slane %v5447_v22, 5  ;;  %v1945_v54 = vrot.slane %v5426_v56, 2  ;;  %v1944_v0 = vrot.slane %v5416_v52, 2 }
 0x8f7   :  { %v1947_v62 = vrot.slane %v5429_v11, 2  ;;  %v3712_v10 = vpack.c.bf16 %v2083_v58, %v2082_v57  ;;  %v3715_v61 = vpack.c.bf16 %v2085_v60, %v2084_v40  ;;  %v1949_v32 = vrot.slane %v5447_v22, 2  ;;  %v2096_v57 = vld [vmem:[%s5993_s7 + $0x170] sm:$0xff]  ;;  %v2097_v58 = vld [vmem:[%s5993_s7 + $0x178] sm:$0xff] }
 0x8f8   :  { %v5453_v25 = vsel %vm94_vm0, %v1917_v19, %v1918_v63  ;;  %v5456_v26 = vsel %vm94_vm0, %v1918_v63, 0.0  ;;  %v1946_v9 = vsel %vm126_vm5, %v1944_v0, %v1945_v54  ;;  %v2087_v19 = vld [vmem:[%s5993_s7 + $0x128] sm:$0xff]  ;;  %v2105_v40 = vld [vmem:[%s5993_s7 + $0x1b8] sm:$0xff] }
 0x8f9   :  { %v1940_v6 = vrot.slane %v5453_v25, 1  ;;  %v1942_v28 = vrot.slane %v5456_v26, 1  ;;  %v1964_v29 = vrot.slane %v5453_v25, 3  ;;  %v1966_v34 = vrot.slane %v5456_v26, 3  ;;  %v2099_v0 = vld [vmem:[%s5993_s7 + $0x188] sm:$0xff] }
 0x8fa   :  { %v1988_v31 = vrot.slane %v5453_v25, 5  ;;  %v1990_v49 = vrot.slane %v5456_v26, 5  ;;  %v1948_v48 = vsel %vm126_vm5, %v1945_v54, %v1947_v62  ;;  %v1950_v17 = vrot.slane %v5453_v25, 2 }
 0x8fb   :  { %v1943_v30 = vsel %vm115_vm2, %v1940_v6, %v1942_v28  ;;  %v1967_v35 = vsel %vm141_vm3, %v1964_v29, %v1966_v34  ;;  %v1941_v36 = vsel %vm115_vm2, %v1939_v12, %v1940_v6  ;;  %v1965_v37 = vsel %vm141_vm3, %v1963_v27, %v1964_v29  ;;  %v2088_v29 = vld [vmem:[%s5993_s7 + $0x130] sm:$0xff]  ;;  %v2089_v34 = vld [vmem:[%s5993_s7 + $0x138] sm:$0xff] }
 0x8fc   :  { %v3945_v38 = vpack.i.bf16 %v1943_v30, %v1967_v35  ;;  %v3940_v3 = vpack.i.bf16 %v1941_v36, %v1965_v37  ;;  %v1991_v41 = vsel %vm94_vm0, %v1988_v31, %v1990_v49  ;;  %v1989_v53 = vsel %vm94_vm0, %v1987_v50, %v1988_v31  ;;  %v2092_v31 = vld [vmem:[%s5993_s7 + $0x150] sm:$0xff]  ;;  %v2093_v49 = vld [vmem:[%s5993_s7 + $0x158] sm:$0xff] }
 0x8fd   :  { %v1952_v42 = vrot.slane %v5456_v26, 2  ;;  %v1951_v12 = vsel %vm126_vm5, %v1949_v32, %v1950_v17  ;;  %v3718_v27 = vpack.c.bf16 %v2087_v19, %v2086_v18  ;;  %v1993_v37 = vrot.slane %v5426_v56, 6 }
 0x8fe   :  { %3946 = vrot.lane.b32.xlu1 %v3945_v38, %s3972_s22  ;;  %3941 = vrot.lane.b32.xlu0 %v3940_v3, %s3972_s22  ;;  %v3721_v38 = vpack.c.bf16 %v2089_v34, %v2088_v29  ;;  %v1992_v3 = vrot.slane %v5416_v52, 6  ;;  %v3727_v50 = vpack.c.bf16 %v2093_v49, %v2092_v31  ;;  %v1971_v18 = vrot.slane %v5429_v11, 4  ;;  %v2411_v34 = vld [vmem:[%s5995_s8 + $0x80] sm:$0xff] }
 0x8ff   :  { %v1953_v35 = vsel %vm126_vm5, %v1950_v17, %v1952_v42  ;;  %v1974_v32 = vrot.slane %v5453_v25, 4 }
 0x902   :  { %2028 = vrot.lane.b32.xlu1 %v1986_v45, %s3972_s22  ;;  %2026 = vrot.lane.b32.xlu0 %v1984_v47, %s3972_s22  ;;  %v1994_v45 = vsel %vm177_vm1, %v1992_v3, %v1993_v37  ;;  %v3724_v47 = vpack.c.bf16 %v2091_v43, %v2090_v39  ;;  %v2397_v43 = vld [vmem:[%s5995_s8 + $0x10] sm:$0xff] }
 0x906   :  { %2032 = vrot.lane.b32.xlu1 %v1991_v41, %s3972_s22  ;;  %2030 = vrot.lane.b32.xlu0 %v1989_v53, %s3972_s22  ;;  %v2094_v41 = vld [vmem:[%s5993_s7 + $0x160] sm:$0xff]  ;;  %v2095_v53 = vld [vmem:[%s5993_s7 + $0x168] sm:$0xff] }
 0x907   :  { %v3730_v54 = vpack.c.bf16 %v2095_v53, %v2094_v41  ;;  %v2400_v41 = vld [vmem:[%s5995_s8 + $0x28] sm:$0xff]  ;;  %v2417_v53 = vld [vmem:[%s5995_s8 + $0xb0] sm:$0xff] }
 0x968   :  { %v3937_v59 = vpop.permute.xlu1 %3936  ;;  %v3932_v51 = vpop.permute.xlu0 %3931 }
 0x969   :  { %v3938_v1 = vunpack.i.l.bf16 %v3937_v59  ;;  %v3934_v2 = vunpack.i.h.bf16 %v3932_v51  ;;  %v3933_v8 = vunpack.i.l.bf16 %v3932_v51  ;;  %v3939_v24 = vunpack.i.h.bf16 %v3937_v59  ;;  %v2098_v51 = vld [vmem:[%s5993_s7 + $0x180] sm:$0xff] }
 0x96a   :  { %v3733_v59 = vpack.c.bf16 %v2097_v58, %v2096_v57  ;;  %v3736_v62 = vpack.c.bf16 %v2099_v0, %v2098_v51  ;;  %v2402_v51 = vld [vmem:[%s5995_s8 + $0x38] sm:$0xff]  ;;  %v2419_v0 = vld [vmem:[%s5995_s8 + $0xc0] sm:$0xff] }
 0x96b   :  { %v2042_v33 = vsel %vm224_vm4, %v1946_v9, %v3933_v8  ;;  %v2038_v4 = vsel %vm224_vm4, %v5416_v52, %v3934_v2  ;;  %v2043_v13 = vsel %vm224_vm4, %v1948_v48, %v3938_v1  ;;  %v2039_v14 = vsel %vm224_vm4, %v5426_v56, %v3939_v24  ;;  %v2100_v1 = vld [vmem:[%s5993_s7 + $0x190] sm:$0xff]  ;;  %v2101_v2 = vld [vmem:[%s5993_s7 + $0x198] sm:$0xff]  ;;  %v2102_v9 = vld [vmem:[%s5993_s7 + $0x1a0] sm:$0xff] }
 0x96c   :  { %2185 = vmatprep.mubr.f32.mxu0 %v2042_v33  ;;  %v3739_v8 = vpack.c.bf16 %v2101_v2, %v2100_v1  ;;  %v1969_v24 = vrot.slane %v5426_v56, 4  ;;  %v1968_v48 = vrot.slane %v5416_v52, 4 }
 0x96d   :  { %2186 = vmatmul.mubr.f32.vlgmr.msra.gmra.mrb[32].mxu0 %v2038_v4  ;;  %v2104_v4 = vld [vmem:[%s5993_s7 + $0x1b0] sm:$0xff] }
 0x96e   :  { %3713 = vmatpush1.bf16.msra.mxu0 %v3712_v10  ;;  %2190 = vmatprep.mubr.f32.mxu0 %v2043_v13  ;;  %v2103_v10 = vld [vmem:[%s5993_s7 + $0x1a8] sm:$0xff]  ;;  %v3745_v60 = vpack.c.bf16 %v2105_v40, %v2104_v4  ;;  %v1970_v17 = vsel %vm152_vm6, %v1968_v48, %v1969_v24  ;;  %v1972_v52 = vsel %vm152_vm6, %v1969_v24, %v1971_v18  ;;  %v2406_v24 = vld [vmem:[%s5995_s8 + $0x58] sm:$0xff]  ;;  %v2423_v48 = vld [vmem:[%s5995_s8 + $0xe0] sm:$0xff] }
 0x96f   :  { %3714 = vmatprep.subr.bf16.mxu0 %v3971_v5  ;;  %v3742_v33 = vpack.c.bf16 %v2103_v10, %v2102_v9  ;;  %v2404_v9 = vld [vmem:[%s5995_s8 + $0x48] sm:$0xff]  ;;  %v2421_v10 = vld [vmem:[%s5995_s8 + $0xd0] sm:$0xff]  ;;  %v2407_v18 = vld [vmem:[%s5995_s8 + $0x60] sm:$0xff] }
 0x970   :  { %v3947_v15 = vpop.permute.xlu1 %3946  ;;  %v3942_v20 = vpop.permute.xlu0 %3941 }
 0x971   :  { %v3948_v16 = vunpack.i.l.bf16 %v3947_v15  ;;  %v3944_v21 = vunpack.i.h.bf16 %v3942_v20  ;;  %v3943_v63 = vunpack.i.l.bf16 %v3942_v20  ;;  %2191 = vmatmul.mubr.f32.gmra.mrb[34].mxu0 %v2039_v14  ;;  %v3949_v30 = vunpack.i.h.bf16 %v3947_v15 }
 0x972   :  { %3716 = vmatpush1.bf16.msra.mxu0 %v3715_v61  ;;  %v1995_v61 = vrot.slane %v5429_v11, 6  ;;  %v1998_v20 = vrot.slane %v5453_v25, 6  ;;  %v1997_v14 = vrot.slane %v5447_v22, 6 }
 0x973   :  { %v2044_v6 = vsel %vm224_vm4, %v1951_v12, %v3943_v63  ;;  %3717 = vmatprep.subr.bf16.mxu0 %v3971_v5  ;;  %v2040_v28 = vsel %vm224_vm4, %v5447_v22, %v3944_v21  ;;  %v2045_v36 = vsel %vm224_vm4, %v1953_v35, %v3948_v16  ;;  %v2041_v44 = vsel %vm224_vm4, %v5453_v25, %v3949_v30  ;;  %v2395_v30 = vld [vmem:[%s5995_s8] sm:$0xff] }
 0x974   :  { %2195 = vmatprep.mubr.f32.mxu0 %v2044_v6  ;;  %v2027_v13 = vpop.permute.xlu0 %2026  ;;  %v2029_v15 = vpop.permute.xlu1 %2028  ;;  %v1996_v56 = vsel %vm177_vm1, %v1993_v37, %v1995_v61  ;;  %v1999_v16 = vsel %vm177_vm1, %v1997_v14, %v1998_v20  ;;  %v1973_v21 = vrot.slane %v5447_v22, 4  ;;  %v2000_v63 = vrot.slane %v5456_v26, 6  ;;  %v2413_v37 = vld [vmem:[%s5995_s8 + $0x90] sm:$0xff] }
 0x975   :  { %2196 = vmatmul.mubr.f32.gmra.mrb[36].mxu0 %v2040_v28  ;;  %v2046_v19 = vsel %vm224_vm4, %v1970_v17, %v2027_v13  ;;  %v2047_v11 = vsel %vm224_vm4, %v1972_v52, %v2029_v15  ;;  %v2424_v13 = vld [vmem:[%s5995_s8 + $0xe8] sm:$0xff]  ;;  %v2425_v15 = vld [vmem:[%s5995_s8 + $0xf0] sm:$0xff] }
 0x976   :  { %3719 = vmatpush1.bf16.msra.mxu0 %v3718_v27  ;;  %2200 = vmatprep.mubr.f32.mxu0 %v2045_v36  ;;  %v1975_v12 = vsel %vm152_vm6, %v1973_v21, %v1974_v32  ;;  %v1976_v27 = vrot.slane %v5456_v26, 4  ;;  %v2001_v25 = vsel %vm177_vm1, %v1998_v20, %v2000_v63  ;;  %v2412_v26 = vld [vmem:[%s5995_s8 + $0x88] sm:$0xff]  ;;  %v3771_v17 = vpack.c.bf16 %v2424_v13, %v2423_v48 }
 0x977   :  { %3720 = vmatprep.subr.bf16.mxu0 %v3971_v5  ;;  %v3747_v35 = vpack.c.bf16 %v2412_v26, %v2411_v34  ;;  %v2396_v36 = vld [vmem:[%s5995_s8 + $0x8] sm:$0xff] }
 0x978   :  { %v2031_v42 = vpop.permute.xlu0 %2030  ;;  %v2033_v28 = vpop.permute.xlu1 %2032  ;;  %v1977_v29 = vsel %vm152_vm6, %v1974_v32, %v1976_v27  ;;  %v3749_v3 = vpack.c.bf16 %v2396_v36, %v2395_v30 }
 0x979   :  { %2201 = vmatmul.mubr.f32.gmra.mrb[38].mxu0 %v2041_v44  ;;  %v2048_v6 = vsel %vm224_vm4, %v1975_v12, %v2031_v42  ;;  %v2049_v22 = vsel %vm224_vm4, %v1977_v29, %v2033_v28  ;;  %v2398_v44 = vld [vmem:[%s5995_s8 + $0x18] sm:$0xff]  ;;  %3748 = vmatprep.subr.bf16.mxu1 %v3747_v35  ;;  %v2964_v29 = vld [vmem:[%s5996_s16] ss:$0 sm:$0xff] }
 0x97a   :  { %3722 = vmatpush1.bf16.msra.mxu0 %v3721_v38  ;;  %2965 = vmatprep.mubr.msk.f32.mxu0 %vm224_vm4, %v1994_v45  ;;  %v2414_v38 = vld [vmem:[%s5995_s8 + $0x98] sm:$0xff]  ;;  %v2415_v45 = vld [vmem:[%s5995_s8 + $0xa0] sm:$0xff]  ;;  %v3753_v31 = vpack.c.bf16 %v2398_v44, %v2397_v43 }
 0x97b   :  { %3723 = vmatprep.subr.bf16.mxu0 %v3971_v5  ;;  %v3751_v39 = vpack.c.bf16 %v2414_v38, %v2413_v37  ;;  %3750 = vmatpush3.bf16.msra.mxu1 %v3749_v3  ;;  %v2410_v43 = vld [vmem:[%s5995_s8 + $0x78] sm:$0xff] }
 0x97d   :  { %3752 = vmatprep.subr.bf16.mxu1 %v3751_v39  ;;  %v2409_v39 = vld [vmem:[%s5995_s8 + $0x70] sm:$0xff] }
 0x97e   :  { %3725 = vmatpush1.bf16.msra.mxu0 %v3724_v47  ;;  %v2416_v47 = vld [vmem:[%s5995_s8 + $0xa8] sm:$0xff] }
 0x97f   :  { %3726 = vmatprep.subr.bf16.mxu0 %v3971_v5  ;;  %v3755_v49 = vpack.c.bf16 %v2416_v47, %v2415_v45  ;;  %3754 = vmatpush3.bf16.msra.mxu1 %v3753_v31  ;;  %v3777_v31 = vpack.c.bf16 %v2410_v43, %v2409_v39 }
 0x981   :  { %3756 = vmatprep.subr.bf16.mxu1 %v3755_v49 }
 0x982   :  { %3728 = vmatpush1.bf16.msra.mxu0 %v3727_v50  ;;  %v2399_v50 = vld [vmem:[%s5995_s8 + $0x20] sm:$0xff] }
 0x983   :  { %3729 = vmatprep.subr.bf16.mxu0 %v3971_v5  ;;  %v3757_v57 = vpack.c.bf16 %v2400_v41, %v2399_v50 }
 0x985   :  { %3758 = vmatpush3.bf16.msra.mxu1 %v3757_v57  ;;  %v2428_v57 = vld [vmem:[%s5995_s8 + $0x108] sm:$0xff] }
 0x986   :  { %3731 = vmatpush1.bf16.msra.mxu0 %v3730_v54  ;;  %v2418_v54 = vld [vmem:[%s5995_s8 + $0xb8] sm:$0xff] }
 0x987   :  { %3732 = vmatprep.subr.bf16.mxu0 %v3971_v5  ;;  %v3759_v58 = vpack.c.bf16 %v2418_v54, %v2417_v53  ;;  %v2427_v54 = vld [vmem:[%s5995_s8 + $0x100] sm:$0xff] }
 0x989   :  { %3760 = vmatprep.subr.bf16.mxu1 %v3759_v58 }
 0x98a   :  { %3734 = vmatpush1.bf16.msra.mxu0 %v3733_v59  ;;  %v2401_v59 = vld [vmem:[%s5995_s8 + $0x30] sm:$0xff] }
 0x98b   :  { %3735 = vmatprep.subr.bf16.mxu0 %v3971_v5  ;;  %v3761_v1 = vpack.c.bf16 %v2402_v51, %v2401_v59  ;;  %v5723_v59 = vpack.c.bf16 %v2428_v57, %v2427_v54 }
 0x98d   :  { %3762 = vmatpush3.bf16.msra.mxu1 %v3761_v1 }
 0x98e   :  { %3737 = vmatpush1.bf16.msra.mxu0 %v3736_v62  ;;  %v2420_v62 = vld [vmem:[%s5995_s8 + $0xc8] sm:$0xff] }
 0x98f   :  { %3738 = vmatprep.subr.bf16.mxu0 %v3971_v5  ;;  %v3763_v2 = vpack.c.bf16 %v2420_v62, %v2419_v0 }
 0x991   :  { %3764 = vmatprep.subr.bf16.mxu1 %v3763_v2 }
 0x992   :  { %3740 = vmatpush1.bf16.msra.mxu0 %v3739_v8  ;;  %v2403_v8 = vld [vmem:[%s5995_s8 + $0x40] sm:$0xff] }
 0x993   :  { %3741 = vmatprep.subr.bf16.mxu0 %v3971_v5  ;;  %v3765_v4 = vpack.c.bf16 %v2404_v9, %v2403_v8 }
 0x995   :  { %3766 = vmatpush3.bf16.msra.mxu1 %v3765_v4 }
 0x996   :  { %3743 = vmatpush1.bf16.msra.mxu0 %v3742_v33  ;;  %v2422_v33 = vld [vmem:[%s5995_s8 + $0xd8] sm:$0xff] }
 0x997   :  { %3744 = vmatprep.subr.bf16.mxu0 %v3971_v5  ;;  %v3767_v40 = vpack.c.bf16 %v2422_v33, %v2421_v10 }
 0x999   :  { %3768 = vmatprep.subr.bf16.mxu1 %v3767_v40 }
 0x99a   :  { %3746 = vmatpush1.bf16.msra.mxu0 %v3745_v60  ;;  %v2405_v60 = vld [vmem:[%s5995_s8 + $0x50] sm:$0xff] }
 0x99b   :  { %3795 = vmatprep.subr.bf16.mxu0 %v3971_v5  ;;  %v3769_v61 = vpack.c.bf16 %v2406_v24, %v2405_v60 }
 0x99d   :  { %2271 = vmatmul.mubr.f32.vlgmr.msra.gmra.mrb[40].mxu0 %v2046_v19  ;;  %v2408_v19 = vld [vmem:[%s5995_s8 + $0x68] sm:$0xff]  ;;  %3770 = vmatpush3.bf16.msra.mxu1 %v3769_v61 }
 0x99e   :  { %2966 = vmatprep.mubr.msk.f32.mxu0 %vm224_vm4, %v1996_v56  ;;  %v2426_v56 = vld [vmem:[%s5995_s8 + $0xf8] sm:$0xff]  ;;  %v3773_v20 = vpack.c.bf16 %v2408_v19, %v2407_v18  ;;  %3772 = vmatprep.subr.bf16.mxu1 %v3771_v17 }
 0x99f   :  { %v3775_v52 = vpack.c.bf16 %v2426_v56, %v2425_v15 }
 0x9a1   :  { %2276 = vmatmul.mubr.f32.gmra.mrb[42].mxu0 %v2047_v11  ;;  %3774 = vmatpush3.bf16.msra.mxu1 %v3773_v20 }
 0x9a2   :  { %2967 = vmatprep.mubr.msk.f32.mxu0 %vm224_vm4, %v1999_v16  ;;  %3776 = vmatprep.subr.bf16.mxu1 %v3775_v52 }
 0x9a5   :  { %2281 = vmatmul.mubr.f32.gmra.mrb[44].mxu0 %v2048_v6  ;;  %3778 = vmatpush3.bf16.msra.mxu1 %v3777_v31 }
 0x9a6   :  { %2968 = vmatprep.mubr.msk.f32.mxu0 %vm224_vm4, %v2001_v25  ;;  %3780 = vmatprep.subr.bf16.mxu1 %v5723_v59 }
 0x9a9   :  { %2286 = vmatmul.mubr.f32.gmra.mrb[46].mxu0 %v2049_v22 }
 0xa40   :  { %v3213_v14 = vpop.f32.mrb[32].mxu0 }
 0xa41   :  { %v3214_v32 = vpop.f32.mrb[33].mxu0 }
 0xa42   :  { %v3215_v11 = vadd.f32 %v3214_v32, %v3213_v14 }
 0xa44   :  { %v3216_v42 = vpop.f32.mrb[34].mxu0  ;;  %v2188_v22 = vadd.f32 %v3215_v11, %v2964_v29 }
 0xa45   :  { %v3217_v16 = vpop.f32.mrb[35].mxu0 }
 0xa46   :  { %v3218_v21 = vadd.f32 %v3217_v16, %v3216_v42 }
 0xa48   :  { %v3219_v63 = vpop.f32.mrb[36].mxu0  ;;  %v2193_v36 = vadd.f32 %v3218_v21, %v2964_v29 }
 0xa49   :  { %v3220_v12 = vpop.f32.mrb[37].mxu0 }
 0xa4a   :  { %v3221_v27 = vadd.f32 %v3220_v12, %v3219_v63 }
 0xa4c   :  { %v3222_v6 = vpop.f32.mrb[38].mxu0  ;;  %v2198_v47 = vadd.f32 %v3221_v27, %v2964_v29 }
 0xa4d   :  { %v3223_v28 = vpop.f32.mrb[39].mxu0 }
 0xa4e   :  { %v3224_v25 = vadd.f32 %v3223_v28, %v3222_v6 }
 0xa50   :  { %v2203_v58 = vadd.f32 %v3224_v25, %v2964_v29 }
 0xa70   :  { %v2272_v34 = vpop.f32.mrb[40].mxu0 }
 0xa71   :  { %v2273_v26 = vadd.f32 %v2272_v34, %v2188_v22  ;;  %v2274_v30 = vpop.f32.mrb[41].mxu0 }
 0xa73   :  { %v2291_v35 = vmax.f32 %v2273_v26, 0.0 }
 0xa74   :  { %v2277_v37 = vpop.f32.mrb[42].mxu0 }
 0xa75   :  { %v2278_v38 = vadd.f32 %v2277_v37, %v2193_v36  ;;  %v2279_v3 = vpop.f32.mrb[43].mxu0  ;;  %v2299_v44 = vrot.slane %v2291_v35, 6  ;;  %v2429_v37 = vld [vmem:[%s5995_s8 + $0x110] sm:$0xff] }
 0xa77   :  { %v2292_v45 = vmax.f32 %v2278_v38, 0.0  ;;  %v5726_v51 = vsel %vm177_vm1, 0.0, %v2299_v44  ;;  %v2430_v38 = vld [vmem:[%s5995_s8 + $0x118] sm:$0xff] }
 0xa78   :  { %v2282_v49 = vpop.f32.mrb[44].mxu0  ;;  %v2319_v24 = vrot.slane %v5726_v51, 1  ;;  %v2343_v48 = vrot.slane %v5726_v51, 3  ;;  %v2329_v36 = vrot.slane %v5726_v51, 2  ;;  %v3783_v31 = vpack.c.bf16 %v2430_v38, %v2429_v37  ;;  %v2694_v37 = vld [vmem:[%s5997_s9 + $0x50] sm:$0xff]  ;;  %v2695_v38 = vld [vmem:[%s5997_s9 + $0x58] sm:$0xff] }
 0xa79   :  { %v2300_v50 = vrot.slane %v2292_v45, 6  ;;  %v2283_v41 = vadd.f32 %v2282_v49, %v2198_v47  ;;  %v2284_v53 = vpop.f32.mrb[45].mxu0 }
 0xa7a   :  { %v2432_v53 = vld [vmem:[%s5995_s8 + $0x128] sm:$0xff] }
 0xa7b   :  { %v5729_v0 = vsel %vm177_vm1, %v2299_v44, %v2300_v50  ;;  %v5732_v62 = vsel %vm177_vm1, %v2300_v50, 0.0  ;;  %v2293_v1 = vmax.f32 %v2283_v41, 0.0  ;;  %v2431_v41 = vld [vmem:[%s5995_s8 + $0x120] sm:$0xff] }
 0xa7c   :  { %v2322_v2 = vrot.slane %v5732_v62, 1  ;;  %v2346_v8 = vrot.slane %v5732_v62, 3  ;;  %v2287_v9 = vpop.f32.mrb[46].mxu0  ;;  %v2320_v4 = vrot.slane %v5729_v0, 1  ;;  %v2344_v40 = vrot.slane %v5729_v0, 3 }
 0xa7d   :  { %v2288_v10 = vadd.f32 %v2287_v9, %v2203_v58  ;;  %v2289_v33 = vpop.f32.mrb[47].mxu0  ;;  %v2302_v60 = vrot.slane %v2293_v1, 6  ;;  %v2330_v34 = vrot.slane %v5729_v0, 2  ;;  %v2332_v30 = vrot.slane %v5732_v62, 2 }
 0xa7e   :  { %v2323_v61 = vsel %vm115_vm2, %v2320_v4, %v2322_v2  ;;  %v2347_v17 = vsel %vm141_vm3, %v2344_v40, %v2346_v8  ;;  %v2321_v19 = vsel %vm115_vm2, %v2319_v24, %v2320_v4  ;;  %v2345_v15 = vsel %vm141_vm3, %v2343_v48, %v2344_v40  ;;  %v2433_v40 = vld [vmem:[%s5995_s8 + $0x130] sm:$0xff] }
 0xa7f   :  { %v2294_v13 = vmax.f32 %v2288_v10, 0.0  ;;  %v3955_v18 = vpack.i.bf16 %v2323_v61, %v2347_v17  ;;  %v3950_v20 = vpack.i.bf16 %v2321_v19, %v2345_v15  ;;  %v5746_v52 = vsel %vm177_vm1, 0.0, %v2302_v60 }
 0xa80   :  { %v2324_v63 = vrot.slane %v5746_v52, 1  ;;  %v2348_v12 = vrot.slane %v5746_v52, 3  ;;  %v2331_v44 = vsel %vm126_vm5, %v2329_v36, %v2330_v34  ;;  %v2333_v50 = vsel %vm126_vm5, %v2330_v34, %v2332_v30  ;;  %v2691_v34 = vld [vmem:[%s5997_s9 + $0x38] sm:$0xff]  ;;  %v2692_v30 = vld [vmem:[%s5997_s9 + $0x40] sm:$0xff] }
 0xa81   :  { %v2303_v56 = vrot.slane %v2294_v13, 6  ;;  %3956 = vrot.lane.b32.xlu1 %v3955_v18, %s3972_s22  ;;  %3951 = vrot.lane.b32.xlu0 %v3950_v20, %s3972_s22  ;;  %v2334_v2 = vrot.slane %v5746_v52, 2  ;;  %v3787_v8 = vpack.c.bf16 %v2432_v53, %v2431_v41  ;;  %v2354_v15 = vrot.slane %v5729_v0, 4  ;;  %v2702_v53 = vld [vmem:[%s5997_s9 + $0x90] sm:$0xff] }
 0xa82   :  { %v2356_v20 = vrot.slane %v5732_v62, 4 }
 0xa83   :  { %v5750_v14 = vsel %vm177_vm1, %v2302_v60, %v2303_v56  ;;  %v5753_v32 = vsel %vm177_vm1, %v2303_v56, 0.0  ;;  %v2353_v56 = vrot.slane %v5726_v51, 4 }
 0xa84   :  { %v2327_v11 = vrot.slane %v5753_v32, 1  ;;  %v2351_v42 = vrot.slane %v5753_v32, 3  ;;  %v2325_v16 = vrot.slane %v5750_v14, 1  ;;  %v2349_v21 = vrot.slane %v5750_v14, 3 }
 0xa85   :  { %v2335_v57 = vrot.slane %v5750_v14, 2  ;;  %v2337_v9 = vrot.slane %v5753_v32, 2 }
 0xa86   :  { %v2328_v27 = vsel %vm115_vm2, %v2325_v16, %v2327_v11  ;;  %v2352_v6 = vsel %vm141_vm3, %v2349_v21, %v2351_v42  ;;  %v2326_v28 = vsel %vm115_vm2, %v2324_v63, %v2325_v16  ;;  %v2350_v25 = vsel %vm141_vm3, %v2348_v12, %v2349_v21 }
 0xa87   :  { %v3965_v29 = vpack.i.bf16 %v2328_v27, %v2352_v6  ;;  %v3960_v22 = vpack.i.bf16 %v2326_v28, %v2350_v25  ;;  %v2336_v24 = vsel %vm126_vm5, %v2334_v2, %v2335_v57  ;;  %v2338_v18 = vsel %vm126_vm5, %v2335_v57, %v2337_v9  ;;  %v2687_v27 = vld [vmem:[%s5997_s9 + $0x18] sm:$0xff]  ;;  %v2688_v28 = vld [vmem:[%s5997_s9 + $0x20] sm:$0xff]  ;;  %v2689_v25 = vld [vmem:[%s5997_s9 + $0x28] sm:$0xff] }
 0xa88   :  { %v2355_v42 = vsel %vm152_vm6, %v2353_v56, %v2354_v15  ;;  %v2359_v16 = vrot.slane %v5750_v14, 4  ;;  %v2361_v21 = vrot.slane %v5753_v32, 4  ;;  %v2686_v32 = vld [vmem:[%s5997_s9 + $0x10] sm:$0xff]  ;;  %v2707_v9 = vld [vmem:[%s5997_s9 + $0xb8] sm:$0xff] }
 0xa89   :  { %3966 = vrot.lane.b32.xlu1 %v3965_v29, %s3972_s22  ;;  %3961 = vrot.lane.b32.xlu0 %v3960_v22, %s3972_s22  ;;  %v3799_v6 = vpack.c.bf16 %v2687_v27, %v2686_v32  ;;  %v3802_v29 = vpack.c.bf16 %v2689_v25, %v2688_v28  ;;  %v2690_v22 = vld [vmem:[%s5997_s9 + $0x30] sm:$0xff] }
 0xa8a   :  { %v2362_v63 = vsel %vm152_vm6, %v2359_v16, %v2361_v21 }
 0xaf3   :  { %v3957_v26 = vpop.permute.xlu1 %3956  ;;  %v3952_v35 = vpop.permute.xlu0 %3951 }
 0xaf4   :  { %v3958_v3 = vunpack.i.l.bf16 %v3957_v26  ;;  %v3954_v39 = vunpack.i.h.bf16 %v3952_v35  ;;  %v3953_v43 = vunpack.i.l.bf16 %v3952_v35  ;;  %v3959_v49 = vunpack.i.h.bf16 %v3957_v26  ;;  %v2693_v35 = vld [vmem:[%s5997_s9 + $0x48] sm:$0xff] }
 0xaf5   :  { %v3805_v26 = vpack.c.bf16 %v2691_v34, %v2690_v22  ;;  %v3808_v36 = vpack.c.bf16 %v2693_v35, %v2692_v30 }
 0xaf6   :  { %v2391_v45 = vsel %vm224_vm4, %v2331_v44, %v3953_v43  ;;  %v2387_v47 = vsel %vm224_vm4, %v5726_v51, %v3954_v39  ;;  %v2392_v54 = vsel %vm224_vm4, %v2333_v50, %v3958_v3  ;;  %v2388_v4 = vsel %vm224_vm4, %v5729_v0, %v3959_v49  ;;  %v2696_v39 = vld [vmem:[%s5997_s9 + $0x60] sm:$0xff]  ;;  %v2697_v43 = vld [vmem:[%s5997_s9 + $0x68] sm:$0xff] }
 0xaf7   :  { %2514 = vmatprep.mubr.f32.mxu1 %v2391_v45  ;;  %v2358_v0 = vrot.slane %v5746_v52, 4  ;;  %v2357_v51 = vsel %vm152_vm6, %v2354_v15, %v2356_v20  ;;  %v3811_v3 = vpack.c.bf16 %v2695_v38, %v2694_v37  ;;  %v3814_v44 = vpack.c.bf16 %v2697_v43, %v2696_v39  ;;  %v2698_v45 = vld [vmem:[%s5997_s9 + $0x70] sm:$0xff]  ;;  %v2700_v49 = vld [vmem:[%s5997_s9 + $0x80] sm:$0xff]  ;;  %v2701_v50 = vld [vmem:[%s5997_s9 + $0x88] sm:$0xff] }
 0xaf8   :  { %2515 = vmatmul.mubr.f32.vlgmr.msra.gmra.mrb[40].mxu1 %v2387_v47  ;;  %v2699_v47 = vld [vmem:[%s5997_s9 + $0x78] sm:$0xff]  ;;  %v3820_v41 = vpack.c.bf16 %v2701_v50, %v2700_v49 }
 0xaf9   :  { %3782 = vmatpush3.bf16.msra.mxu1 %v5723_v59  ;;  %2519 = vmatprep.mubr.f32.mxu1 %v2392_v54  ;;  %v2434_v59 = vld [vmem:[%s5995_s8 + $0x138] sm:$0xff]  ;;  %v2360_v62 = vsel %vm152_vm6, %v2358_v0, %v2359_v16 }
 0xafa   :  { %3784 = vmatprep.subr.bf16.mxu1 %v3783_v31  ;;  %v3791_v61 = vpack.c.bf16 %v2434_v59, %v2433_v40  ;;  %v2703_v54 = vld [vmem:[%s5997_s9 + $0x98] sm:$0xff] }
 0xafb   :  { %v3967_v58 = vpop.permute.xlu1 %3966  ;;  %v3962_v1 = vpop.permute.xlu0 %3961  ;;  %v3823_v57 = vpack.c.bf16 %v2703_v54, %v2702_v53 }
 0xafc   :  { %v3964_v10 = vunpack.i.h.bf16 %v3962_v1  ;;  %v3963_v33 = vunpack.i.l.bf16 %v3962_v1  ;;  %v3968_v60 = vunpack.i.l.bf16 %v3967_v58  ;;  %2520 = vmatmul.mubr.f32.gmra.mrb[42].mxu1 %v2388_v4  ;;  %v3969_v17 = vunpack.i.h.bf16 %v3967_v58  ;;  %v2704_v58 = vld [vmem:[%s5997_s9 + $0xa0] sm:$0xff]  ;;  %v2705_v1 = vld [vmem:[%s5997_s9 + $0xa8] sm:$0xff] }
 0xafd   :  { %3786 = vmatpush3.bf16.msra.mxu1 %v3783_v31  ;;  %v3817_v31 = vpack.c.bf16 %v2699_v47, %v2698_v45  ;;  %v3826_v2 = vpack.c.bf16 %v2705_v1, %v2704_v58 }
 0xafe   :  { %v2393_v48 = vsel %vm224_vm4, %v2336_v24, %v3963_v33  ;;  %v2389_v13 = vsel %vm224_vm4, %v5746_v52, %v3964_v10  ;;  %3788 = vmatprep.subr.bf16.mxu1 %v3787_v8  ;;  %v2394_v19 = vsel %vm224_vm4, %v2338_v18, %v3968_v60  ;;  %v2390_v11 = vsel %vm224_vm4, %v5750_v14, %v3969_v17  ;;  %v2684_v52 = vld [vmem:[%s5997_s9] sm:$0xff]  ;;  %v2685_v14 = vld [vmem:[%s5997_s9 + $0x8] sm:$0xff] }
 0xaff   :  { %2524 = vmatprep.mubr.f32.mxu1 %v2393_v48  ;;  %v3796_v12 = vpack.c.bf16 %v2685_v14, %v2684_v52 }
 0xb00   :  { %2525 = vmatmul.mubr.f32.gmra.mrb[44].mxu1 %v2389_v13 }
 0xb01   :  { %3790 = vmatpush3.bf16.msra.mxu1 %v3787_v8  ;;  %2529 = vmatprep.mubr.f32.mxu1 %v2394_v19  ;;  %v2706_v8 = vld [vmem:[%s5997_s9 + $0xb0] sm:$0xff]  ;;  %v2969_v19 = vld [vmem:[%s5998_s17] ss:$0 sm:$0xff] }
 0xb02   :  { %3792 = vmatprep.subr.bf16.mxu1 %v3791_v61  ;;  %3797 = vmatpush1.bf16.msra.mxu0 %v3796_v12  ;;  %v3829_v10 = vpack.c.bf16 %v2707_v9, %v2706_v8 }
 0xb03   :  { %3798 = vmatprep.subr.bf16.mxu0 %v3971_v5 }
 0xb04   :  { %2530 = vmatmul.mubr.f32.gmra.mrb[46].mxu1 %v2390_v11 }
 0xb05   :  { %3794 = vmatpush3.bf16.msra.mxu1 %v3791_v61  ;;  %3350 = vmatprep.mubr.msk.f32.mxu1 %vm224_vm4, %v2355_v42 }
 0xb06   :  { %3831 = vmatprep.subr.bf16.mxu1 %v3971_v5  ;;  %3800 = vmatpush1.bf16.msra.mxu0 %v3799_v6 }
 0xb07   :  { %3801 = vmatprep.subr.bf16.mxu0 %v3971_v5 }
 0xb08   :  { %3351 = vmatmul.mubr.msk.f32.vlgmr.msra.gmra.mrb[48].mxu1 %vm224_vm4, %v2357_v51 }
 0xb09   :  { %3353 = vmatprep.mubr.msk.f32.mxu1 %vm224_vm4, %v2360_v62 }
 0xb0a   :  { %3803 = vmatpush1.bf16.msra.mxu0 %v3802_v29 }
 0xb0b   :  { %3804 = vmatprep.subr.bf16.mxu0 %v3971_v5 }
 0xb0c   :  { %3354 = vmatmul.mubr.msk.f32.gmra.mrb[50].mxu1 %vm224_vm4, %v2362_v63 }
 0xb0e   :  { %3806 = vmatpush1.bf16.msra.mxu0 %v3805_v26 }
 0xb0f   :  { %3807 = vmatprep.subr.bf16.mxu0 %v3971_v5 }
 0xb12   :  { %3809 = vmatpush1.bf16.msra.mxu0 %v3808_v36 }
 0xb13   :  { %3810 = vmatprep.subr.bf16.mxu0 %v3971_v5 }
 0xb16   :  { %3812 = vmatpush1.bf16.msra.mxu0 %v3811_v3 }
 0xb17   :  { %3813 = vmatprep.subr.bf16.mxu0 %v3971_v5 }
 0xb1a   :  { %3815 = vmatpush1.bf16.msra.mxu0 %v3814_v44 }
 0xb1b   :  { %3816 = vmatprep.subr.bf16.mxu0 %v3971_v5 }
 0xb1e   :  { %3818 = vmatpush1.bf16.msra.mxu0 %v3817_v31 }
 0xb1f   :  { %3819 = vmatprep.subr.bf16.mxu0 %v3971_v5 }
 0xb22   :  { %3821 = vmatpush1.bf16.msra.mxu0 %v3820_v41 }
 0xb23   :  { %3822 = vmatprep.subr.bf16.mxu0 %v3971_v5 }
 0xb26   :  { %3824 = vmatpush1.bf16.msra.mxu0 %v3823_v57 }
 0xb27   :  { %3825 = vmatprep.subr.bf16.mxu0 %v3971_v5 }
 0xb2a   :  { %3827 = vmatpush1.bf16.msra.mxu0 %v3826_v2 }
 0xb2b   :  { %3828 = vmatprep.subr.bf16.mxu0 %v3971_v5 }
 0xb2e   :  { %3830 = vmatpush1.bf16.msra.mxu0 %v3829_v10 }
 0xbcb   :  { %v3257_v33 = vpop.f32.mrb[40].mxu1 }
 0xbcc   :  { %v3258_v4 = vpop.f32.mrb[41].mxu1 }
 0xbcd   :  { %v3259_v40 = vadd.f32 %v3258_v4, %v3257_v33 }
 0xbcf   :  { %v3260_v59 = vpop.f32.mrb[42].mxu1  ;;  %v2517_v11 = vadd.f32 %v3259_v40, %v2969_v19 }
 0xbd0   :  { %v3261_v60 = vpop.f32.mrb[43].mxu1 }
 0xbd1   :  { %v3262_v24 = vadd.f32 %v3261_v60, %v3260_v59 }
 0xbd3   :  { %v3263_v48 = vpop.f32.mrb[44].mxu1  ;;  %v2522_v56 = vadd.f32 %v3262_v24, %v2969_v19 }
 0xbd4   :  { %v3264_v13 = vpop.f32.mrb[45].mxu1 }
 0xbd5   :  { %v3265_v61 = vadd.f32 %v3264_v13, %v3263_v48 }
 0xbd7   :  { %v3266_v17 = vpop.f32.mrb[46].mxu1  ;;  %v2527_v52 = vadd.f32 %v3265_v61, %v2969_v19  ;;  %v2837_v61 = vld [vmem:[%s5999_s19] sm:$0xff] }
 0xbd8   :  { %v3267_v18 = vpop.f32.mrb[47].mxu1 }
 0xbd9   :  { %v3268_v15 = vadd.f32 %v3267_v18, %v3266_v17  ;;  %v2838_v17 = vld [vmem:[%s5999_s19 + $0x8] sm:$0xff] }
 0xbda   :  { %v3832_v18 = vpack.c.bf16 %v2838_v17, %v2837_v61 }
 0xbdb   :  { %v3352_v20 = vpop.f32.mrb[48].mxu1  ;;  %v2532_v51 = vadd.f32 %v3268_v15, %v2969_v19  ;;  %v2839_v19 = vld [vmem:[%s5999_s19 + $0x10] sm:$0xff]  ;;  %v2840_v15 = vld [vmem:[%s5999_s19 + $0x18] sm:$0xff] }
 0xbdc   :  { %v2607_v42 = vadd.f32 %v3352_v20, %v2522_v56  ;;  %v2601_v16 = vpop.f32.mrb[49].mxu1  ;;  %3833 = vmatpush3.bf16.msra.mxu1 %v3832_v18  ;;  %v3835_v56 = vpack.c.bf16 %v2840_v15, %v2839_v19  ;;  %v2841_v20 = vld [vmem:[%s5999_s19 + $0x20] sm:$0xff] }
 0xbdd   :  { %v2602_v0 = vadd.f32 %v2601_v16, %v2517_v11  ;;  %3834 = vmatprep.subr.bf16.mxu1 %v3971_v5  ;;  %v2842_v11 = vld [vmem:[%s5999_s19 + $0x28] sm:$0xff]  ;;  %v2843_v16 = vld [vmem:[%s5999_s19 + $0x30] sm:$0xff] }
 0xbde   :  { %v2621_v21 = vmax.f32 %v2607_v42, 0.0  ;;  %v3838_v42 = vpack.c.bf16 %v2842_v11, %v2841_v20 }
 0xbdf   :  { %v2620_v62 = vmax.f32 %v2602_v0, 0.0  ;;  %v3355_v63 = vpop.f32.mrb[50].mxu1  ;;  %v2844_v0 = vld [vmem:[%s5999_s19 + $0x38] sm:$0xff] }
 0xbe0   :  { %v2629_v14 = vrot.slane %v2621_v21, 7  ;;  %v2617_v32 = vadd.f32 %v3355_v63, %v2532_v51  ;;  %v2611_v12 = vpop.f32.mrb[51].mxu1  ;;  %3836 = vmatpush3.bf16.msra.mxu1 %v3835_v56  ;;  %v3974_v21 = vmov 0.0   ;;  %v3841_v51 = vpack.c.bf16 %v2844_v0, %v2843_v16  ;;  %v2974_v63 = vld [vmem:[%s6001_s18] ss:$0 sm:$0xff] }
 0xbe1   :  { %v2628_v27 = vrot.slane %v2620_v62, 7  ;;  %v2612_v6 = vadd.f32 %v2611_v12, %v2527_v52  ;;  %3837 = vmatprep.subr.bf16.mxu1 %v3971_v5  ;;  %3372 = vmatprep.mubr.msk.f32.mxu1 %vm3973_vm8, %v3974_v21  ;;  %v26_v62 = vstv %s6000_s20 }
 0xbe2   :  { %v2642_v28 = vsel %vm815_vm7, %v2629_v14, 0.0  ;;  %v2623_v25 = vmax.f32 %v2617_v32, 0.0  ;;  %27 = vst [vmem:[#allocation2] sm:$0x1] %v26_v62 }
 0xbe3   :  { %v2651_v29 = vrot.slane %v2642_v28, 1  ;;  %v2661_v22 = vrot.slane %v2642_v28, 2  ;;  %v2630_v34 = vsel %vm815_vm7, %v2628_v27, %v2629_v14  ;;  %v2640_v26 = vsel %vm815_vm7, 0.0, %v2628_v27 }
 0xbe4   :  { %v2648_v30 = vrot.slane %v2640_v26, 1  ;;  %v2658_v35 = vrot.slane %v2640_v26, 2  ;;  %v2632_v36 = vrot.slane %v2623_v25, 7  ;;  %v2622_v37 = vmax.f32 %v2612_v6, 0.0  ;;  %3839 = vmatpush3.bf16.msra.mxu1 %v3838_v42 }
 0xbe5   :  { %v2659_v38 = vrot.slane %v2630_v34, 2  ;;  %v2649_v3 = vrot.slane %v2630_v34, 1  ;;  %3840 = vmatprep.subr.bf16.mxu1 %v3971_v5 }
 0xbe6   :  { %v2643_v39 = vsel %vm815_vm7, %v2632_v36, 0.0  ;;  %v2631_v43 = vrot.slane %v2622_v37, 7 }
 0xbe7   :  { %v2656_v44 = vrot.slane %v2643_v39, 1  ;;  %v2660_v45 = vsel %vm126_vm5, %v2658_v35, %v2659_v38  ;;  %v2652_v47 = vsel %vm115_vm2, %v2649_v3, %v2651_v29  ;;  %v2650_v50 = vsel %vm115_vm2, %v2648_v30, %v2649_v3 }
 0xbe8   :  { %v2633_v31 = vsel %vm815_vm7, %v2631_v43, %v2632_v36  ;;  %v2641_v49 = vsel %vm815_vm7, 0.0, %v2631_v43  ;;  %2975 = vmatprep.mubr.msk.f32.mxu0 %vm224_vm4, %v2660_v45  ;;  %2670 = vrot.lane.b32.xlu1 %v2652_v47, %s3972_s22  ;;  %v2662_v41 = vsel %vm126_vm5, %v2659_v38, %v2661_v22  ;;  %v2666_v4 = vrot.slane %v2643_v39, 2 }
 0xbe9   :  { %v2653_v53 = vrot.slane %v2641_v49, 1  ;;  %2668 = vrot.lane.b32.xlu0 %v2650_v50, %s3972_s22  ;;  %v2654_v54 = vrot.slane %v2633_v31, 1  ;;  %v2663_v8 = vrot.slane %v2641_v49, 2  ;;  %v2664_v10 = vrot.slane %v2633_v31, 2  ;;  %3842 = vmatpush3.bf16.msra.mxu1 %v3841_v51 }
 0xbeb   :  { %v2657_v57 = vsel %vm115_vm2, %v2654_v54, %v2656_v44  ;;  %v2655_v58 = vsel %vm115_vm2, %v2653_v53, %v2654_v54  ;;  %v2665_v59 = vsel %vm126_vm5, %v2663_v8, %v2664_v10  ;;  %v2667_v48 = vsel %vm126_vm5, %v2664_v10, %v2666_v4 }
 0xbec   :  { %2674 = vrot.lane.b32.xlu1 %v2657_v57, %s3972_s22 }
 0xbed   :  { %2672 = vrot.lane.b32.xlu0 %v2655_v58, %s3972_s22 }
 0xc5a   :  { %v2671_v9 = vpop.permute.xlu1 %2670 }
 0xc5b   :  { %v2669_v1 = vpop.permute.xlu0 %2668  ;;  %v2681_v33 = vsel %vm224_vm4, %v2630_v34, %v2671_v9 }
 0xc5c   :  { %v2680_v2 = vsel %vm224_vm4, %v2640_v26, %v2669_v1 }
 0xc5d   :  { %2788 = vmatmul.mubr.f32.vlgmr.msra.gmra.mrb[48].mxu0 %v2680_v2 }
 0xc5e   :  { %2976 = vmatprep.mubr.msk.f32.mxu0 %vm224_vm4, %v2662_v41  ;;  %v2675_v24 = vpop.permute.xlu1 %2674 }
 0xc5f   :  { %v2673_v40 = vpop.permute.xlu0 %2672  ;;  %v2683_v13 = vsel %vm224_vm4, %v2633_v31, %v2675_v24 }
 0xc60   :  { %v2682_v60 = vsel %vm224_vm4, %v2641_v49, %v2673_v40 }
 0xc61   :  { %2793 = vmatmul.mubr.f32.gmra.mrb[50].mxu0 %v2681_v33 }
 0xc62   :  { %2977 = vmatprep.mubr.msk.f32.mxu0 %vm224_vm4, %v2665_v59 }
 0xc65   :  { %2798 = vmatmul.mubr.f32.gmra.mrb[52].mxu0 %v2682_v60 }
 0xc66   :  { %2978 = vmatprep.mubr.msk.f32.mxu0 %vm224_vm4, %v2667_v48 }
 0xc69   :  { %2803 = vmatmul.mubr.f32.gmra.mrb[54].mxu0 %v2683_v13 }
 0xd30   :  { %v2789_v52 = vpop.f32.mrb[48].mxu0 }
 0xd31   :  { %v2790_v14 = vadd.f32 %v2974_v63, %v2789_v52  ;;  %v2791_v32 = vpop.f32.mrb[49].mxu0 }
 0xd33   :  { %v2808_v12 = vmax.f32 %v2790_v14, 0.0 }
 0xd34   :  { %v2794_v27 = vpop.f32.mrb[50].mxu0 }
 0xd35   :  { %v2795_v6 = vadd.f32 %v2974_v63, %v2794_v27  ;;  %v2796_v28 = vpop.f32.mrb[51].mxu0  ;;  %v2812_v25 = vadd.f32 %v2808_v12, %v5406_v55 }
 0xd37   :  { %v2809_v29 = vmax.f32 %v2795_v6, 0.0  ;;  %v2816_v30 = vsel %vm224_vm4, %v2812_v25, 0.0 }
 0xd38   :  { %v2799_v22 = vpop.f32.mrb[52].mxu0 }
 0xd39   :  { %v2813_v34 = vadd.f32 %v2809_v29, %v5419_v46  ;;  %v2800_v5 = vadd.f32 %v2974_v63, %v2799_v22  ;;  %v2801_v26 = vpop.f32.mrb[53].mxu0 }
 0xd3b   :  { %v2817_v35 = vsel %vm224_vm4, %v2813_v34, 0.0  ;;  %v2810_v36 = vmax.f32 %v2800_v5, 0.0 }
 0xd3c   :  { %v2818_v37 = vadd.f32 %v2817_v35, %v2816_v30  ;;  %v2804_v38 = vpop.f32.mrb[54].mxu0 }
 0xd3d   :  { %v2805_v3 = vadd.f32 %v2974_v63, %v2804_v38  ;;  %v2806_v39 = vpop.f32.mrb[55].mxu0  ;;  %v2814_v44 = vadd.f32 %v2810_v36, %v5432_v23 }
 0xd3e   :  { %v2819_v43 = vrot.slane %v2818_v37, 4 }
 0xd3f   :  { %v2811_v45 = vmax.f32 %v2805_v3, 0.0  ;;  %v2825_v46 = vsel %vm224_vm4, %v2814_v44, 0.0 }
 0xd40   :  { %v2820_v55 = vadd.f32 %v2819_v43, %v2818_v37 }
 0xd41   :  { %v2815_v47 = vadd.f32 %v2811_v45, %v5444_v7  ;;  %v2979_v7 = vld [vmem:[#allocation2] ss:$0 sm:$0xff] }
 0xd42   :  { %v2821_v31 = vrot.slane %v2820_v55, 2 }
 0xd43   :  { %v2826_v49 = vsel %vm224_vm4, %v2815_v47, 0.0 }
 0xd44   :  { %v2827_v50 = vadd.f32 %v2826_v49, %v2825_v46  ;;  %v2822_v41 = vadd.f32 %v2821_v31, %v2820_v55 }
 0xd46   :  { %v2828_v53 = vrot.slane %v2827_v50, 4  ;;  %v2823_v57 = vrot.slane %v2822_v41, 1 }
 0xd48   :  { %v2829_v54 = vadd.f32 %v2828_v53, %v2827_v50  ;;  %v2824_v2 = vadd.f32 %v2823_v57, %v2822_v41 }
 0xd4a   :  { %v2830_v58 = vrot.slane %v2829_v54, 2  ;;  %v2835_v23 = vmul.f32 0.0625, %v2824_v2 }
 0xd4c   :  { %v2831_v1 = vadd.f32 %v2830_v58, %v2829_v54 }
 0xd4e   :  { %v2832_v8 = vrot.slane %v2831_v1, 1 }
 0xd50   :  { %v2833_v9 = vadd.f32 %v2832_v8, %v2831_v1 }
 0xd52   :  { %v2836_v10 = vmul.f32 0.0625, %v2833_v9 }
 0xd54   :  { %v2855_v33 = vsel %vm2854_vm9, %v2836_v10, %v2835_v23 }
 0xd55   :  { %3373 = vmatmul.mubr.msk.f32.vlgmr.msra.gmra.mrb[52].mxu1 %vm224_vm4, %v2855_v33 }
 0xe28   :  { %v2924_v4 = vpop.f32.mrb[52].mxu1 }
 0xe29   :  { %v2925_v40 = vadd.f32 %v2979_v7, %v2924_v4  ;;  %v3374_v59 = vpop.f32.mrb[53].mxu1 }
 0xe2b   :  { %2929 = vst.msk [vmem:[%s6002_s21] sm:$0x3] %vm2928_vm10, %v2925_v40 }

</bundles_post_ra>
